<compile_context>
chip_gen: v5e
topology: v5e:2x2
jax: 0.10.0
libtpu: 0.0.40
codegen_flags: <defaults>
</compile_context>

<pallas_src>
import functools

import jax
import jax.numpy as jnp
from jax.experimental import pallas as pl
from jax.experimental.pallas import tpu as pltpu


# ----------------------------- generation-aware VMEM budget ----------------------------
def _vmem_phys_bytes():
    try:
        info = pltpu.get_tpu_info()
        v = int(getattr(info, "vmem_capacity_bytes", 0) or 0)
        if v > 0:
            return v
    except Exception:
        pass
    return 64 * 1024 * 1024  # conservative default (v7x physical VMEM)


_VMEM_PHYS = _vmem_phys_bytes()
_VMEM_LIMIT = max(16 * 1024 * 1024, min(int(_VMEM_PHYS * 0.75), 100 * 1024 * 1024))
_CONV_VMEM_BUDGET = int(_VMEM_LIMIT * 0.8)


# ----------------------- fused 3x3 conv Pallas kernel (hot path) -----------------------
# Input is padded (top=1, bottom=2, left=1, right=1) and flattened to ((H+3)*Wp, Cin)
# with Wp = W + 2, so tap (dy, dx) is the contiguous row offset dy*Wp + dx.  The kernel
# produces H*Wp output rows; the 2 wrap-around columns per image row are zeroed so the
# flat output can be re-padded directly into the next conv's padded-flat input.

def _conv3x3_kernel(x_ref, w_ref, b_ref, o_ref, *, H, Wp, Cin, relu):
    # x_ref: ((H+3)*Wp, Cin) bf16    w_ref: (9*Cin, tn) bf16
    # b_ref: (1, tn) f32             o_ref: (H*Wp, tn) bf16
    M = H * Wp
    acc = jnp.dot(x_ref[0:M, :], w_ref[0:Cin, :], preferred_element_type=jnp.float32)
    for t in range(1, 9):
        dy, dx = divmod(t, 3)
        off = dy * Wp + dx
        acc = acc + jnp.dot(x_ref[off:off + M, :],
                            w_ref[t * Cin:(t + 1) * Cin, :],
                            preferred_element_type=jnp.float32)
    r = acc + b_ref[...]
    if relu:
        r = jnp.maximum(r, 0.0)
    # zero the 2 wrap columns (q mod Wp in {W, W+1}) so chaining stays valid
    col = jax.lax.broadcasted_iota(jnp.int32, (M, 1), 0) % Wp
    r = jnp.where(col < (Wp - 2), r, 0.0)
    o_ref[...] = r.astype(o_ref.dtype)


def _conv_vmem_bytes(H, W, Cin, tn):
    Wp = W + 2
    x_blk = (H + 3) * Wp * Cin * 2   # bf16
    w_blk = 9 * Cin * tn * 2         # bf16
    o_blk = H * Wp * tn * 2          # bf16
    return 2 * (x_blk + w_blk + o_blk)   # double buffered


def _conv3x3_pallas(x_flat, w_flat, bias_row, *, H, W, relu=True):
    """x_flat: (N, (H+3)*Wp, Cin) bf16; w_flat: (9*Cin, Cout) bf16; bias: (1, Cout) f32.
    Returns (N, H*Wp, Cout) bf16 with wrap columns zeroed."""
    N, L, Cin = x_flat.shape
    Cout = w_flat.shape[1]
    Wp = W + 2
    M = H * Wp
    tn = min(256, Cout)
    return pl.pallas_call(
        functools.partial(_conv3x3_kernel, H=H, Wp=Wp, Cin=Cin, relu=relu),
        out_shape=jax.ShapeDtypeStruct((N, M, Cout), jnp.bfloat16),
        grid_spec=pltpu.PrefetchScalarGridSpec(
            num_scalar_prefetch=0,
            # Cout tile is the OUTER axis so the weight block index is unchanged across
            # the inner batch axis -> weights DMA'd once per Cout tile (stationary).
            grid=(Cout // tn, N),
            in_specs=[
                pl.BlockSpec((None, L, Cin), lambda j, b: (b, 0, 0)),
                pl.BlockSpec((9 * Cin, tn), lambda j, b: (0, j)),
                pl.BlockSpec((1, tn), lambda j, b: (0, j)),
            ],
            out_specs=pl.BlockSpec((None, M, tn), lambda j, b: (b, 0, j)),
        ),
        compiler_params=pltpu.CompilerParams(
            dimension_semantics=("parallel", "parallel"),
            vmem_limit_bytes=_VMEM_LIMIT),
    )(x_flat, w_flat, bias_row)


def _conv3x3_xla(x_nhwc, w_flat, bias_row, relu=True):
    """XLA-native conv for shapes the fused kernel does not cover well (Cin=3 stem,
    or images whose per-sample block would not fit the VMEM budget)."""
    Cin = w_flat.shape[0] // 9
    Cout = w_flat.shape[1]
    w = w_flat.reshape(3, 3, Cin, Cout)
    y = jax.lax.conv_general_dilated(
        x_nhwc.astype(jnp.bfloat16), w.astype(jnp.bfloat16),
        window_strides=(1, 1), padding="SAME",
        dimension_numbers=("NHWC", "HWIO", "NHWC"),
        preferred_element_type=jnp.float32)
    y = y + bias_row.reshape(1, 1, 1, -1)
    if relu:
        y = jnp.maximum(y, 0.0)
    return y.astype(jnp.bfloat16)


# ------------------------------ padded-flat layout helpers -----------------------------
def _to_padded_flat(x_nhwc):
    N, H, W, C = x_nhwc.shape
    xp = jnp.pad(x_nhwc.astype(jnp.bfloat16), ((0, 0), (1, 2), (1, 1), (0, 0)))
    return xp.reshape(N, (H + 3) * (W + 2), C)


def _flat_to_nhwc(y_flat, H, W):
    N, _, C = y_flat.shape
    Wp = W + 2
    return y_flat.reshape(N, H, Wp, C)[:, :, :W, :]


def _reflatten_padded(y_flat, H, W):
    # With wrap columns zeroed in-kernel, the flat conv output becomes the next conv's
    # padded-flat input with a single pad: data (y,x) moves from q=y*Wp+x to
    # p=(y+1)*Wp+(x+1) = q + Wp + 1; every remaining position is a zero pad position.
    Wp = W + 2
    return jnp.pad(y_flat, ((0, 0), (Wp + 1, 2 * Wp - 1), (0, 0)))


def conv_run(x_nhwc, names, P):
    """A run of consecutive 3x3 conv+ReLU layers at one spatial resolution.  Consecutive
    Pallas convs are chained in padded-flat layout (no unpad / column-slice / re-pad
    HBM glue between layers)."""
    H, W = x_nhwc.shape[1], x_nhwc.shape[2]
    kind, val = "nhwc", x_nhwc
    for name in names:
        w, b = P["w" + name], P["b" + name]
        Cin, Cout = w.shape[0] // 9, w.shape[1]
        tn = min(256, Cout)
        fused = (Cin >= 16 and Cout % tn == 0
                 and _conv_vmem_bytes(H, W, Cin, tn) <= _CONV_VMEM_BUDGET)
        if fused:
            flat = _to_padded_flat(val) if kind == "nhwc" else _reflatten_padded(val, H, W)
            val = _conv3x3_pallas(flat, w, b, H=H, W=W, relu=True)
            kind = "flat"
        else:
            if kind == "flat":
                val = _flat_to_nhwc(val, H, W)
            val = _conv3x3_xla(val, w, b, relu=True)
            kind = "nhwc"
    return _flat_to_nhwc(val, H, W) if kind == "flat" else val


def maxpool2(x):
    N, H, W, C = x.shape
    return x.reshape(N, H // 2, 2, W // 2, 2, C).max(axis=(2, 4))


# ----------------------------------- VGG19 slices ---------------------------------------
def slice1(x, P):
    return conv_run(x, ["0"], P)


def slice2(x, P):
    x = conv_run(x, ["2"], P)
    return conv_run(maxpool2(x), ["5"], P)


def slice3(x, P):
    x = conv_run(x, ["7"], P)
    return conv_run(maxpool2(x), ["10"], P)


def slice4(x, P):
    x = conv_run(x, ["12", "14", "16"], P)
    return conv_run(maxpool2(x), ["19", "21"], P)


# ----------------------------------- CoAttention ----------------------------------------
def _l2_normalize(x, eps=1e-12):  # F.normalize along the channel dim
    n = jnp.sqrt(jnp.sum(x * x, axis=-1, keepdims=True))
    return x / jnp.maximum(n, eps)


def coattention(qa, qb, P):
    """CoAttention.forward -> (Za, Zb, Qa_1, Qb_1).  All matmuls are tiny (HW<=64,
    d<=32, 1-wide projections) so they stay on XLA.  Index order verified against
    torch: L=bmm(Qb_low^T,Qa_low), Za=bmm(Qb_,Aa), Zb=bmm(Qa_,Aa^T)."""
    qa = qa.astype(jnp.float32)
    qb = qb.astype(jnp.float32)
    N, H, W, C = qa.shape
    HW = H * W
    qa_f = qa.reshape(N, HW, C)
    qb_f = qb.reshape(N, HW, C)

    # forward_sa: 1-channel projections + softmax over HW, elementwise re-weighting.
    aa = jnp.einsum('npc,cd->npd', qa_f, P["proj1_w"]) + P["proj1_b"]
    ab = jnp.einsum('npc,cd->npd', qb_f, P["proj2_w"]) + P["proj2_b"]
    aa = jax.nn.softmax(aa[..., 0], axis=-1)[..., None]
    ab = jax.nn.softmax(ab[..., 0], axis=-1)[..., None]
    qa1 = aa * qa_f
    qb1 = ab * qb_f

    # forward_co (on the attended features).
    qa_low = jnp.einsum('npc,cd->npd', qa1, P["proja_w"]) + P["proja_b"]
    qb_low = jnp.einsum('npc,cd->npd', qb1, P["projb_w"]) + P["projb_b"]
    L = jnp.einsum('nid,njd->nij', qb_low, qa_low)
    Aa = jnp.tanh(L)
    za = jnp.einsum('nij,nic->njc', Aa, qb1)          # Za = bmm(Qb_, Aa)
    zb = jnp.einsum('nji,nic->njc', Aa, qa1)          # Zb = bmm(Qa_, Aa^T)

    za = _l2_normalize(za).reshape(N, H, W, C)
    zb = _l2_normalize(zb).reshape(N, H, W, C)
    return za, zb, qa1.reshape(N, H, W, C), qb1.reshape(N, H, W, C)


# ------------------------------- full VGGAttn forward -----------------------------------
def vgg_attn_forward(content_nchw, style_nchw, params, output_last_feature=False):
    content = jnp.transpose(content_nchw, (0, 2, 3, 1)).astype(jnp.float32)
    style = jnp.transpose(style_nchw, (0, 2, 3, 1)).astype(jnp.float32)
    N = content.shape[0]
    vgg = params["vgg"]  # both "pretrained" VGG copies share one weight set

    # Content + style batched through the shared slices: conv weights fetched once/layer.
    x = jnp.concatenate([content, style], axis=0)
    x1 = slice1(x, vgg)
    x2 = slice2(x1, vgg)
    x3 = slice3(x2, vgg)
    h1, h2 = x1[:N], x2[:N]
    h3 = x3[:N].astype(jnp.float32)
    h3_2 = x3[N:].astype(jnp.float32)

    _, Zb, _, Qb = coattention(h3, h3_2, params["coa_res2"])
    h3n = jax.nn.relu(Zb + h3 + Qb)
    h3_2n = jax.nn.relu(Qb + h3_2)

    # slice4 over [h3', h3_2', original h3_2] in one batched pass (weights once):
    # gives h4, h4_2 and h4_r (= slice4 of the pre-coattention style features).
    x4 = slice4(jnp.concatenate([h3n, h3_2n, h3_2], axis=0), vgg)
    h4 = x4[:N].astype(jnp.float32)
    h4_2 = x4[N:2 * N].astype(jnp.float32)
    h4_r = x4[2 * N:].astype(jnp.float32)

    _, Zb, _, Qb = coattention(h4, h4_2, params["coa_res3"])
    h4 = jax.nn.relu(Zb + h4)
    # (torch also computes h4_2 = relu(Qb + h4_2); it is dead code and skipped here)

    # adain_mean(h4, h4_r) == h4 + per-(batch,channel) spatial mean of h4_r
    h4 = h4 + jnp.mean(h4_r, axis=(1, 2), keepdims=True)

    if output_last_feature:
        return h4
    return h1, h2, h3n, h4


# ------------------------- deterministic parameter init / prep --------------------------
def _init_conv(key, cin, cout, ksize):
    kw, kb = jax.random.split(key)
    fan_in = cin * ksize * ksize
    bound = 1.0 / (fan_in ** 0.5)
    if ksize == 3:
        w = jax.random.uniform(kw, (3, 3, cin, cout), jnp.float32, -bound, bound)
    else:
        w = jax.random.uniform(kw, (cin, cout), jnp.float32, -bound, bound)
    b = jax.random.uniform(kb, (cout,), jnp.float32, -bound, bound)
    return w, b


def init_params(key):
    keys = iter(jax.random.split(key, 32))
    vgg_cfg = [("0", 3, 64), ("2", 64, 64), ("5", 64, 128), ("7", 128, 128),
               ("10", 128, 256), ("12", 256, 256), ("14", 256, 256),
               ("16", 256, 256), ("19", 256, 512), ("21", 512, 512)]
    vgg = {}
    for name, cin, cout in vgg_cfg:
        w, b = _init_conv(next(keys), cin, cout, 3)
        vgg["w" + name], vgg["b" + name] = w, b

    def coa_params(channel):
        d = channel // 16
        pa_w, pa_b = _init_conv(next(keys), channel, d, 1)
        pb_w, pb_b = _init_conv(next(keys), channel, d, 1)
        p1_w, p1_b = _init_conv(next(keys), channel, 1, 1)
        p2_w, p2_b = _init_conv(next(keys), channel, 1, 1)
        return dict(proja_w=pa_w, proja_b=pa_b, projb_w=pb_w, projb_b=pb_b,
                    proj1_w=p1_w, proj1_b=p1_b, proj2_w=p2_w, proj2_b=p2_b)

    return dict(vgg=vgg, coa_res2=coa_params(256), coa_res3=coa_params(512))


def prepare_params(raw):
    """One-time preprocessing (outside jit): 3x3 conv weights -> (9*Cin, Cout) bf16,
    biases -> (1, Cout) f32; CoAttention projections stay f32."""
    vgg = {}
    for name, v in raw["vgg"].items():
        if name.startswith("w"):
            kh, kw, cin, cout = v.shape
            vgg[name] = v.reshape(kh * kw * cin, cout).astype(jnp.bfloat16)
        else:
            vgg[name] = v.reshape(1, -1).astype(jnp.float32)
    out = {"vgg": vgg}
    for coa in ("coa_res2", "coa_res3"):
        d = {}
        for name, v in raw[coa].items():
            if name.endswith("_b"):
                d[name] = v.reshape(1, -1).astype(jnp.float32)
            else:
                d[name] = v.astype(jnp.float32)
        out[coa] = d
    return out


# --------------------------- fused conv numerical self-check ----------------------------
def _self_check_conv(key):
    """Check the fused + chained Pallas conv path against XLA's native conv (bf16-level
    tolerance; catches layout / chaining / masking bugs that finite-checks miss)."""
    k1, k2, k3 = jax.random.split(key, 3)
    N, H, W, C = 2, 8, 8, 128
    x = jax.random.normal(k1, (N, H, W, C), jnp.float32)
    w1 = jax.random.normal(k2, (3, 3, C, C), jnp.float32) * 0.05
    w2 = jax.random.normal(k3, (3, 3, C, C), jnp.float32) * 0.05
    b = jnp.zeros((1, C), jnp.float32)
    P = {"wA": w1.reshape(9 * C, C).astype(jnp.bfloat16), "bA": b,
         "wB": w2.reshape(9 * C, C).astype(jnp.bfloat16), "bB": b}
    got = jax.jit(lambda v: conv_run(v, ["A", "B"], P))(x)

    def ref1(v, w):
        y = jax.lax.conv_general_dilated(v, w, (1, 1), "SAME",
                                         dimension_numbers=("NHWC", "HWIO", "NHWC"))
        return jnp.maximum(y, 0.0)

    ref = ref1(ref1(x, w1), w2)
    err = float(jnp.max(jnp.abs(got.astype(jnp.float32) - ref)) /
                (jnp.max(jnp.abs(ref)) + 1e-6))
    assert err < 0.1, f"fused conv self-check failed (rel err {err:.4f})"


# -------------------------------------- main ---------------------------------------------
if __name__ == "__main__":
    key = jax.random.PRNGKey(0)
    k_params, k_content, k_style, k_check = jax.random.split(key, 4)

    params = prepare_params(init_params(k_params))
    content = jax.random.normal(k_content, (2, 3, 32, 32), jnp.float32)  # NCHW input
    style = jax.random.normal(k_style, (2, 3, 32, 32), jnp.float32)      # NCHW input

    _self_check_conv(k_check)

    fwd = jax.jit(vgg_attn_forward, static_argnames=("output_last_feature",))
    h1, h2, h3, h4 = fwd(content, style, params)
    jax.block_until_ready((h1, h2, h3, h4))

    assert h1.shape == (2, 32, 32, 64)    # NHWC of torch (2,64,32,32)
    assert h2.shape == (2, 16, 16, 128)
    assert h3.shape == (2, 8, 8, 256)
    assert h4.shape == (2, 4, 4, 512)
    assert all(bool(jnp.all(jnp.isfinite(t))) for t in (h1, h2, h3, h4))
    print("KERNEL_OK")
</pallas_src>

<mosaic_0001>
module attributes {stable_mosaic.version = 11 : i64} {
  func.func @_conv3x3_kernel(%arg0: i32, %arg1: i32, %arg2: memref<1x110x128xbf16, #tpu.memory_space<vmem>>, %arg3: memref<1152x128xbf16, #tpu.memory_space<vmem>>, %arg4: memref<1x128xf32, #tpu.memory_space<vmem>>, %arg5: memref<1x80x128xbf16, #tpu.memory_space<vmem>>) attributes {dimension_semantics = [#tpu.dimension_semantics<parallel>, #tpu.dimension_semantics<parallel>], iteration_bounds = array<i64: 1, 2>, scalar_prefetch = 0 : i64, scratch_operands = 0 : i64, tpu.core_type = #tpu.core_type<tc>, window_params = [{transform_indices = @transform_0, window_bounds = array<i64: 1, 110, 128>}, {transform_indices = @transform_1, window_bounds = array<i64: 1152, 128>}, {transform_indices = @transform_2, window_bounds = array<i64: 1, 128>}, {transform_indices = @transform_3, window_bounds = array<i64: 1, 80, 128>}]} {
    %c0 = arith.constant 0 : index
    %c0_0 = arith.constant 0 : index
    %c0_1 = arith.constant 0 : index
    %0 = vector.load %arg2[%c0, %c0_0, %c0_1] : memref<1x110x128xbf16, #tpu.memory_space<vmem>>, vector<1x80x128xbf16>
    %1 = vector.shape_cast %0 : vector<1x80x128xbf16> to vector<80x128xbf16>
    %c0_2 = arith.constant 0 : index
    %c0_3 = arith.constant 0 : index
    %2 = vector.load %arg3[%c0_2, %c0_3] : memref<1152x128xbf16, #tpu.memory_space<vmem>>, vector<128x128xbf16>
    %cst = arith.constant dense<0.000000e+00> : vector<80x128xf32>
    %3 = tpu.matmul %1, %2, %cst {dimension_numbers = #tpu.dot_dimension_numbers<[1], [0], [0], [1], [0, 0, 1, 1], [], []>} : vector<80x128xbf16>, vector<128x128xbf16>, vector<80x128xf32> -> vector<80x128xf32>
    %c0_4 = arith.constant 0 : index
    %c1 = arith.constant 1 : index
    %c0_5 = arith.constant 0 : index
    %4 = vector.load %arg2[%c0_4, %c1, %c0_5] : memref<1x110x128xbf16, #tpu.memory_space<vmem>>, vector<1x80x128xbf16>
    %5 = vector.shape_cast %4 : vector<1x80x128xbf16> to vector<80x128xbf16>
    %c128 = arith.constant 128 : index
    %c0_6 = arith.constant 0 : index
    %6 = vector.load %arg3[%c128, %c0_6] : memref<1152x128xbf16, #tpu.memory_space<vmem>>, vector<128x128xbf16>
    %cst_7 = arith.constant dense<0.000000e+00> : vector<80x128xf32>
    %7 = tpu.matmul %5, %6, %cst_7 {dimension_numbers = #tpu.dot_dimension_numbers<[1], [0], [0], [1], [0, 0, 1, 1], [], []>} : vector<80x128xbf16>, vector<128x128xbf16>, vector<80x128xf32> -> vector<80x128xf32>
    %8 = arith.addf %3, %7 : vector<80x128xf32>
    %c0_8 = arith.constant 0 : index
    %c2 = arith.constant 2 : index
    %c0_9 = arith.constant 0 : index
    %9 = vector.load %arg2[%c0_8, %c2, %c0_9] : memref<1x110x128xbf16, #tpu.memory_space<vmem>>, vector<1x80x128xbf16>
    %10 = vector.shape_cast %9 : vector<1x80x128xbf16> to vector<80x128xbf16>
    %c256 = arith.constant 256 : index
    %c0_10 = arith.constant 0 : index
    %11 = vector.load %arg3[%c256, %c0_10] : memref<1152x128xbf16, #tpu.memory_space<vmem>>, vector<128x128xbf16>
    %cst_11 = arith.constant dense<0.000000e+00> : vector<80x128xf32>
    %12 = tpu.matmul %10, %11, %cst_11 {dimension_numbers = #tpu.dot_dimension_numbers<[1], [0], [0], [1], [0, 0, 1, 1], [], []>} : vector<80x128xbf16>, vector<128x128xbf16>, vector<80x128xf32> -> vector<80x128xf32>
    %13 = arith.addf %8, %12 : vector<80x128xf32>
    %c0_12 = arith.constant 0 : index
    %c10 = arith.constant 10 : index
    %c0_13 = arith.constant 0 : index
    %14 = vector.load %arg2[%c0_12, %c10, %c0_13] : memref<1x110x128xbf16, #tpu.memory_space<vmem>>, vector<1x80x128xbf16>
    %15 = vector.shape_cast %14 : vector<1x80x128xbf16> to vector<80x128xbf16>
    %c384 = arith.constant 384 : index
    %c0_14 = arith.constant 0 : index
    %16 = vector.load %arg3[%c384, %c0_14] : memref<1152x128xbf16, #tpu.memory_space<vmem>>, vector<128x128xbf16>
    %cst_15 = arith.constant dense<0.000000e+00> : vector<80x128xf32>
    %17 = tpu.matmul %15, %16, %cst_15 {dimension_numbers = #tpu.dot_dimension_numbers<[1], [0], [0], [1], [0, 0, 1, 1], [], []>} : vector<80x128xbf16>, vector<128x128xbf16>, vector<80x128xf32> -> vector<80x128xf32>
    %18 = arith.addf %13, %17 : vector<80x128xf32>
    %c0_16 = arith.constant 0 : index
    %c11 = arith.constant 11 : index
    %c0_17 = arith.constant 0 : index
    %19 = vector.load %arg2[%c0_16, %c11, %c0_17] : memref<1x110x128xbf16, #tpu.memory_space<vmem>>, vector<1x80x128xbf16>
    %20 = vector.shape_cast %19 : vector<1x80x128xbf16> to vector<80x128xbf16>
    %c512 = arith.constant 512 : index
    %c0_18 = arith.constant 0 : index
    %21 = vector.load %arg3[%c512, %c0_18] : memref<1152x128xbf16, #tpu.memory_space<vmem>>, vector<128x128xbf16>
    %cst_19 = arith.constant dense<0.000000e+00> : vector<80x128xf32>
    %22 = tpu.matmul %20, %21, %cst_19 {dimension_numbers = #tpu.dot_dimension_numbers<[1], [0], [0], [1], [0, 0, 1, 1], [], []>} : vector<80x128xbf16>, vector<128x128xbf16>, vector<80x128xf32> -> vector<80x128xf32>
    %23 = arith.addf %18, %22 : vector<80x128xf32>
    %c0_20 = arith.constant 0 : index
    %c12 = arith.constant 12 : index
    %c0_21 = arith.constant 0 : index
    %24 = vector.load %arg2[%c0_20, %c12, %c0_21] : memref<1x110x128xbf16, #tpu.memory_space<vmem>>, vector<1x80x128xbf16>
    %25 = vector.shape_cast %24 : vector<1x80x128xbf16> to vector<80x128xbf16>
    %c640 = arith.constant 640 : index
    %c0_22 = arith.constant 0 : index
    %26 = vector.load %arg3[%c640, %c0_22] : memref<1152x128xbf16, #tpu.memory_space<vmem>>, vector<128x128xbf16>
    %cst_23 = arith.constant dense<0.000000e+00> : vector<80x128xf32>
    %27 = tpu.matmul %25, %26, %cst_23 {dimension_numbers = #tpu.dot_dimension_numbers<[1], [0], [0], [1], [0, 0, 1, 1], [], []>} : vector<80x128xbf16>, vector<128x128xbf16>, vector<80x128xf32> -> vector<80x128xf32>
    %28 = arith.addf %23, %27 : vector<80x128xf32>
    %c0_24 = arith.constant 0 : index
    %c20 = arith.constant 20 : index
    %c0_25 = arith.constant 0 : index
    %29 = vector.load %arg2[%c0_24, %c20, %c0_25] : memref<1x110x128xbf16, #tpu.memory_space<vmem>>, vector<1x80x128xbf16>
    %30 = vector.shape_cast %29 : vector<1x80x128xbf16> to vector<80x128xbf16>
    %c768 = arith.constant 768 : index
    %c0_26 = arith.constant 0 : index
    %31 = vector.load %arg3[%c768, %c0_26] : memref<1152x128xbf16, #tpu.memory_space<vmem>>, vector<128x128xbf16>
    %cst_27 = arith.constant dense<0.000000e+00> : vector<80x128xf32>
    %32 = tpu.matmul %30, %31, %cst_27 {dimension_numbers = #tpu.dot_dimension_numbers<[1], [0], [0], [1], [0, 0, 1, 1], [], []>} : vector<80x128xbf16>, vector<128x128xbf16>, vector<80x128xf32> -> vector<80x128xf32>
    %33 = arith.addf %28, %32 : vector<80x128xf32>
    %c0_28 = arith.constant 0 : index
    %c21 = arith.constant 21 : index
    %c0_29 = arith.constant 0 : index
    %34 = vector.load %arg2[%c0_28, %c21, %c0_29] : memref<1x110x128xbf16, #tpu.memory_space<vmem>>, vector<1x80x128xbf16>
    %35 = vector.shape_cast %34 : vector<1x80x128xbf16> to vector<80x128xbf16>
    %c896 = arith.constant 896 : index
    %c0_30 = arith.constant 0 : index
    %36 = vector.load %arg3[%c896, %c0_30] : memref<1152x128xbf16, #tpu.memory_space<vmem>>, vector<128x128xbf16>
    %cst_31 = arith.constant dense<0.000000e+00> : vector<80x128xf32>
    %37 = tpu.matmul %35, %36, %cst_31 {dimension_numbers = #tpu.dot_dimension_numbers<[1], [0], [0], [1], [0, 0, 1, 1], [], []>} : vector<80x128xbf16>, vector<128x128xbf16>, vector<80x128xf32> -> vector<80x128xf32>
    %38 = arith.addf %33, %37 : vector<80x128xf32>
    %c0_32 = arith.constant 0 : index
    %c22 = arith.constant 22 : index
    %c0_33 = arith.constant 0 : index
    %39 = vector.load %arg2[%c0_32, %c22, %c0_33] : memref<1x110x128xbf16, #tpu.memory_space<vmem>>, vector<1x80x128xbf16>
    %40 = vector.shape_cast %39 : vector<1x80x128xbf16> to vector<80x128xbf16>
    %c1024 = arith.constant 1024 : index
    %c0_34 = arith.constant 0 : index
    %41 = vector.load %arg3[%c1024, %c0_34] : memref<1152x128xbf16, #tpu.memory_space<vmem>>, vector<128x128xbf16>
    %cst_35 = arith.constant dense<0.000000e+00> : vector<80x128xf32>
    %42 = tpu.matmul %40, %41, %cst_35 {dimension_numbers = #tpu.dot_dimension_numbers<[1], [0], [0], [1], [0, 0, 1, 1], [], []>} : vector<80x128xbf16>, vector<128x128xbf16>, vector<80x128xf32> -> vector<80x128xf32>
    %43 = arith.addf %38, %42 : vector<80x128xf32>
    %c0_36 = arith.constant 0 : index
    %c0_37 = arith.constant 0 : index
    %44 = vector.load %arg4[%c0_36, %c0_37] : memref<1x128xf32, #tpu.memory_space<vmem>>, vector<1x128xf32>
    %45 = vector.broadcast %44 : vector<1x128xf32> to vector<80x128xf32>
    %46 = arith.addf %43, %45 : vector<80x128xf32>
    %cst_38 = arith.constant 0.000000e+00 : f32
    %47 = vector.broadcast %cst_38 : f32 to vector<80x128xf32>
    %48 = arith.maximumf %46, %47 : vector<80x128xf32>
    %49 = tpu.iota {dimensions = array<i32: 0>} : vector<80x1xi32>
    %c10_i32 = arith.constant 10 : i32
    %c0_i32 = arith.constant 0 : i32
    %50 = arith.cmpi eq, %c10_i32, %c0_i32 : i32
    %c1_i32 = arith.constant 1 : i32
    %51 = arith.select %50, %c1_i32, %c10_i32 : i32
    %52 = vector.broadcast %51 : i32 to vector<80x1xi32>
    %53 = arith.remsi %49, %52 : vector<80x1xi32>
    %c0_i32_39 = arith.constant 0 : i32
    %54 = vector.broadcast %c0_i32_39 : i32 to vector<80x1xi32>
    %55 = arith.cmpi ne, %53, %54 : vector<80x1xi32>
    %c0_i32_40 = arith.constant 0 : i32
    %56 = vector.broadcast %c0_i32_40 : i32 to vector<80x1xi32>
    %57 = arith.cmpi slt, %53, %56 : vector<80x1xi32>
    %c0_i32_41 = arith.constant 0 : i32
    %58 = arith.cmpi slt, %51, %c0_i32_41 : i32
    %59 = vector.broadcast %58 : i1 to vector<80x1xi1>
    %60 = vector.broadcast %59 : vector<80x1xi1> to vector<80x1xi1>
    %61 = arith.xori %57, %60 : vector<80x1xi1>
    %62 = arith.andi %61, %55 : vector<80x1xi1>
    %63 = vector.broadcast %51 : i32 to vector<80x1xi32>
    %64 = arith.addi %53, %63 : vector<80x1xi32>
    %65 = arith.select %62, %64, %53 : vector<80x1xi1>, vector<80x1xi32>
    %c8_i32 = arith.constant 8 : i32
    %66 = vector.broadcast %c8_i32 : i32 to vector<80x1xi32>
    %67 = arith.cmpi slt, %65, %66 : vector<80x1xi32>
    %cst_42 = arith.constant 0.000000e+00 : f32
    %68 = vector.shape_cast %67 : vector<80x1xi1> to vector<80x1xi1>
    %69 = vector.broadcast %68 : vector<80x1xi1> to vector<80x128xi1>
    %70 = vector.broadcast %cst_42 : f32 to vector<80x128xf32>
    %71 = arith.select %69, %48, %70 : vector<80x128xi1>, vector<80x128xf32>
    %72 = arith.truncf %71 : vector<80x128xf32> to vector<80x128xbf16>
    %c0_43 = arith.constant 0 : index
    %c0_44 = arith.constant 0 : index
    %c0_45 = arith.constant 0 : index
    %73 = vector.load %arg5[%c0_43, %c0_44, %c0_45] : memref<1x80x128xbf16, #tpu.memory_space<vmem>>, vector<1x80x128xbf16>
    %74 = vector.shape_cast %73 : vector<1x80x128xbf16> to vector<80x128xbf16>
    %75 = vector.shape_cast %72 : vector<80x128xbf16> to vector<1x80x128xbf16>
    tpu.vector_store %arg5[%c0_43, %c0_44, %c0_45], %75 {strides = array<i32>} : memref<1x80x128xbf16, #tpu.memory_space<vmem>>, vector<1x80x128xbf16>,
    return
  }
  func.func @transform_0(%arg0: i32, %arg1: i32) -> (i32, i32, i32) {
    %c0_i32 = arith.constant 0 : i32
    %c0_i32_0 = arith.constant 0 : i32
    %c0_i32_1 = arith.constant 0 : i32
    return %arg1, %c0_i32, %c0_i32_0 : i32, i32, i32
  }
  func.func @transform_1(%arg0: i32, %arg1: i32) -> (i32, i32) {
    %c0_i32 = arith.constant 0 : i32
    %c0_i32_0 = arith.constant 0 : i32
    return %c0_i32, %arg0 : i32, i32
  }
  func.func @transform_2(%arg0: i32, %arg1: i32) -> (i32, i32) {
    %c0_i32 = arith.constant 0 : i32
    %c0_i32_0 = arith.constant 0 : i32
    return %c0_i32, %arg0 : i32, i32
  }
  func.func @transform_3(%arg0: i32, %arg1: i32) -> (i32, i32, i32) {
    %c0_i32 = arith.constant 0 : i32
    %c0_i32_0 = arith.constant 0 : i32
    return %arg1, %c0_i32, %arg0 : i32, i32, i32
  }
}

module attributes {stable_mosaic.version = 11 : i64} {
  func.func @_conv3x3_kernel(%arg0: i32, %arg1: i32, %arg2: memref<1x110x128xbf16, #tpu.memory_space<vmem>>, %arg3: memref<1152x128xbf16, #tpu.memory_space<vmem>>, %arg4: memref<1x128xf32, #tpu.memory_space<vmem>>, %arg5: memref<1x80x128xbf16, #tpu.memory_space<vmem>>) attributes {dimension_semantics = [#tpu.dimension_semantics<parallel>, #tpu.dimension_semantics<parallel>], iteration_bounds = array<i64: 1, 2>, scalar_prefetch = 0 : i64, scratch_operands = 0 : i64, tpu.core_type = #tpu.core_type<tc>, window_params = [{transform_indices = @transform_0, window_bounds = array<i64: 1, 110, 128>}, {transform_indices = @transform_1, window_bounds = array<i64: 1152, 128>}, {transform_indices = @transform_2, window_bounds = array<i64: 1, 128>}, {transform_indices = @transform_3, window_bounds = array<i64: 1, 80, 128>}]} {
    %c0 = arith.constant 0 : index
    %c0_0 = arith.constant 0 : index
    %c0_1 = arith.constant 0 : index
    %0 = vector.load %arg2[%c0, %c0_0, %c0_1] : memref<1x110x128xbf16, #tpu.memory_space<vmem>>, vector<1x80x128xbf16>
    %1 = vector.shape_cast %0 : vector<1x80x128xbf16> to vector<80x128xbf16>
    %c0_2 = arith.constant 0 : index
    %c0_3 = arith.constant 0 : index
    %2 = vector.load %arg3[%c0_2, %c0_3] : memref<1152x128xbf16, #tpu.memory_space<vmem>>, vector<128x128xbf16>
    %cst = arith.constant dense<0.000000e+00> : vector<80x128xf32>
    %3 = tpu.matmul %1, %2, %cst {dimension_numbers = #tpu.dot_dimension_numbers<[1], [0], [0], [1], [0, 0, 1, 1], [], []>} : vector<80x128xbf16>, vector<128x128xbf16>, vector<80x128xf32> -> vector<80x128xf32>
    %c0_4 = arith.constant 0 : index
    %c1 = arith.constant 1 : index
    %c0_5 = arith.constant 0 : index
    %4 = vector.load %arg2[%c0_4, %c1, %c0_5] : memref<1x110x128xbf16, #tpu.memory_space<vmem>>, vector<1x80x128xbf16>
    %5 = vector.shape_cast %4 : vector<1x80x128xbf16> to vector<80x128xbf16>
    %c128 = arith.constant 128 : index
    %c0_6 = arith.constant 0 : index
    %6 = vector.load %arg3[%c128, %c0_6] : memref<1152x128xbf16, #tpu.memory_space<vmem>>, vector<128x128xbf16>
    %cst_7 = arith.constant dense<0.000000e+00> : vector<80x128xf32>
    %7 = tpu.matmul %5, %6, %cst_7 {dimension_numbers = #tpu.dot_dimension_numbers<[1], [0], [0], [1], [0, 0, 1, 1], [], []>} : vector<80x128xbf16>, vector<128x128xbf16>, vector<80x128xf32> -> vector<80x128xf32>
    %8 = arith.addf %3, %7 : vector<80x128xf32>
    %c0_8 = arith.constant 0 : index
    %c2 = arith.constant 2 : index
    %c0_9 = arith.constant 0 : index
    %9 = vector.load %arg2[%c0_8, %c2, %c0_9] : memref<1x110x128xbf16, #tpu.memory_space<vmem>>, vector<1x80x128xbf16>
    %10 = vector.shape_cast %9 : vector<1x80x128xbf16> to vector<80x128xbf16>
    %c256 = arith.constant 256 : index
    %c0_10 = arith.constant 0 : index
    %11 = vector.load %arg3[%c256, %c0_10] : memref<1152x128xbf16, #tpu.memory_space<vmem>>, vector<128x128xbf16>
    %cst_11 = arith.constant dense<0.000000e+00> : vector<80x128xf32>
    %12 = tpu.matmul %10, %11, %cst_11 {dimension_numbers = #tpu.dot_dimension_numbers<[1], [0], [0], [1], [0, 0, 1, 1], [], []>} : vector<80x128xbf16>, vector<128x128xbf16>, vector<80x128xf32> -> vector<80x128xf32>
    %13 = arith.addf %8, %12 : vector<80x128xf32>
    %c0_12 = arith.constant 0 : index
    %c10 = arith.constant 10 : index
    %c0_13 = arith.constant 0 : index
    %14 = vector.load %arg2[%c0_12, %c10, %c0_13] : memref<1x110x128xbf16, #tpu.memory_space<vmem>>, vector<1x80x128xbf16>
    %15 = vector.shape_cast %14 : vector<1x80x128xbf16> to vector<80x128xbf16>
    %c384 = arith.constant 384 : index
    %c0_14 = arith.constant 0 : index
    %16 = vector.load %arg3[%c384, %c0_14] : memref<1152x128xbf16, #tpu.memory_space<vmem>>, vector<128x128xbf16>
    %cst_15 = arith.constant dense<0.000000e+00> : vector<80x128xf32>
    %17 = tpu.matmul %15, %16, %cst_15 {dimension_numbers = #tpu.dot_dimension_numbers<[1], [0], [0], [1], [0, 0, 1, 1], [], []>} : vector<80x128xbf16>, vector<128x128xbf16>, vector<80x128xf32> -> vector<80x128xf32>
    %18 = arith.addf %13, %17 : vector<80x128xf32>
    %c0_16 = arith.constant 0 : index
    %c11 = arith.constant 11 : index
    %c0_17 = arith.constant 0 : index
    %19 = vector.load %arg2[%c0_16, %c11, %c0_17] : memref<1x110x128xbf16, #tpu.memory_space<vmem>>, vector<1x80x128xbf16>
    %20 = vector.shape_cast %19 : vector<1x80x128xbf16> to vector<80x128xbf16>
    %c512 = arith.constant 512 : index
    %c0_18 = arith.constant 0 : index
    %21 = vector.load %arg3[%c512, %c0_18] : memref<1152x128xbf16, #tpu.memory_space<vmem>>, vector<128x128xbf16>
    %cst_19 = arith.constant dense<0.000000e+00> : vector<80x128xf32>
    %22 = tpu.matmul %20, %21, %cst_19 {dimension_numbers = #tpu.dot_dimension_numbers<[1], [0], [0], [1], [0, 0, 1, 1], [], []>} : vector<80x128xbf16>, vector<128x128xbf16>, vector<80x128xf32> -> vector<80x128xf32>
    %23 = arith.addf %18, %22 : vector<80x128xf32>
    %c0_20 = arith.constant 0 : index
    %c12 = arith.constant 12 : index
    %c0_21 = arith.constant 0 : index
    %24 = vector.load %arg2[%c0_20, %c12, %c0_21] : memref<1x110x128xbf16, #tpu.memory_space<vmem>>, vector<1x80x128xbf16>
    %25 = vector.shape_cast %24 : vector<1x80x128xbf16> to vector<80x128xbf16>
    %c640 = arith.constant 640 : index
    %c0_22 = arith.constant 0 : index
    %26 = vector.load %arg3[%c640, %c0_22] : memref<1152x128xbf16, #tpu.memory_space<vmem>>, vector<128x128xbf16>
    %cst_23 = arith.constant dense<0.000000e+00> : vector<80x128xf32>
    %27 = tpu.matmul %25, %26, %cst_23 {dimension_numbers = #tpu.dot_dimension_numbers<[1], [0], [0], [1], [0, 0, 1, 1], [], []>} : vector<80x128xbf16>, vector<128x128xbf16>, vector<80x128xf32> -> vector<80x128xf32>
    %28 = arith.addf %23, %27 : vector<80x128xf32>
    %c0_24 = arith.constant 0 : index
    %c20 = arith.constant 20 : index
    %c0_25 = arith.constant 0 : index
    %29 = vector.load %arg2[%c0_24, %c20, %c0_25] : memref<1x110x128xbf16, #tpu.memory_space<vmem>>, vector<1x80x128xbf16>
    %30 = vector.shape_cast %29 : vector<1x80x128xbf16> to vector<80x128xbf16>
    %c768 = arith.constant 768 : index
    %c0_26 = arith.constant 0 : index
    %31 = vector.load %arg3[%c768, %c0_26] : memref<1152x128xbf16, #tpu.memory_space<vmem>>, vector<128x128xbf16>
    %cst_27 = arith.constant dense<0.000000e+00> : vector<80x128xf32>
    %32 = tpu.matmul %30, %31, %cst_27 {dimension_numbers = #tpu.dot_dimension_numbers<[1], [0], [0], [1], [0, 0, 1, 1], [], []>} : vector<80x128xbf16>, vector<128x128xbf16>, vector<80x128xf32> -> vector<80x128xf32>
    %33 = arith.addf %28, %32 : vector<80x128xf32>
    %c0_28 = arith.constant 0 : index
    %c21 = arith.constant 21 : index
    %c0_29 = arith.constant 0 : index
    %34 = vector.load %arg2[%c0_28, %c21, %c0_29] : memref<1x110x128xbf16, #tpu.memory_space<vmem>>, vector<1x80x128xbf16>
    %35 = vector.shape_cast %34 : vector<1x80x128xbf16> to vector<80x128xbf16>
    %c896 = arith.constant 896 : index
    %c0_30 = arith.constant 0 : index
    %36 = vector.load %arg3[%c896, %c0_30] : memref<1152x128xbf16, #tpu.memory_space<vmem>>, vector<128x128xbf16>
    %cst_31 = arith.constant dense<0.000000e+00> : vector<80x128xf32>
    %37 = tpu.matmul %35, %36, %cst_31 {dimension_numbers = #tpu.dot_dimension_numbers<[1], [0], [0], [1], [0, 0, 1, 1], [], []>} : vector<80x128xbf16>, vector<128x128xbf16>, vector<80x128xf32> -> vector<80x128xf32>
    %38 = arith.addf %33, %37 : vector<80x128xf32>
    %c0_32 = arith.constant 0 : index
    %c22 = arith.constant 22 : index
    %c0_33 = arith.constant 0 : index
    %39 = vector.load %arg2[%c0_32, %c22, %c0_33] : memref<1x110x128xbf16, #tpu.memory_space<vmem>>, vector<1x80x128xbf16>
    %40 = vector.shape_cast %39 : vector<1x80x128xbf16> to vector<80x128xbf16>
    %c1024 = arith.constant 1024 : index
    %c0_34 = arith.constant 0 : index
    %41 = vector.load %arg3[%c1024, %c0_34] : memref<1152x128xbf16, #tpu.memory_space<vmem>>, vector<128x128xbf16>
    %cst_35 = arith.constant dense<0.000000e+00> : vector<80x128xf32>
    %42 = tpu.matmul %40, %41, %cst_35 {dimension_numbers = #tpu.dot_dimension_numbers<[1], [0], [0], [1], [0, 0, 1, 1], [], []>} : vector<80x128xbf16>, vector<128x128xbf16>, vector<80x128xf32> -> vector<80x128xf32>
    %43 = arith.addf %38, %42 : vector<80x128xf32>
    %c0_36 = arith.constant 0 : index
    %c0_37 = arith.constant 0 : index
    %44 = vector.load %arg4[%c0_36, %c0_37] : memref<1x128xf32, #tpu.memory_space<vmem>>, vector<1x128xf32>
    %45 = vector.broadcast %44 : vector<1x128xf32> to vector<80x128xf32>
    %46 = arith.addf %43, %45 : vector<80x128xf32>
    %cst_38 = arith.constant 0.000000e+00 : f32
    %47 = vector.broadcast %cst_38 : f32 to vector<80x128xf32>
    %48 = arith.maximumf %46, %47 : vector<80x128xf32>
    %49 = tpu.iota {dimensions = array<i32: 0>} : vector<80x1xi32>
    %c10_i32 = arith.constant 10 : i32
    %c0_i32 = arith.constant 0 : i32
    %50 = arith.cmpi eq, %c10_i32, %c0_i32 : i32
    %c1_i32 = arith.constant 1 : i32
    %51 = arith.select %50, %c1_i32, %c10_i32 : i32
    %52 = vector.broadcast %51 : i32 to vector<80x1xi32>
    %53 = arith.remsi %49, %52 : vector<80x1xi32>
    %c0_i32_39 = arith.constant 0 : i32
    %54 = vector.broadcast %c0_i32_39 : i32 to vector<80x1xi32>
    %55 = arith.cmpi ne, %53, %54 : vector<80x1xi32>
    %c0_i32_40 = arith.constant 0 : i32
    %56 = vector.broadcast %c0_i32_40 : i32 to vector<80x1xi32>
    %57 = arith.cmpi slt, %53, %56 : vector<80x1xi32>
    %c0_i32_41 = arith.constant 0 : i32
    %58 = arith.cmpi slt, %51, %c0_i32_41 : i32
    %59 = vector.broadcast %58 : i1 to vector<80x1xi1>
    %60 = vector.broadcast %59 : vector<80x1xi1> to vector<80x1xi1>
    %61 = arith.xori %57, %60 : vector<80x1xi1>
    %62 = arith.andi %61, %55 : vector<80x1xi1>
    %63 = vector.broadcast %51 : i32 to vector<80x1xi32>
    %64 = arith.addi %53, %63 : vector<80x1xi32>
    %65 = arith.select %62, %64, %53 : vector<80x1xi1>, vector<80x1xi32>
    %c8_i32 = arith.constant 8 : i32
    %66 = vector.broadcast %c8_i32 : i32 to vector<80x1xi32>
    %67 = arith.cmpi slt, %65, %66 : vector<80x1xi32>
    %cst_42 = arith.constant 0.000000e+00 : f32
    %68 = vector.shape_cast %67 : vector<80x1xi1> to vector<80x1xi1>
    %69 = vector.broadcast %68 : vector<80x1xi1> to vector<80x128xi1>
    %70 = vector.broadcast %cst_42 : f32 to vector<80x128xf32>
    %71 = arith.select %69, %48, %70 : vector<80x128xi1>, vector<80x128xf32>
    %72 = arith.truncf %71 : vector<80x128xf32> to vector<80x128xbf16>
    %c0_43 = arith.constant 0 : index
    %c0_44 = arith.constant 0 : index
    %c0_45 = arith.constant 0 : index
    %73 = vector.load %arg5[%c0_43, %c0_44, %c0_45] : memref<1x80x128xbf16, #tpu.memory_space<vmem>>, vector<1x80x128xbf16>
    %74 = vector.shape_cast %73 : vector<1x80x128xbf16> to vector<80x128xbf16>
    %75 = vector.shape_cast %72 : vector<80x128xbf16> to vector<1x80x128xbf16>
    tpu.vector_store %arg5[%c0_43, %c0_44, %c0_45], %75 {strides = array<i32>} : memref<1x80x128xbf16, #tpu.memory_space<vmem>>, vector<1x80x128xbf16>,
    return
  }
  func.func @transform_0(%arg0: i32, %arg1: i32) -> (i32, i32, i32) {
    %c0_i32 = arith.constant 0 : i32
    %c0_i32_0 = arith.constant 0 : i32
    %c0_i32_1 = arith.constant 0 : i32
    return %arg1, %c0_i32, %c0_i32_0 : i32, i32, i32
  }
  func.func @transform_1(%arg0: i32, %arg1: i32) -> (i32, i32) {
    %c0_i32 = arith.constant 0 : i32
    %c0_i32_0 = arith.constant 0 : i32
    return %c0_i32, %arg0 : i32, i32
  }
  func.func @transform_2(%arg0: i32, %arg1: i32) -> (i32, i32) {
    %c0_i32 = arith.constant 0 : i32
    %c0_i32_0 = arith.constant 0 : i32
    return %c0_i32, %arg0 : i32, i32
  }
  func.func @transform_3(%arg0: i32, %arg1: i32) -> (i32, i32, i32) {
    %c0_i32 = arith.constant 0 : i32
    %c0_i32_0 = arith.constant 0 : i32
    return %arg1, %c0_i32, %arg0 : i32, i32, i32
  }
}

</mosaic_0001>

<bundles_post_ra>
// kernel: _lambda_.3
= control target key start
LH: loop header
LB: loop body
LE: loop exit
PB: predicated region body
PF: predicated region fallthrough
CT: control target
= control target key end

     0   :  { %s2663_s12 = smov 0   ;;  %s2665_s13 = smov 0   ;;  %s3474_s0 = inlined_call_operand.vmem [shape: bf16[2,110,128], index: 0, kind: input, shape index: {}]   ;;  %s3475_s1 = inlined_call_operand.vmem [shape: bf16[1152,128], index: 1, kind: input, shape index: {}]   ;;  %s3476_s2 = inlined_call_operand.vmem [shape: f32[1,128], index: 2, kind: input, shape index: {}]   ;;  %s3477_s3 = inlined_call_operand.vmem [shape: bf16[2,80,128], index: 3, kind: output, shape index: {}]  }
   0x1   :  { %s2667_s14 = smov 0  }
   0x2 LB: > { %s22_s15 = sadd.s32 1, %s2636_s13  ;;  %p2113_p0 = scmp.ge.s32.totalorder %s2640_s14, 1  ;;  %s2640_s14 = sphi %s2667_s14, %s13_s14   ;;  %s2636_s13 = sphi %s2665_s13, %s3507_s13   ;;  %s2632_s12 = sphi %s2663_s12, %s3506_s12  }
   0x3   : > { %p23_p1 = scmp.ge.s32.totalorder %s22_s15, 2  ;;  %p168_p2 = scmp.lt.s32.totalorder %s2640_s14, 3 }
   0x5   : > { %s3509_s15 = smov (%p23_p1, %s22_s15), 0  ;;  %p169_p3 = pnand %p2113_p0, %p168_p2 }
   0x6   : > { %p202_p4 = scmp.lt.s32.totalorder (!%p169_p3), %s2632_s12, 1 }
   0x7   : > { %172 = sbr.rel (%p169_p3) target bundleno = 377 (0x179), region = 32 }
   0xc   : > { %v2473_v0 = vld [vmem:[%s3475_s1 + $0x78] sm:$0xff]  ;;  %v2472_v1 = vld [vmem:[%s3475_s1 + $0x70] sm:$0xff]  ;;  %s3511_s12 = smov (!%p202_p4, %s2632_s12), 1  ;;  %v2471_v4 = vld [vmem:[%s3475_s1 + $0x68] sm:$0xff]  ;;  %vm293_vm0 = vsmask.f32 7424 }
   0xd   : > { %391 = vmatpush.bf16.msra.mxu0 %v2473_v0  ;;  %2574 = vmatpush.bf16.msra.mxu1 %v2473_v0  ;;  %v2493_v2 = vld [vmem:[%s3475_s1 + $0xf8] sm:$0xff]  ;;  %v2492_v3 = vld [vmem:[%s3475_s1 + $0xf0] sm:$0xff]  ;;  %s2590_s26 = smul.u32 56, %s3511_s12  ;;  %v2491_v5 = vld [vmem:[%s3475_s1 + $0xe8] sm:$0xff]  ;;  %vm532_vm1 = vcmask 1046528   ;;  %vm995_vm4 = vcmask 1045504  }
   0xe   : > { %2575 = vmatpush.bf16.msra.mxu2 %v2473_v0  ;;  %760 = vmatpush.bf16.msra.mxu3 %v2493_v2  ;;  %v2470_v6 = vld [vmem:[%s3475_s1 + $0x60] sm:$0xff]  ;;  %v2469_v9 = vld [vmem:[%s3475_s1 + $0x58] sm:$0xff]  ;;  %v2468_v17 = vld [vmem:[%s3475_s1 + $0x50] sm:$0xff]  ;;  %vm824_vm2 = vsmask.f32 6400  ;;  %vm1458_vm5 = vcmask 1044480  }
   0xf   : > { %s2708_s6 = scalar_lea.vmem %s3474_s0, %s2590_s26  ;;  %v2490_v7 = vld [vmem:[%s3475_s1 + $0xe0] sm:$0xff]  ;;  %v2489_v14 = vld [vmem:[%s3475_s1 + $0xd8] sm:$0xff]  ;;  %v2488_v24 = vld [vmem:[%s3475_s1 + $0xd0] sm:$0xff]  ;;  %vm1287_vm3 = vsmask.f32 5376  ;;  %s2591_s5 = smul.u32 40, %s3511_s12 }
  0x10   : > { %v248_v8 = vld [vmem:[%s2708_s6 + $0x28] sm:$0x1]  ;;  %v2718_v10 = vld [vmem:[%s2708_s6] sm:$0xff]   ;;  %v2721_v11 = vld [vmem:[%s2708_s6 + $0x10] sm:$0xff] }
  0x11   : > { %392 = vmatpush.bf16.msra.mxu0 %v2472_v1  ;;  %2576 = vmatpush.bf16.msra.mxu1 %v2472_v1  ;;  %v2724_v12 = vld [vmem:[%s2708_s6 + $0x20] sm:$0xff]  ;;  %v286_v13 = vunpack.c.l.b16 %v248_v8  ;;  %v2730_v15 = vld [vmem:[%s2708_s6 + $0x8] sm:$0xff]  ;;  %v297_v16 = vshll.u32 %v2718_v10, 16  ;;  %v2737_v18 = vld [vmem:[%s2708_s6 + $0x18] sm:$0xff]  ;;  %v310_v19 = vshll.u32 %v2721_v11, 16  ;;  %v295_v25 = vshrl.u32 %v2718_v10, 16  ;;  %s3323_s8 = scalar_lea.vmem %s3477_s3, %s2591_s5 }
  0x12   : > { %2577 = vmatpush.bf16.msra.mxu2 %v2472_v1  ;;  %761 = vmatpush.bf16.msra.mxu3 %v2492_v3  ;;  %v326_v21 = vshll.u32 %v2724_v12, 16  ;;  %v641_v22 = vld [vmem:[%s2708_s6 + $0x4] sm:$0xe]  ;;  %v2745_v23 = vld [vmem:[%s2708_s6 + $0x8] sm:$0xff]   ;;  %v302_v27 = vshll.u32 %v2730_v15, 16  ;;  %v314_v28 = vshrl.u32 %v2721_v11, 16 }
  0x13   : > { %v2740_v20 = vpack.c.b16 %v286_v13, %v286_v13  ;;  %v299_v26 = vrot.slane %v297_v16, 1  ;;  %v2467_v29 = vld [vmem:[%s3475_s1 + $0x48] sm:$0xff]  ;;  %v2756_v30 = vrot.slane %v310_v19, 1  ;;  %v318_v31 = vshll.u32 %v2737_v18, 16  ;;  %v2466_v39 = vld [vmem:[%s3475_s1 + $0x40] sm:$0xff]  ;;  %v2465_v45 = vld [vmem:[%s3475_s1 + $0x38] sm:$0xff] }
  0x14   : > { %v679_v32 = vunpack.c.l.b16 %v641_v22  ;;  %v680_v33 = vunpack.c.l.b16 %v2745_v23  ;;  %v2760_v34 = vrot.slane %v326_v21, 1  ;;  %v330_v35 = vshrl.u32 %v2724_v12, 16  ;;  %v2487_v37 = vld [vmem:[%s3475_s1 + $0xc8] sm:$0xff]  ;;  %v2481_v48 = vld [vmem:[%s3475_s1 + $0xb8] sm:$0xff]  ;;  %v2486_v52 = vld [vmem:[%s3475_s1 + $0xc0] sm:$0xff] }
  0x15   : > { %393 = vmatpush.bf16.msra.mxu0 %v2471_v4  ;;  %2578 = vmatpush.bf16.msra.mxu1 %v2471_v4  ;;  %v334_v36 = vshll.u32 %v2740_v20, 16  ;;  %v304_v38 = vrot.slane %v302_v27, 1  ;;  %v300_v40 = vor.u32 %v299_v26, %v295_v25  ;;  %v316_v41 = vor.u32 %v314_v28, %v2756_v30  ;;  %v2772_v43 = vld [vmem:[%s2708_s6 + $0xc] sm:$0xff]  ;;  %v2501_v49 = vld [vmem:[%s3475_s1 + $0x138] sm:$0xff]  ;;  %v2462_v3 = vld [vmem:[%s3475_s1 + $0x20] sm:$0xff] }
  0x16   : > { %2579 = vmatpush.bf16.msra.mxu2 %v2471_v4  ;;  %762 = vmatpush.bf16.msra.mxu3 %v2491_v5  ;;  %v320_v42 = vrot.slane %v318_v31, 1  ;;  %v2776_v44 = vpack.c.b16 %v680_v33, %v679_v32  ;;  %v332_v46 = vor.u32 %v330_v35, %v2760_v34  ;;  %v697_v54 = vrot.slane %v2772_v43, 1  ;;  %v2464_v56 = vld [vmem:[%s3475_s1 + $0x30] sm:$0xff]  ;;  %v2529_v57 = vld [vmem:[%s3475_s1 + $0x1f8] sm:$0xff]  ;;  %v2463_v61 = vld [vmem:[%s3475_s1 + $0x28] sm:$0xff] }
  0x17   : > { %v336_v47 = vrot.slane %v334_v36, 1  ;;  %v305_v50 = vsel %vm293_vm0, %v300_v40, %v304_v38  ;;  %v2480_v58 = vld [vmem:[%s3475_s1 + $0xb0] sm:$0xff]  ;;  %v2479_v63 = vld [vmem:[%s3475_s1 + $0xa8] sm:$0xff]  ;;  %v306_v1 = vshrl.u32 %v2730_v15, 16  ;;  %v322_v2 = vshrl.u32 %v2737_v18, 16  ;;  %v2478_v4 = vld [vmem:[%s3475_s1 + $0xa0] sm:$0xff] }
  0x18   : > { %v321_v51 = vsel %vm293_vm0, %v316_v41, %v320_v42  ;;  %v696_v53 = vrot.slane %v2776_v44, 1  ;;  %v2500_v59 = vld [vmem:[%s3475_s1 + $0x130] sm:$0xff]  ;;  %v2499_v0 = vld [vmem:[%s3475_s1 + $0x128] sm:$0xff]  ;;  %v2498_v5 = vld [vmem:[%s3475_s1 + $0x120] sm:$0xff]  ;;  %v826_v27 = vshrl.u32 %v2776_v44, 16  ;;  %v837_v31 = vshll.u32 %v2772_v43, 16 }
  0x19   : > { %394 = vmatpush.bf16.msra.mxu0 %v2470_v6  ;;  %2580 = vmatpush.bf16.msra.mxu1 %v2470_v6  ;;  %v337_v55 = vsel %vm293_vm0, %v332_v46, %v336_v47  ;;  %v2528_v62 = vld [vmem:[%s3475_s1 + $0x1f0] sm:$0xff]  ;;  %v2477_v13 = vld [vmem:[%s3475_s1 + $0x98] sm:$0xff]  ;;  %v2567_v25 = vld [vmem:[%s2708_s6] sm:$0xf0]  ;;  %v534_v46 = vrot.slane %v2730_v15, 1 }
  0x1a   : > { %2581 = vmatpush.bf16.msra.mxu2 %v2470_v6  ;;  %763 = vmatpush.bf16.msra.mxu3 %v2490_v7  ;;  %v698_v60 = vsel %vm532_vm1, %v696_v53, %v697_v54  ;;  %v308_v6 = vor.u32 %v306_v1, %v304_v38  ;;  %v324_v7 = vor.u32 %v322_v2, %v320_v42  ;;  %v2833_v8 = vld [vmem:[%s2708_s6 + $0x14] sm:$0xff]  ;;  %v2568_v26 = vld [vmem:[%s2708_s6] sm:$0xe]  ;;  %v2527_v28 = vld [vmem:[%s3475_s1 + $0x1e8] sm:$0xff]  ;;  %v828_v38 = vrot.slane %v826_v27, 1 }
  0x1b   : > { %v699_v19 = vrot.slane %v2833_v8, 1  ;;  %v2460_v21 = vld [vmem:[%s3475_s1 + $0x10] sm:$0xff]  ;;  %v2475_v35 = vld [vmem:[%s3475_s1 + $0x88] sm:$0xff]  ;;  %v839_v41 = vrot.slane %v837_v31, 2  ;;  %v2458_v42 = vld [vmem:[%s3475_s1] sm:$0xff] }
  0x1c   : > { %v313_v16 = vsel %vm293_vm0, %v308_v6, %v2756_v30  ;;  %v2476_v22 = vld [vmem:[%s3475_s1 + $0x90] sm:$0xff]  ;;  %v834_v30 = vshrl.u32 %v2772_v43, 16  ;;  %v2495_v36 = vld [vmem:[%s3475_s1 + $0x108] sm:$0xff]  ;;  %v2494_v47 = vld [vmem:[%s3475_s1 + $0x100] sm:$0xff] }
  0x1d   : > { %395 = vmatpush.bf16.msra.mxu0 %v2469_v9  ;;  %2582 = vmatpush.bf16.msra.mxu1 %v2469_v9  ;;  %v700_v32 = vsel %vm532_vm1, %v697_v54, %v699_v19  ;;  %v2899_v53 = vld [vmem:[%s2708_s6 + $0x1c] sm:$0xff]  ;;  %v2504_v27 = vld [vmem:[%s3475_s1 + $0x150] sm:$0xff] }
  0x1e   : > { %2583 = vmatpush.bf16.msra.mxu2 %v2469_v9  ;;  %764 = vmatpush.bf16.msra.mxu3 %v2489_v14  ;;  %v2461_v9 = vld [vmem:[%s3475_s1 + $0x18] sm:$0xff]  ;;  %v836_v40 = vrot.slane %v834_v30, 1  ;;  %v2506_v6 = vld [vmem:[%s3475_s1 + $0x160] sm:$0xff]  ;;  %v2532_v31 = vld [vmem:[%s3475_s1 + $0x210] sm:$0xff] }
  0x1f   : > { %v2497_v14 = vld [vmem:[%s3475_s1 + $0x118] sm:$0xff] }
  0x20   : > { %v2525_v2 = vld [vmem:[%s3475_s1 + $0x1d8] sm:$0xff] }
  0x21   : > { %396 = vmatpush.bf16.msra.mxu0 %v2468_v17  ;;  %2584 = vmatpush.bf16.msra.mxu1 %v2468_v17 }
  0x22   : > { %2585 = vmatpush.bf16.msra.mxu2 %v2468_v17  ;;  %765 = vmatpush.bf16.msra.mxu3 %v2488_v24  ;;  %v329_v17 = vsel %vm293_vm0, %v324_v7, %v2760_v34  ;;  %v2496_v24 = vld [vmem:[%s3475_s1 + $0x110] sm:$0xff]  ;;  %v2459_v34 = vld [vmem:[%s3475_s1 + $0x8] sm:$0xff]  ;;  %v2534_v7 = vld [vmem:[%s3475_s1 + $0x220] sm:$0xff] }
  0x25   : > { %397 = vmatpush.bf16.msra.mxu0 %v2467_v29  ;;  %2586 = vmatpush.bf16.msra.mxu1 %v2467_v29 }
  0x26   : > { %2587 = vmatpush.bf16.msra.mxu2 %v2467_v29  ;;  %766 = vmatpush.bf16.msra.mxu3 %v2487_v37  ;;  %v829_v29 = vshll.u32 %v2776_v44, 16  ;;  %v2569_v37 = vor.u32 %v2568_v26, %v2567_v25  ;;  %v2474_v44 = vld [vmem:[%s3475_s1 + $0x80] sm:$0xff]  ;;  %v2533_v25 = vld [vmem:[%s3475_s1 + $0x218] sm:$0xff]  ;;  %v2524_v26 = vld [vmem:[%s3475_s1 + $0x1d0] sm:$0xff] }
  0x29   : > { %398 = vmatpush.bf16.msra.mxu0 %v2466_v39  ;;  %2588 = vmatpush.bf16.msra.mxu1 %v2466_v39 }
  0x2a   : > { %2589 = vmatpush.bf16.msra.mxu2 %v2466_v39  ;;  %767 = vmatpush.bf16.msra.mxu3 %v2486_v52  ;;  %v831_v39 = vrot.slane %v829_v29, 2  ;;  %v2537_v52 = vld [vmem:[%s3475_s1 + $0x238] sm:$0xff]  ;;  %v855_v29 = vshll.u32 %v2899_v53, 16 }
  0x2c   : > { %399 = vmatmul.bf16.vlgmr.msra.gmra.mxu0 %v305_v50  ;;  %409 = vmatmul.bf16.vlgmr.msra.gmra.mxu1 %v321_v51  ;;  %v832_v50 = vor.u32 %v831_v39, %v828_v38  ;;  %v840_v51 = vor.u32 %v839_v41, %v836_v40  ;;  %v538_v38 = vrot.slane %v2737_v18, 1 }
  0x2d   : > { %478 = vmatpush.bf16.msrb.mxu1 %v2465_v45  ;;  %931 = vmatpush.bf16.msrb.mxu0 %v2501_v49  ;;  %v533_v45 = vrot.slane %v2569_v37, 1  ;;  %v2509_v49 = vld [vmem:[%s3475_s1 + $0x178] sm:$0xff] }
  0x2e   : > { %597 = vmatpush.bf16.msrb.mxu2 %v2481_v48  ;;  %1394 = vmatpush.bf16.msrb.mxu3 %v2529_v57  ;;  %v2521_v48 = vld [vmem:[%s3475_s1 + $0x1b8] sm:$0xff]  ;;  %v2508_v57 = vld [vmem:[%s3475_s1 + $0x170] sm:$0xff] }
  0x2f   : > { %419 = vmatmul.bf16.vlgmr.msra.gmra.mxu2 %v337_v55  ;;  %768 = vmatmul.bf16.vlgmr.msra.gmra.mxu3 %v698_v60  ;;  %v535_v54 = vsel %vm532_vm1, %v533_v45, %v534_v46  ;;  %v841_v55 = vsel %vm824_vm2, %v832_v50, %v840_v51  ;;  %v2526_v60 = vld [vmem:[%s3475_s1 + $0x1e0] sm:$0xff] }
  0x31   : > { %479 = vmatpush.bf16.msrb.mxu1 %v2464_v56  ;;  %932 = vmatpush.bf16.msrb.mxu0 %v2500_v59  ;;  %v2520_v56 = vld [vmem:[%s3475_s1 + $0x1b0] sm:$0xff] }
  0x32   : > { %598 = vmatpush.bf16.msrb.mxu2 %v2480_v58  ;;  %1395 = vmatpush.bf16.msrb.mxu3 %v2528_v62  ;;  %v701_v58 = vrot.slane %v2899_v53, 1  ;;  %v2536_v59 = vld [vmem:[%s3475_s1 + $0x230] sm:$0xff]  ;;  %v846_v62 = vshll.u32 %v2833_v8, 16 }
  0x34   : > { %v702_v1 = vsel %vm532_vm1, %v699_v19, %v701_v58 }
  0x35   : > { %480 = vmatpush.bf16.msrb.mxu1 %v2463_v61  ;;  %933 = vmatpush.bf16.msrb.mxu0 %v2499_v0  ;;  %v843_v61 = vshrl.u32 %v2833_v8, 16  ;;  %v2507_v0 = vld [vmem:[%s3475_s1 + $0x168] sm:$0xff] }
  0x36   : > { %599 = vmatpush.bf16.msrb.mxu2 %v2479_v63  ;;  %1396 = vmatpush.bf16.msrb.mxu3 %v2527_v28  ;;  %v2519_v63 = vld [vmem:[%s3475_s1 + $0x1a8] sm:$0xff]  ;;  %v852_v28 = vshrl.u32 %v2899_v53, 16 }
  0x39   : > { %481 = vmatpush.bf16.msrb.mxu1 %v2462_v3  ;;  %934 = vmatpush.bf16.msrb.mxu0 %v2498_v5  ;;  %v845_v3 = vrot.slane %v843_v61, 1  ;;  %v2518_v5 = vld [vmem:[%s3475_s1 + $0x1a0] sm:$0xff] }
  0x3a   : > { %600 = vmatpush.bf16.msrb.mxu2 %v2478_v4  ;;  %1397 = vmatpush.bf16.msrb.mxu3 %v2526_v60  ;;  %v848_v4 = vrot.slane %v846_v62, 2  ;;  %v804_v60 = vld [vmem:[%s2708_s6 + $0x2c] sm:$0x3] }
  0x3c   : > { %404 = vmatmul.bf16.gmra.mxu0 %v313_v16  ;;  %414 = vmatmul.bf16.gmra.mxu1 %v329_v17  ;;  %v2948_v16 = vld [vmem:[%s2708_s6 + $0x24] sm:$0xff]  ;;  %v2505_v17 = vld [vmem:[%s3475_s1 + $0x158] sm:$0xff] }
  0x3d   : > { %482 = vmatpush.bf16.msrb.mxu1 %v2461_v9  ;;  %935 = vmatpush.bf16.msrb.mxu0 %v2497_v14  ;;  %v536_v9 = vrot.slane %v2721_v11, 1  ;;  %v2517_v14 = vld [vmem:[%s3475_s1 + $0x198] sm:$0xff]  ;;  %v864_v50 = vshll.u32 %v2948_v16, 16 }
  0x3e   : > { %601 = vmatpush.bf16.msrb.mxu2 %v2477_v13  ;;  %1398 = vmatpush.bf16.msrb.mxu3 %v2525_v2  ;;  %v849_v13 = vor.u32 %v848_v4, %v845_v3  ;;  %v822_v2 = vunpack.c.l.b16 %v804_v60 }
  0x3f   : > { %773 = vmatmul.bf16.gmra.mxu3 %v700_v32  ;;  %v537_v19 = vsel %vm532_vm1, %v534_v46, %v536_v9  ;;  %v651_v32 = vld [vmem:[%s2708_s6 + $0x2c] sm:$0x1]  ;;  %v539_v41 = vsel %vm532_vm1, %v536_v9, %v538_v38  ;;  %v2530_v9 = vld [vmem:[%s3475_s1 + $0x200] sm:$0xff] }
  0x40   : > { %v689_v37 = vunpack.c.l.b16 %v651_v32 }
  0x41   : > { %483 = vmatpush.bf16.msrb.mxu1 %v2460_v21  ;;  %936 = vmatpush.bf16.msrb.mxu0 %v2496_v24  ;;  %v850_v21 = vsel %vm824_vm2, %v840_v51, %v849_v13  ;;  %v2516_v24 = vld [vmem:[%s3475_s1 + $0x190] sm:$0xff]  ;;  %v2514_v51 = vld [vmem:[%s3475_s1 + $0x180] sm:$0xff] }
  0x42   : > { %602 = vmatpush.bf16.msrb.mxu2 %v2476_v22  ;;  %v703_v22 = vrot.slane %v2948_v16, 1  ;;  %1399 = vmatpush.bf16.msrb.mxu3 %v2524_v26  ;;  %v695_v40 = vpack.c.b16 %v689_v37, %v689_v37  ;;  %v1438_v37 = vld [vmem:[%s2708_s6 + $0x8] sm:$0x8] }
  0x44   : > { %v704_v30 = vsel %vm532_vm1, %v701_v58, %v703_v22  ;;  %v705_v45 = vrot.slane %v695_v40, 1 }
  0x45   : > { %484 = vmatpush.bf16.msrb.mxu1 %v2459_v34  ;;  %937 = vmatpush.bf16.msrb.mxu0 %v2495_v36  ;;  %v2523_v34 = vld [vmem:[%s3475_s1 + $0x1c8] sm:$0xff]  ;;  %v857_v36 = vrot.slane %v855_v29, 2 }
  0x46   : > { %603 = vmatpush.bf16.msrb.mxu2 %v2475_v35  ;;  %v854_v35 = vrot.slane %v852_v28, 1  ;;  %1400 = vmatpush.bf16.msrb.mxu3 %v2523_v34 }
  0x48   : > { %v858_v39 = vor.u32 %v857_v36, %v854_v35  ;;  %v975_v35 = vld [vmem:[%s2708_s6 + $0x4] sm:$0xc] }
  0x49   : > { %485 = vmatpush.bf16.msrb.mxu1 %v2458_v42  ;;  %938 = vmatpush.bf16.msrb.mxu0 %v2494_v47  ;;  %v1104_v42 = vld [vmem:[%s2708_s6 + $0x8] sm:$0xc]  ;;  %v1143_v47 = vunpack.c.h.b16 %v2745_v23 }
  0x4a   : > { %604 = vmatpush.bf16.msrb.mxu2 %v2474_v44  ;;  %v859_v44 = vsel %vm824_vm2, %v849_v13, %v858_v39  ;;  %v1142_v46 = vunpack.c.l.b16 %v1104_v42 }
  0x4c   : > { %486 = vmatmul.bf16.vlgmr.msrb.gmra.mxu1 %v2718_v10  ;;  %939 = vmatmul.bf16.vlgmr.msrb.gmra.mxu0 %v841_v55  ;;  %v2535_v10 = vld [vmem:[%s3475_s1 + $0x228] sm:$0xff]  ;;  %v2502_v55 = vld [vmem:[%s3475_s1 + $0x140] sm:$0xff] }
  0x4d   : > { %1060 = vmatpush.bf16.msra.mxu1 %v2509_v49  ;;  %1523 = vmatpush.bf16.msra.mxu0 %v2537_v52  ;;  %v861_v49 = vshrl.u32 %v2948_v16, 16  ;;  %v2531_v52 = vld [vmem:[%s3475_s1 + $0x208] sm:$0xff] }
  0x4e   : > { %1223 = vmatpush.bf16.msra.mxu2 %v2521_v48  ;;  %v2503_v48 = vld [vmem:[%s3475_s1 + $0x148] sm:$0xff] }
  0x4f   : > { %605 = vmatmul.bf16.vlgmr.msrb.gmra.mxu2 %v535_v54  ;;  %778 = vmatmul.bf16.gmra.mxu3 %v702_v1  ;;  %v2522_v54 = vld [vmem:[%s3475_s1 + $0x1c0] sm:$0xff]  ;;  %v863_v58 = vrot.slane %v861_v49, 1  ;;  %v540_v1 = vrot.slane %v2724_v12, 1  ;;  %v997_v49 = vrot.slane %v2772_v43, 2  ;;  %v3060_v43 = vld [vmem:[%s2708_s6 + $0x28] sm:$0xff] }
  0x50   : > { %1401 = vmatpush.bf16.msrb.mxu3 %v2522_v54 }
  0x51   : > { %1061 = vmatpush.bf16.msra.mxu1 %v2508_v57  ;;  %1524 = vmatpush.bf16.msra.mxu0 %v2536_v59  ;;  %v3011_v57 = vpack.c.b16 %v1143_v47, %v1142_v46  ;;  %v866_v59 = vrot.slane %v864_v50, 2 }
  0x52   : > { %1224 = vmatpush.bf16.msra.mxu2 %v2520_v56  ;;  %v3007_v56 = vld [vmem:[%s2708_s6 + $0x10] sm:$0xff] }
  0x53   : > { %v1289_v61 = vshrl.u32 %v3011_v57, 16  ;;  %v1292_v62 = vshll.u32 %v3011_v57, 16  ;;  %v1160_v46 = vrot.slane %v3007_v56, 2 }
  0x55   : > { %1062 = vmatpush.bf16.msra.mxu1 %v2507_v0  ;;  %1525 = vmatpush.bf16.msra.mxu0 %v2535_v10  ;;  %v1300_v0 = vshll.u32 %v3007_v56, 16  ;;  %v867_v10 = vor.u32 %v866_v59, %v863_v58  ;;  %v1291_v3 = vrot.slane %v1289_v61, 2  ;;  %v1294_v4 = vrot.slane %v1292_v62, 3 }
  0x56   : > { %1225 = vmatpush.bf16.msra.mxu2 %v2519_v63  ;;  %v1297_v63 = vshrl.u32 %v3007_v56, 16  ;;  %v999_v59 = vrot.slane %v2833_v8, 2 }
  0x57   : > { %v868_v13 = vsel %vm824_vm2, %v858_v39, %v867_v10  ;;  %v1456_v39 = vunpack.c.l.b16 %v1438_v37 }
  0x59   : > { %1063 = vmatpush.bf16.msra.mxu1 %v2506_v6  ;;  %1526 = vmatpush.bf16.msra.mxu0 %v2534_v7  ;;  %v1302_v6 = vrot.slane %v1300_v0, 3  ;;  %v541_v7 = vsel %vm532_vm1, %v538_v38, %v540_v1  ;;  %v993_v38 = vunpack.c.l.b16 %v975_v35  ;;  %v1457_v42 = vpack.c.b16 %v1143_v47, %v1456_v39  ;;  %v1267_v0 = vld [vmem:[%s2708_s6 + $0x30] sm:$0x7] }
  0x5a   : > { %1226 = vmatpush.bf16.msra.mxu2 %v2518_v5  ;;  %v1299_v5 = vrot.slane %v1297_v63, 2  ;;  %v1003_v39 = vrot.slane %v2948_v16, 2 }
  0x5b   : > { %v1459_v50 = vrot.slane %v1457_v42, 3 }
  0x5c   : > { %491 = vmatmul.bf16.gmra.mxu1 %v2730_v15  ;;  %944 = vmatmul.bf16.gmra.mxu0 %v850_v21  ;;  %v2515_v15 = vld [vmem:[%s3475_s1 + $0x188] sm:$0xff] }
  0x5d   : > { %1064 = vmatpush.bf16.msra.mxu1 %v2505_v17  ;;  %1527 = vmatpush.bf16.msra.mxu0 %v2533_v25  ;;  %v1295_v17 = vor.u32 %v1294_v4, %v1291_v3  ;;  %v3031_v25 = vld [vmem:[%s2708_s6 + $0x18] sm:$0xff] }
  0x5e   : > { %1227 = vmatpush.bf16.msra.mxu2 %v2517_v14  ;;  %v3024_v14 = vpack.c.b16 %v822_v2, %v822_v2  ;;  %v1306_v28 = vshrl.u32 %v3031_v25, 16  ;;  %v1309_v29 = vshll.u32 %v3031_v25, 16  ;;  %v1162_v58 = vrot.slane %v3031_v25, 2 }
  0x5f   : > { %610 = vmatmul.bf16.gmra.mxu2 %v537_v19  ;;  %783 = vmatmul.bf16.gmra.mxu3 %v704_v30  ;;  %v1303_v19 = vor.u32 %v1302_v6, %v1299_v5  ;;  %v1462_v60 = vrot.slane %v3031_v25, 3  ;;  %v1000_v2 = vsel %vm995_vm4, %v997_v49, %v999_v59  ;;  %v1285_v5 = vunpack.c.l.b16 %v1267_v0 }
  0x60   : > { %v870_v21 = vshrl.u32 %v3024_v14, 16  ;;  %v1163_v63 = vsel %vm995_vm4, %v1160_v46, %v1162_v58 }
  0x61   : > { %1065 = vmatpush.bf16.msra.mxu1 %v2504_v27  ;;  %1528 = vmatpush.bf16.msra.mxu0 %v2532_v31  ;;  %v1311_v31 = vrot.slane %v1309_v29, 3  ;;  %v3074_v6 = vpack.c.b16 %v1285_v5, %v1285_v5 }
  0x62   : > { %1228 = vmatpush.bf16.msra.mxu2 %v2516_v24  ;;  %v1304_v24 = vsel %vm1287_vm3, %v1295_v17, %v1303_v19  ;;  %v872_v26 = vrot.slane %v870_v21, 1 }
  0x63   : > { %v1336_v17 = vshll.u32 %v3074_v6, 16 }
  0x65   : > { %1066 = vmatpush.bf16.msra.mxu1 %v2503_v48  ;;  %1529 = vmatpush.bf16.msra.mxu0 %v2531_v52 }
  0x66   : > { %1229 = vmatpush.bf16.msra.mxu2 %v2515_v15  ;;  %v1308_v15 = vrot.slane %v1306_v28, 2 }
  0x68   : > { %v1312_v36 = vor.u32 %v1311_v31, %v1308_v15 }
  0x69   : > { %1067 = vmatpush.bf16.msra.mxu1 %v2502_v55  ;;  %1530 = vmatpush.bf16.msra.mxu0 %v2530_v9 }
  0x6a   : > { %1230 = vmatpush.bf16.msra.mxu2 %v2514_v51  ;;  %v1313_v40 = vsel %vm1287_vm3, %v1303_v19, %v1312_v36 }
  0x6c   : > { %496 = vmatmul.bf16.gmra.mxu1 %v2721_v11  ;;  %949 = vmatmul.bf16.gmra.mxu0 %v859_v44  ;;  %v706_v11 = vsel %vm532_vm1, %v703_v22, %v705_v45  ;;  %v873_v22 = vshll.u32 %v3024_v14, 16 }
  0x6e   : > { %v875_v27 = vrot.slane %v873_v22, 2  ;;  %v1001_v22 = vrot.slane %v2899_v53, 2 }
  0x6f   : > { %615 = vmatmul.bf16.gmra.mxu2 %v539_v41  ;;  %788 = vmatmul.bf16.gmra.mxu3 %v706_v11  ;;  %v3043_v41 = vld [vmem:[%s2708_s6 + $0x20] sm:$0xff] }
  0x70   : > { %v876_v30 = vor.u32 %v875_v27, %v872_v26  ;;  %v1315_v44 = vshrl.u32 %v3043_v41, 16  ;;  %v1318_v45 = vshll.u32 %v3043_v41, 16  ;;  %v1164_v19 = vrot.slane %v3043_v41, 2 }
  0x71   : > { %v1338_v26 = vrot.slane %v1336_v17, 3 }
  0x72   : > { %v877_v34 = vsel %vm824_vm2, %v867_v10, %v876_v30  ;;  %v1317_v51 = vrot.slane %v1315_v44, 2  ;;  %v1320_v52 = vrot.slane %v1318_v45, 3  ;;  %v1165_v27 = vsel %vm995_vm4, %v1162_v58, %v1164_v19 }
  0x73   : > { %v1004_v45 = vsel %vm995_vm4, %v1001_v22, %v1003_v39 }
  0x74   : > { %v1321_v11 = vor.u32 %v1320_v52, %v1317_v51 }
  0x76   : > { %v1322_v55 = vsel %vm1287_vm3, %v1312_v36, %v1321_v11  ;;  %v1166_v36 = vrot.slane %v3060_v43, 2 }
  0x7c   : > { %501 = vmatmul.bf16.gmra.mxu1 %v2737_v18  ;;  %954 = vmatmul.bf16.gmra.mxu0 %v868_v13  ;;  %v542_v18 = vrot.slane %v2740_v20, 1  ;;  %v994_v20 = vpack.c.b16 %v680_v33, %v993_v38  ;;  %v1460_v33 = vrot.slane %v3007_v56, 3  ;;  %v1324_v56 = vshrl.u32 %v3060_v43, 16 }
  0x7d   : > { %v1333_v13 = vshrl.u32 %v3074_v6, 16 }
  0x7e   : > { %v543_v32 = vsel %vm532_vm1, %v540_v1, %v542_v18  ;;  %v996_v48 = vrot.slane %v994_v20, 2  ;;  %v1461_v54 = vsel %vm1458_vm5, %v1459_v50, %v1460_v33  ;;  %v1326_v61 = vrot.slane %v1324_v56, 2  ;;  %v1114_v20 = vld [vmem:[%s2708_s6 + $0x30] sm:$0x3] }
  0x7f   : > { %620 = vmatmul.bf16.gmra.mxu2 %v541_v7  ;;  %1402 = vmatmul.bf16.vlgmr.msrb.gmra.mxu3 %v1304_v24  ;;  %v1463_v3 = vsel %vm1458_vm5, %v1460_v33, %v1462_v60  ;;  %v1464_v24 = vrot.slane %v3043_v41, 3  ;;  %v1335_v25 = vrot.slane %v1333_v13, 2  ;;  %v1002_v18 = vsel %vm995_vm4, %v999_v59, %v1001_v22 }
  0x80   : > { %v998_v47 = vsel %vm995_vm4, %v996_v48, %v997_v49  ;;  %v1167_v41 = vsel %vm995_vm4, %v1164_v19, %v1166_v36  ;;  %v1152_v48 = vunpack.c.l.b16 %v1114_v20  ;;  %v1005_v56 = vrot.slane %v3024_v14, 2 }
  0x81   : > { %v1465_v30 = vsel %vm1458_vm5, %v1462_v60, %v1464_v24  ;;  %v1339_v15 = vor.u32 %v1338_v26, %v1335_v25 }
  0x82   : > { %v1158_v16 = vpack.c.b16 %v1152_v48, %v1152_v48 }
  0x8c   : > { %506 = vmatmul.bf16.gmra.mxu1 %v2724_v12  ;;  %959 = vmatmul.bf16.gmra.mxu0 %v877_v34  ;;  %v1159_v12 = vrot.slane %v3011_v57, 2  ;;  %v1327_v57 = vshll.u32 %v3060_v43, 16 }
  0x8e   : > { %v1161_v23 = vsel %vm995_vm4, %v1159_v12, %v1160_v46  ;;  %v1329_v62 = vrot.slane %v1327_v57, 3  ;;  %v1468_v57 = vrot.slane %v3074_v6, 3 }
  0x8f   : > { %625 = vmatmul.bf16.gmra.mxu2 %v543_v32  ;;  %1407 = vmatmul.bf16.gmra.mxu3 %v1313_v40  ;;  %v1466_v40 = vrot.slane %v3060_v43, 3 }
  0x90   : > { %v1330_v4 = vor.u32 %v1329_v62, %v1326_v61 }
  0x91   : > { %v1467_v12 = vsel %vm1458_vm5, %v1464_v24, %v1466_v40  ;;  %v1469_v0 = vsel %vm1458_vm5, %v1466_v40, %v1468_v57 }
  0x92   : > { %v1331_v8 = vsel %vm1287_vm3, %v1321_v11, %v1330_v4  ;;  %v1340_v53 = vsel %vm1287_vm3, %v1330_v4, %v1339_v15  ;;  %v1168_v11 = vrot.slane %v1158_v16, 2 }
  0x94   : > { %v1169_v59 = vsel %vm995_vm4, %v1166_v36, %v1168_v11 }
  0x9c   : > { %1068 = vmatmul.bf16.vlgmr.msra.gmra.mxu1 %v998_v47  ;;  %1531 = vmatmul.bf16.vlgmr.msra.gmra.mxu0 %v1461_v54 }
  0x9f   : > { %1231 = vmatmul.bf16.vlgmr.msra.gmra.mxu2 %v1161_v23  ;;  %1412 = vmatmul.bf16.gmra.mxu3 %v1322_v55 }
  0xa9   : > { %v400_v1 = vpop.f32.mrf.mxu0  ;;  %v3069_v10 = vpop.f32.mrf.mxu1 }
  0xac   : > { %1073 = vmatmul.bf16.gmra.mxu1 %v1000_v2  ;;  %1536 = vmatmul.bf16.gmra.mxu0 %v1463_v3 }
  0xaf   : > { %1236 = vmatmul.bf16.gmra.mxu2 %v1163_v63  ;;  %1417 = vmatmul.bf16.gmra.mxu3 %v1331_v8  ;;  %v1006_v63 = vsel %vm995_vm4, %v1003_v39, %v1005_v56 }
  0xb1   : > { %v402_v7 = vpop.f32.mrf.mxu0  ;;  %v3076_v9 = vpop.f32.mrf.mxu1 }
  0xb2   : > { %v769_v21 = vpop.f32.mrf.mxu3  ;;  %v3088_v31 = vpop.f32.mrf.mxu2 }
  0xb9   : > { %v405_v28 = vpop.f32.mrf.mxu0  ;;  %v3084_v29 = vpop.f32.mrf.mxu1 }
  0xba   : > { %v771_v32 = vpop.f32.mrf.mxu3  ;;  %v3094_v38 = vpop.f32.mrf.mxu2 }
  0xbc   : > { %1078 = vmatmul.bf16.gmra.mxu1 %v1002_v18  ;;  %1541 = vmatmul.bf16.gmra.mxu0 %v1465_v30 }
  0xbf   : > { %1241 = vmatmul.bf16.gmra.mxu2 %v1165_v27  ;;  %1422 = vmatmul.bf16.gmra.mxu3 %v1340_v53  ;;  %v1591_v27 = vlaneseq }
  0xc1   : > { %v407_v34 = vpop.f32.mrf.mxu0  ;;  %v3091_v35 = vpop.f32.mrf.mxu1  ;;  %v3116_v18 = vshrl.u32 %v1591_v27, 7 }
  0xc2   : > { %v774_v37 = vpop.f32.mrf.mxu3 }
  0xc3   : > { %v1605_v53 = vand.u32 65535, %v3116_v18  ;;  %v1606_v36 = vshrl.u32 %v3116_v18, 16 }
  0xc5   : > { %v3122_v40 = vmul.u32 52428, %v1605_v53  ;;  %v3127_v20 = vmul.u32 52429, %v1606_v36 }
  0xc9   : > { %v487_v42 = vpop.f32.mrf.mxu1  ;;  %v940_v44 = vpop.f32.mrf.mxu0 }
  0xca   : > { %v488_v46 = vadd.f32 %v487_v42, %v400_v1  ;;  %v776_v49 = vpop.f32.mrf.mxu3 }
  0xcc   : > { %1083 = vmatmul.bf16.gmra.mxu1 %v1004_v45  ;;  %1546 = vmatmul.bf16.gmra.mxu0 %v1467_v12  ;;  %v1612_v45 = vshll.u32 %v3122_v40, 16  ;;  %v3131_v12 = vadd.s32 8, %v3116_v18 }
  0xce   : > { %v1634_v48 = vand.u32 65535, %v3131_v12 }
  0xcf   : > { %1246 = vmatmul.bf16.gmra.mxu2 %v1167_v41 }
  0xd0   : > { %v1637_v11 = vmul.u32 52429, %v1634_v48 }
  0xd1   : > { %v489_v52 = vpop.f32.mrf.mxu1  ;;  %v942_v23 = vpop.f32.mrf.mxu0 }
  0xd2   : > { %v606_v50 = vpop.f32.mrf.mxu2  ;;  %v490_v47 = vadd.f32 %v489_v52, %v402_v7  ;;  %v779_v55 = vpop.f32.mrf.mxu3 }
  0xd3   : > { %v631_v33 = vadd.f32 %v606_v50, %v488_v46 }
  0xd5   : > { %v794_v51 = vadd.f32 %v769_v21, %v631_v33  ;;  %v1614_v33 = vshll.u32 %v3127_v20, 16 }
  0xd7   : > { %v3102_v54 = vadd.f32 %v940_v44, %v794_v51  ;;  %v1608_v44 = vmul.u32 52429, %v1605_v53 }
  0xd9   : > { %v492_v61 = vpop.f32.mrf.mxu1  ;;  %v945_v62 = vpop.f32.mrf.mxu0  ;;  %vm1616_vm6 = vc.u32 %v1608_v44, %v1612_v45  ;;  %v1618_v52 = vadd.s32 %v1612_v45, %v1608_v44  ;;  %v1615_v45 = vshrl.u32 %v3127_v20, 16 }
  0xda   : > { %v608_v43 = vpop.f32.mrf.mxu2  ;;  %v493_v1 = vadd.f32 %v492_v61, %v405_v28  ;;  %v781_v3 = vpop.f32.mrf.mxu3  ;;  %v3146_v61 = vadd.s32 16, %v3116_v18 }
  0xdb   : > { %v632_v58 = vadd.f32 %v608_v43, %v490_v47  ;;  %v1611_v43 = vmul.u32 52428, %v1606_v36  ;;  %vm1620_vm7 = vc.u32 %v1618_v52, %v1614_v33 }
  0xdc   : > { %1088 = vmatmul.bf16.gmra.mxu1 %v1006_v63  ;;  %1551 = vmatmul.bf16.gmra.mxu0 %v1469_v0 }
  0xdd   : > { %v795_v60 = vadd.f32 %v771_v32, %v632_v58  ;;  %v2642_v58 = vmov 0  }
  0xdf   : > { %1251 = vmatmul.bf16.gmra.mxu2 %v1169_v59  ;;  %v3109_v2 = vadd.f32 %v942_v23, %v795_v60  ;;  %v1638_v23 = vmul.u32 52428, %v1634_v48  ;;  %v1617_v59 = vsel %vm1616_vm6, 1, %v2642_v58 }
  0xe1   : > { %v494_v8 = vpop.f32.mrf.mxu1  ;;  %v947_v6 = vpop.f32.mrf.mxu0  ;;  %v1641_v56 = vshll.u32 %v1638_v23, 16 }
  0xe2   : > { %v611_v14 = vpop.f32.mrf.mxu2  ;;  %v495_v7 = vadd.f32 %v494_v8, %v407_v34  ;;  %v784_v17 = vpop.f32.mrf.mxu3  ;;  %v1664_v8 = vshrl.u32 %v3146_v61, 16 }
  0xe3   : > { %v633_v4 = vadd.f32 %v611_v14, %v493_v1  ;;  %vm1645_vm8 = vc.u32 %v1637_v11, %v1641_v56  ;;  %v1619_v14 = vadd.s32 %v1617_v59, %v1611_v43 }
  0xe4   : > { %v1646_v1 = vsel %vm1645_vm8, 1, %v2642_v58  ;;  %v3158_v27 = vmul.u32 52429, %v1664_v8 }
  0xe5   : > { %v796_v5 = vadd.f32 %v774_v37, %v633_v4 }
  0xe7   : > { %v3111_v13 = vadd.f32 %v945_v62, %v796_v5  ;;  %v1621_v5 = vsel %vm1620_vm7, 1, %v2642_v58 }
  0xe9   : > { %v497_v24 = vpop.f32.mrf.mxu1  ;;  %v950_v25 = vpop.f32.mrf.mxu0 }
  0xea   : > { %v613_v19 = vpop.f32.mrf.mxu2  ;;  %v498_v26 = vadd.f32 %v497_v24, %v3069_v10  ;;  %v3118_v32 = vpop.f32.mrf.mxu3 }
  0xeb   : > { %v634_v21 = vadd.f32 %v613_v19, %v495_v7 }
  0xed   : > { %v797_v22 = vadd.f32 %v776_v49, %v634_v21 }
  0xef   : > { %v3114_v28 = vadd.f32 %v947_v6, %v797_v22 }
  0xf1   : > { %v499_v37 = vpop.f32.mrf.mxu1  ;;  %v952_v39 = vpop.f32.mrf.mxu0 }
  0xf2   : > { %v616_v30 = vpop.f32.mrf.mxu2  ;;  %v500_v10 = vadd.f32 %v499_v37, %v3076_v9  ;;  %v3134_v50 = vpop.f32.mrf.mxu3  ;;  %v1635_v9 = vshrl.u32 %v3131_v12, 16  ;;  %v1642_v37 = vshrl.u32 %v1638_v23, 16 }
  0xf3   : > { %v635_v15 = vadd.f32 %v616_v30, %v498_v26  ;;  %v1623_v30 = vadd.s32 %v1621_v5, %v1619_v14 }
  0xf4   : > { %v1640_v63 = vmul.u32 52428, %v1635_v9 }
  0xf5   : > { %v798_v34 = vadd.f32 %v779_v55, %v635_v15  ;;  %v3139_v55 = vmul.u32 52429, %v1635_v9 }
  0xf6   : > { %v1648_v19 = vadd.s32 %v1646_v1, %v1640_v63 }
  0xf7   : > { %v3125_v41 = vadd.f32 %v950_v25, %v798_v34  ;;  %v1643_v60 = vshll.u32 %v3139_v55, 16  ;;  %v3165_v34 = vadd.s32 24, %v3116_v18  ;;  %v1644_v48 = vshrl.u32 %v3139_v55, 16 }
  0xf9   : > { %v502_v16 = vpop.f32.mrf.mxu1  ;;  %v955_v51 = vpop.f32.mrf.mxu0  ;;  %v1692_v44 = vand.u32 65535, %v3165_v34 }
  0xfa   : > { %v618_v42 = vpop.f32.mrf.mxu2  ;;  %v503_v47 = vadd.f32 %v502_v16, %v3084_v29  ;;  %v1647_v29 = vadd.s32 %v1641_v56, %v1637_v11  ;;  %v3155_v24 = vpop.f32.mrf.mxu3  ;;  %v1669_v16 = vmul.u32 52428, %v1664_v8 }
  0xfb   : > { %v636_v46 = vadd.f32 %v618_v42, %v500_v10  ;;  %v1672_v10 = vshll.u32 %v3158_v27, 16  ;;  %v1696_v52 = vmul.u32 52428, %v1692_v44  ;;  %v1695_v11 = vmul.u32 52429, %v1692_v44 }
  0xfc   : > { %vm1649_vm9 = vc.u32 %v1647_v29, %v1643_v60  ;;  %v1673_v44 = vshrl.u32 %v3158_v27, 16 }
  0xfd   : > { %v799_v49 = vadd.f32 %v781_v3, %v636_v46  ;;  %v1663_v3 = vand.u32 65535, %v3146_v61  ;;  %v1650_v25 = vsel %vm1649_vm9, 1, %v2642_v58  ;;  %v1699_v56 = vshll.u32 %v1696_v52, 16 }
  0xff   : > { %v3141_v57 = vadd.f32 %v952_v39, %v799_v49  ;;  %v3152_v21 = vmul.u32 52428, %v1663_v3  ;;  %v1666_v26 = vmul.u32 52429, %v1663_v3  ;;  %vm1703_vm12 = vc.u32 %v1695_v11, %v1699_v56 }
 0x100   : > { %v1704_v14 = vsel %vm1703_vm12, 1, %v2642_v58 }
 0x101   : > { %v504_v6 = vpop.f32.mrf.mxu1  ;;  %v957_v7 = vpop.f32.mrf.mxu0  ;;  %v1670_v15 = vshll.u32 %v3152_v21, 16  ;;  %v1671_v8 = vshrl.u32 %v3152_v21, 16 }
 0x102   : > { %v621_v62 = vpop.f32.mrf.mxu2  ;;  %v505_v22 = vadd.f32 %v504_v6, %v3091_v35  ;;  %v1652_v35 = vadd.s32 %v1650_v25, %v1648_v19  ;;  %v3175_v59 = vpop.f32.mrf.mxu3 }
 0x103   : > { %v637_v0 = vadd.f32 %v621_v62, %v503_v47  ;;  %v1676_v42 = vadd.s32 %v1670_v15, %v1666_v26  ;;  %vm1674_vm10 = vc.u32 %v1666_v26, %v1670_v15 }
 0x104   : > { %v1653_v9 = vadd.s32 %v1652_v35, %v1642_v37  ;;  %v1675_v47 = vsel %vm1674_vm10, 1, %v2642_v58 }
 0x105   : > { %v800_v4 = vadd.f32 %v784_v17, %v637_v0  ;;  %v1613_v17 = vshrl.u32 %v3122_v40, 16  ;;  %vm1678_vm11 = vc.u32 %v1676_v42, %v1672_v10  ;;  %v1677_v63 = vadd.s32 %v1675_v47, %v1669_v16 }
 0x106   : > { %v1654_v62 = vadd.s32 %v1653_v9, %v1644_v48  ;;  %v1679_v29 = vsel %vm1678_vm11, 1, %v2642_v58 }
 0x107   : > { %v3162_v53 = vadd.f32 %v955_v51, %v800_v4  ;;  %v1624_v40 = vadd.s32 %v1623_v30, %v1613_v17  ;;  %v1693_v51 = vshrl.u32 %v3165_v34, 16  ;;  %v3182_v4 = vadd.s32 32, %v3116_v18 }
 0x108   : > { %v1655_v30 = vshrl.u32 %v1654_v62, 3 }
 0x109   : > { %v507_v49 = vpop.f32.mrf.mxu1  ;;  %v960_v33 = vpop.f32.mrf.mxu0  ;;  %v1625_v20 = vadd.s32 %v1624_v40, %v1615_v45  ;;  %v1697_v43 = vmul.u32 52429, %v1693_v51  ;;  %v1721_v25 = vand.u32 65535, %v3182_v4  ;;  %v1722_v26 = vshrl.u32 %v3182_v4, 16 }
 0x10a   : > { %v623_v36 = vpop.f32.mrf.mxu2  ;;  %v508_v23 = vadd.f32 %v507_v49, %v3088_v31  ;;  %v1705_v31 = vadd.s32 %v1699_v56, %v1695_v11  ;;  %v1656_v48 = vmul.u32 10, %v1655_v30  ;;  %v3201_v49 = vadd.s32 40, %v3116_v18 }
 0x10b   : > { %v638_v39 = vadd.f32 %v623_v36, %v505_v22  ;;  %v1701_v1 = vshll.u32 %v1697_v43, 16  ;;  %v1626_v3 = vshrl.u32 %v1625_v20, 3  ;;  %v1681_v22 = vadd.s32 %v1679_v29, %v1677_v63 }
 0x10c   : > { %v3192_v21 = vmul.u32 52428, %v1721_v25  ;;  %v3194_v10 = vmul.u32 52429, %v1722_v26  ;;  %v1702_v9 = vshrl.u32 %v1697_v43, 16  ;;  %v1727_v56 = vmul.u32 52428, %v1722_v26 }
 0x10d   : > { %v801_v46 = vadd.f32 %v3118_v32, %v638_v39  ;;  %v1698_v32 = vmul.u32 52428, %v1693_v51  ;;  %vm1707_vm13 = vc.u32 %v1705_v31, %v1701_v1  ;;  %v1627_v37 = vmul.u32 10, %v1626_v3 }
 0x10e   : > { %v1708_v15 = vsel %vm1707_vm13, 1, %v2642_v58  ;;  %v1724_v39 = vmul.u32 52429, %v1721_v25  ;;  %v1682_v45 = vadd.s32 %v1681_v22, %v1671_v8  ;;  %v1728_v40 = vshll.u32 %v3192_v21, 16 }
 0x10f   : > { %v3177_v55 = vadd.f32 %v957_v7, %v801_v46  ;;  %v1706_v6 = vadd.s32 %v1704_v14, %v1698_v32  ;;  %v3198_v46 = vpop.f32.mrf.mxu3  ;;  %v1730_v51 = vshll.u32 %v3194_v10, 16 }
 0x110   : > { %vm1732_vm14 = vc.u32 %v1724_v39, %v1728_v40  ;;  %v1734_v27 = vadd.s32 %v1728_v40, %v1724_v39  ;;  %v1683_v20 = vadd.s32 %v1682_v45, %v1673_v44  ;;  %v3244_v44 = vld [vmem:[%s3476_s2] ss:$0 sm:$0xff] }
 0x111   : > { %v509_v7 = vpop.f32.mrf.mxu1  ;;  %v962_v19 = vpop.f32.mrf.mxu0  ;;  %v1710_v35 = vadd.s32 %v1708_v15, %v1706_v6  ;;  %v1733_v62 = vsel %vm1732_vm14, 1, %v2642_v58 }
 0x112   : > { %v626_v60 = vpop.f32.mrf.mxu2  ;;  %v510_v17 = vadd.f32 %v509_v7, %v3094_v38  ;;  %vm1736_vm0 = vc.u32 %v1734_v27, %v1730_v51  ;;  %v1684_v31 = vshrl.u32 %v1683_v20, 3 }
 0x113   : > { %v639_v0 = vadd.f32 %v626_v60, %v508_v23  ;;  %v1750_v23 = vand.u32 65535, %v3201_v49  ;;  %v1657_v60 = vsub.s32 %v3131_v12, %v1656_v48  ;;  %v1735_v12 = vadd.s32 %v1733_v62, %v1727_v56 }
 0x115   : > { %v802_v5 = vadd.f32 %v3134_v50, %v639_v0  ;;  %v1700_v50 = vshrl.u32 %v1696_v52, 16  ;;  %v1753_v63 = vmul.u32 52429, %v1750_v23  ;;  %v3215_v29 = vmul.u32 52428, %v1750_v23 }
 0x116   : > { %vm1893_vm2 = vcmp.ne.s32.totalorder %v1657_v60, 0  ;;  %vm1903_vm3 = vcmp.lt.s32.totalorder %v1657_v60, 0  ;;  %v1923_v40 = vadd.s32 10, %v1657_v60 }
 0x117   : > { %v3190_v36 = vadd.f32 %v960_v33, %v802_v5  ;;  %v3204_v33 = vsub.s32 %v3116_v18, %v1627_v37  ;;  %v1711_v16 = vadd.s32 %v1710_v35, %v1700_v50  ;;  %v1737_v5 = vsel %vm1736_vm0, 1, %v2642_v58  ;;  %v3229_v25 = vpop.f32.mrf.mxu3  ;;  %vm3249_vm6 = vmand %vm1903_vm3, %vm1893_vm2 }
 0x118   : > { %v1757_v8 = vshll.u32 %v3215_v29, 16  ;;  %v1685_v50 = vmul.u32 10, %v1684_v31  ;;  %v1729_v35 = vshrl.u32 %v3192_v21, 16  ;;  %v1739_v39 = vadd.s32 %v1737_v5, %v1735_v12 }
 0x119   : > { %v1069_v47 = vpop.f32.mrf.mxu1  ;;  %v1532_v11 = vpop.f32.mrf.mxu0  ;;  %vm1892_vm15 = vcmp.ne.s32.totalorder %v3204_v33, 0  ;;  %v1712_v43 = vadd.s32 %v1711_v16, %v1702_v9  ;;  %vm1902_vm1 = vcmp.lt.s32.totalorder %v3204_v33, 0  ;;  %v1933_v20 = vsel %vm3249_vm6, %v1923_v40, %v1657_v60 }
 0x11a   : > { %v628_v42 = vpop.f32.mrf.mxu2  ;;  %v1094_v32 = vadd.f32 %v1069_v47, %v3102_v54  ;;  %v1922_v54 = vadd.s32 10, %v3204_v33  ;;  %vm1761_vm4 = vc.u32 %v1753_v63, %v1757_v8  ;;  %vm3235_vm5 = vmand %vm1902_vm1, %vm1892_vm15  ;;  %v1740_v27 = vadd.s32 %v1739_v39, %v1729_v35 }
 0x11b   : > { %v640_v38 = vadd.f32 %v628_v42, %v510_v17  ;;  %v1713_v6 = vshrl.u32 %v1712_v43, 3  ;;  %v1763_v17 = vadd.s32 %v1757_v8, %v1753_v63  ;;  %v1758_v62 = vshrl.u32 %v3215_v29, 16 }
 0x11c   : > { %v1932_v9 = vsel %vm3235_vm5, %v1922_v54, %v3204_v33  ;;  %vm3280_vm9 = vcmp.lt.s32.totalorder %v1933_v20, 8 }
 0x11d   : > { %v803_v52 = vadd.f32 %v3155_v24, %v640_v38  ;;  %v1751_v24 = vshrl.u32 %v3201_v49, 16  ;;  %v1714_v48 = vmul.u32 10, %v1713_v6  ;;  %vm3266_vm8 = vcmp.lt.s32.totalorder %v1932_v9, 8 }
 0x11e   : > { %v3329_v9 = vadd.s32 64, %v3116_v18 }
 0x11f   : > { %v3217_v0 = vadd.f32 %v962_v19, %v803_v52  ;;  %v3220_v3 = vmul.u32 52429, %v1751_v24  ;;  %v3226_v19 = vadd.s32 48, %v3116_v18  ;;  %v1756_v26 = vmul.u32 52428, %v1751_v24 }
 0x120   : > { %v3258_v52 = vsub.s32 %v3146_v61, %v1685_v50  ;;  %v3271_v61 = vsub.s32 %v3165_v34, %v1714_v48  ;;  %v3278_v24 = vadd.s32 56, %v3116_v18 }
 0x121   : > { %v1759_v7 = vshll.u32 %v3220_v3, 16  ;;  %v1071_v15 = vpop.f32.mrf.mxu1  ;;  %v1534_v37 = vpop.f32.mrf.mxu0  ;;  %v1779_v21 = vand.u32 65535, %v3226_v19  ;;  %v1780_v56 = vshrl.u32 %v3226_v19, 16 }
 0x122   : > { %v1232_v1 = vpop.f32.mrf.mxu2  ;;  %v1095_v45 = vadd.f32 %v1071_v15, %v3109_v2  ;;  %v1731_v2 = vshrl.u32 %v3194_v10, 16  ;;  %vm1894_vm10 = vcmp.ne.s32.totalorder %v3258_v52, 0  ;;  %vm1904_vm11 = vcmp.lt.s32.totalorder %v3258_v52, 0 }
 0x123   : > { %v1257_v14 = vadd.f32 %v1232_v1, %v1094_v32  ;;  %vm1765_vm7 = vc.u32 %v1763_v17, %v1759_v7  ;;  %v3273_v32 = vmul.u32 52428, %v1779_v21  ;;  %v3287_v31 = vmul.u32 52429, %v1780_v56  ;;  %vm3308_vm14 = vmand %vm1904_vm11, %vm1894_vm10 }
 0x124   : > { %v1766_v23 = vsel %vm1765_vm7, 1, %v2642_v58  ;;  %v1741_v34 = vadd.s32 %v1740_v27, %v1731_v2  ;;  %v1924_v12 = vadd.s32 10, %v3258_v52  ;;  %vm1895_vm12 = vcmp.ne.s32.totalorder %v3271_v61, 0 }
 0x125   : > { %v1428_v22 = vadd.f32 %v3175_v59, %v1257_v14  ;;  %v1762_v59 = vsel %vm1761_vm4, 1, %v2642_v58  ;;  %v3290_v14 = vpop.f32.mrf.mxu3  ;;  %v1782_v5 = vmul.u32 52429, %v1779_v21  ;;  %v1786_v8 = vshll.u32 %v3273_v32, 16 }
 0x126   : > { %v1764_v16 = vadd.s32 %v1762_v59, %v1756_v26  ;;  %v1760_v7 = vshrl.u32 %v3220_v3, 16  ;;  %v1808_v26 = vand.u32 65535, %v3278_v24  ;;  %vm1905_vm13 = vcmp.lt.s32.totalorder %v3271_v61, 0 }
 0x127   : > { %v1557_v42 = vadd.f32 %v1532_v11, %v1428_v22  ;;  %v1925_v17 = vadd.s32 10, %v3271_v61  ;;  %v1742_v30 = vshrl.u32 %v1741_v34, 3  ;;  %v1809_v15 = vshrl.u32 %v3278_v24, 16  ;;  %vm3335_vm0 = vmand %vm1905_vm13, %vm1895_vm12 }
 0x128   : > { %v1768_v43 = vadd.s32 %v1766_v23, %v1764_v16  ;;  %v1788_v39 = vshll.u32 %v3287_v31, 16  ;;  %vm3312_vm15 = vc.u32 %v1782_v5, %v1786_v8  ;;  %v1785_v23 = vmul.u32 52428, %v1780_v56 }
 0x129   : > { %v1571_v47 = vadd.f32 %v3244_v44, %v1557_v42  ;;  %v1074_v63 = vpop.f32.mrf.mxu1  ;;  %v1537_v1 = vpop.f32.mrf.mxu0  ;;  %v1792_v42 = vadd.s32 %v1786_v8, %v1782_v5  ;;  %v3318_v40 = vmul.u32 52429, %v1809_v15  ;;  %v1791_v20 = vsel %vm3312_vm15, 1, %v2642_v58 }
 0x12a   : > { %v1234_v51 = vpop.f32.mrf.mxu2  ;;  %v1096_v29 = vadd.f32 %v1074_v63, %v3111_v13  ;;  %v1769_v22 = vadd.s32 %v1768_v43, %v1758_v62  ;;  %v1814_v62 = vmul.u32 52428, %v1809_v15  ;;  %v1837_v43 = vand.u32 65535, %v3329_v9 }
 0x12b   : > { %v1258_v11 = vadd.f32 %v1234_v51, %v1095_v45  ;;  %v1581_v54 = vmax.f32 %v1571_v47, 0.0  ;;  %v3316_v45 = vmul.u32 52428, %v1808_v26  ;;  %v1811_v47 = vmul.u32 52429, %v1808_v26 }
 0x12c   : > { %v1770_v21 = vadd.s32 %v1769_v22, %v1760_v7  ;;  %vm3348_vm1 = vc.u32 %v1792_v42, %v1788_v39  ;;  %v1817_v56 = vshll.u32 %v3318_v40, 16  ;;  %v1838_v5 = vshrl.u32 %v3329_v9, 16 }
 0x12d   : > { %v1429_v10 = vadd.f32 %v3198_v46, %v1258_v11  ;;  %v1815_v33 = vshll.u32 %v3316_v45, 16  ;;  %v3366_v22 = vmul.u32 52428, %v1837_v43  ;;  %v1787_v39 = vshrl.u32 %v3273_v32, 16 }
 0x12e   : > { %v1771_v63 = vshrl.u32 %v1770_v21, 3  ;;  %v3368_v26 = vmul.u32 52429, %v1838_v5  ;;  %v1816_v21 = vshrl.u32 %v3316_v45, 16 }
 0x12f   : > { %v1558_v46 = vadd.f32 %v1534_v37, %v1429_v10  ;;  %v1972_v37 = vsel %vm3266_vm8, %v1581_v54, 0.0  ;;  %vm1819_vm3 = vc.u32 %v1811_v47, %v1815_v33  ;;  %v1844_v59 = vshll.u32 %v3366_v22, 16 }
 0x131   : > { %v1572_v6 = vadd.f32 %v3244_v44, %v1558_v46  ;;  %v1076_v51 = vpop.f32.mrf.mxu1  ;;  %v1539_v2 = vpop.f32.mrf.mxu0 }
 0x132   : > { %v1237_v13 = vpop.f32.mrf.mxu2  ;;  %v1097_v11 = vadd.f32 %v1076_v51, %v3114_v28  ;;  %v1935_v28 = vsel %vm3335_vm0, %v1925_v17, %v3271_v61  ;;  %v1413_v46 = vpop.f32.mrf.mxu3  ;;  %v1820_v61 = vsel %vm1819_vm3, 1, %v2642_v58  ;;  %v1843_v51 = vmul.u32 52428, %v1838_v5 }
 0x133   : > { %v1582_v50 = vmax.f32 %v1572_v6, 0.0  ;;  %v1259_v35 = vadd.f32 %v1237_v13, %v1096_v29  ;;  %v1793_v29 = vadd.s32 %v1791_v20, %v1785_v23  ;;  %v1840_v6 = vmul.u32 52429, %v1837_v43 }
 0x134   : > { %v1822_v7 = vadd.s32 %v1820_v61, %v1814_v62  ;;  %vm3372_vm5 = vcmp.lt.s32.totalorder %v1935_v28, 8 }
 0x135   : > { %v1973_v38 = vsel %vm3280_vm9, %v1582_v50, 0.0  ;;  %v1430_v48 = vadd.f32 %v3229_v25, %v1259_v35  ;;  %v1934_v25 = vsel %vm3308_vm14, %v1924_v12, %v3258_v52  ;;  %v1743_v52 = vmul.u32 10, %v1742_v30 }
 0x136   : > { %v2545_v16 = vpack.c.bf16 %v1973_v38, %v1972_v37  ;;  %vm3357_vm2 = vcmp.lt.s32.totalorder %v1934_v25, 8  ;;  %v1821_v12 = vadd.s32 %v1815_v33, %v1811_v47  ;;  %v1772_v35 = vmul.u32 10, %v1771_v63 }
 0x137   : > { %v1559_v60 = vadd.f32 %v1537_v1, %v1430_v48  ;;  %v1795_v1 = vsel %vm3348_vm1, 1, %v2642_v58  ;;  %v3381_v48 = vsub.s32 %v3182_v4, %v1743_v52  ;;  %vm1848_vm6 = vc.u32 %v1840_v6, %v1844_v59 }
 0x138   : > { %2546 = vst [vmem:[%s3323_s8] sm:$0xff] %v2545_v16   ;;  %vm1823_vm4 = vc.u32 %v1821_v12, %v1817_v56  ;;  %v1797_v3 = vadd.s32 %v1795_v1, %v1793_v29  ;;  %v1849_v32 = vsel %vm1848_vm6, 1, %v2642_v58  ;;  %v1850_v47 = vadd.s32 %v1844_v59, %v1840_v6 }
 0x139   : > { %v1573_v13 = vadd.f32 %v3244_v44, %v1559_v60  ;;  %v1824_v15 = vsel %vm1823_vm4, 1, %v2642_v58  ;;  %v1079_v37 = vpop.f32.mrf.mxu1  ;;  %v1542_v50 = vpop.f32.mrf.mxu0  ;;  %v1818_v33 = vshrl.u32 %v3318_v40, 16  ;;  %v1851_v56 = vadd.s32 %v1849_v32, %v1843_v51 }
 0x13a   : > { %v1239_v54 = vpop.f32.mrf.mxu2  ;;  %v1098_v38 = vadd.f32 %v1079_v37, %v3125_v41  ;;  %v1826_v16 = vadd.s32 %v1824_v15, %v1822_v7  ;;  %v1789_v41 = vshrl.u32 %v3287_v31, 16  ;;  %v1798_v4 = vadd.s32 %v1797_v3, %v1787_v39  ;;  %v1415_v10 = vpop.f32.mrf.mxu3 }
 0x13b   : > { %v1260_v8 = vadd.f32 %v1239_v54, %v1097_v11  ;;  %v1583_v27 = vmax.f32 %v1573_v13, 0.0  ;;  %v3392_v11 = vadd.s32 72, %v3116_v18  ;;  %vm1896_vm8 = vcmp.ne.s32.totalorder %v3381_v48, 0 }
 0x13c   : > { %v1827_v62 = vadd.s32 %v1826_v16, %v1816_v21  ;;  %vm1906_vm9 = vcmp.lt.s32.totalorder %v3381_v48, 0  ;;  %v1799_v5 = vadd.s32 %v1798_v4, %v1789_v41  ;;  %v1926_v13 = vadd.s32 10, %v3381_v48 }
 0x13d   : > { %v1431_v17 = vadd.f32 %v3290_v14, %v1260_v8  ;;  %v1846_v14 = vshll.u32 %v3368_v26, 16  ;;  %v1866_v43 = vand.u32 65535, %v3392_v11  ;;  %v1974_v31 = vsel %vm3357_vm2, %v1583_v27, 0.0  ;;  %vm3417_vm13 = vmand %vm1906_vm9, %vm1896_vm8 }
 0x13e   : > { %v1828_v8 = vadd.s32 %v1827_v62, %v1818_v33  ;;  %v1800_v37 = vshrl.u32 %v1799_v5, 3  ;;  %v1847_v3 = vshrl.u32 %v3368_v26, 16  ;;  %v1936_v16 = vsel %vm3417_vm13, %v1926_v13, %v3381_v48 }
 0x13f   : > { %v1560_v42 = vadd.f32 %v1539_v2, %v1431_v17  ;;  %v3388_v2 = vsub.s32 %v3201_v49, %v1772_v35  ;;  %vm1852_vm7 = vc.u32 %v1850_v47, %v1846_v14  ;;  %v1867_v49 = vshrl.u32 %v3392_v11, 16 }
 0x140   : > { %v1853_v28 = vsel %vm1852_vm7, 1, %v2642_v58  ;;  %v1869_v54 = vmul.u32 52429, %v1866_v43  ;;  %v1870_v29 = vmul.u32 52428, %v1866_v43  ;;  %v1829_v39 = vshrl.u32 %v1828_v8, 3 }
 0x141   : > { %v1574_v23 = vadd.f32 %v3244_v44, %v1560_v42  ;;  %v1081_v40 = vpop.f32.mrf.mxu1  ;;  %v1544_v63 = vpop.f32.mrf.mxu0  ;;  %v3405_v34 = vmul.u32 52429, %v1867_v49  ;;  %v1855_v1 = vadd.s32 %v1853_v28, %v1851_v56  ;;  %vm1897_vm10 = vcmp.ne.s32.totalorder %v3388_v2, 0 }
 0x142   : > { %v1242_v25 = vpop.f32.mrf.mxu2  ;;  %v1099_v12 = vadd.f32 %v1081_v40, %v3141_v57  ;;  %v1873_v61 = vshll.u32 %v1870_v29, 16  ;;  %vm1907_vm11 = vcmp.lt.s32.totalorder %v3388_v2, 0  ;;  %v1872_v7 = vmul.u32 52428, %v1867_v49  ;;  %v1418_v51 = vpop.f32.mrf.mxu3 }
 0x143   : > { %v1584_v45 = vmax.f32 %v1574_v23, 0.0  ;;  %v1261_v20 = vadd.f32 %v1242_v25, %v1098_v38  ;;  %v1875_v57 = vshll.u32 %v3405_v34, 16  ;;  %v1927_v15 = vadd.s32 10, %v3388_v2  ;;  %vm3423_vm14 = vmand %vm1907_vm11, %vm1897_vm10 }
 0x144   : > { %vm1877_vm12 = vc.u32 %v1869_v54, %v1873_v61  ;;  %v1879_v42 = vadd.s32 %v1873_v61, %v1869_v54  ;;  %v1801_v41 = vmul.u32 10, %v1800_v37  ;;  %v1830_v4 = vmul.u32 10, %v1829_v39 }
 0x145   : > { %v1975_v18 = vsel %vm3372_vm5, %v1584_v45, 0.0  ;;  %v1432_v60 = vadd.f32 %v1413_v46, %v1261_v20  ;;  %v1845_v46 = vshrl.u32 %v3366_v22, 16  ;;  %v1937_v32 = vsel %vm3423_vm14, %v1927_v15, %v3388_v2 }
 0x146   : > { %v2550_v52 = vpack.c.bf16 %v1975_v18, %v1974_v31  ;;  %vm1881_vm15 = vc.u32 %v1879_v42, %v1875_v57  ;;  %v1874_v48 = vshrl.u32 %v1870_v29, 16  ;;  %vm1946_vm0 = vcmp.lt.s32.totalorder %v1936_v16, 8 }
 0x147   : > { %v1561_v6 = vadd.f32 %v1542_v50, %v1432_v60  ;;  %v1878_v50 = vsel %vm1877_vm12, 1, %v2642_v58  ;;  %v1856_v59 = vadd.s32 %v1855_v1, %v1845_v46  ;;  %v1882_v47 = vsel %vm1881_vm15, 1, %v2642_v58 }
 0x148   : > { %2570 = vst [vmem:[%s3323_s8 + $0x8] sm:$0xff] %v2550_v52   ;;  %v1880_v21 = vadd.s32 %v1878_v50, %v1872_v7  ;;  %vm1947_vm1 = vcmp.lt.s32.totalorder %v1937_v32, 8  ;;  %v1802_v2 = vsub.s32 %v3226_v19, %v1801_v41  ;;  %v1876_v49 = vshrl.u32 %v3405_v34, 16 }
 0x149   : > { %v1575_v38 = vadd.f32 %v3244_v44, %v1561_v6  ;;  %v1084_v27 = vpop.f32.mrf.mxu1  ;;  %v1547_v25 = vpop.f32.mrf.mxu0  ;;  %v1857_v45 = vadd.s32 %v1856_v59, %v1847_v3 }
 0x14a   : > { %v1244_v17 = vpop.f32.mrf.mxu2  ;;  %v1100_v26 = vadd.f32 %v1084_v27, %v3162_v53  ;;  %v1831_v53 = vsub.s32 %v3278_v24, %v1830_v4  ;;  %vm1898_vm2 = vcmp.ne.s32.totalorder %v1802_v2, 0  ;;  %vm1908_vm3 = vcmp.lt.s32.totalorder %v1802_v2, 0  ;;  %v1420_v54 = vpop.f32.mrf.mxu3 }
 0x14b   : > { %v1262_v30 = vadd.f32 %v1244_v17, %v1099_v12  ;;  %v1585_v20 = vmax.f32 %v1575_v38, 0.0  ;;  %v1858_v58 = vshrl.u32 %v1857_v45, 3  ;;  %vm3443_vm6 = vmand %vm1908_vm3, %vm1898_vm2  ;;  %v1928_v8 = vadd.s32 10, %v1802_v2 }
 0x14c   : > { %vm1899_vm4 = vcmp.ne.s32.totalorder %v1831_v53, 0  ;;  %vm1909_vm5 = vcmp.lt.s32.totalorder %v1831_v53, 0  ;;  %v1929_v1 = vadd.s32 10, %v1831_v53 }
 0x14d   : > { %v1433_v14 = vadd.f32 %v1415_v10, %v1262_v30  ;;  %v1884_v10 = vadd.s32 %v1882_v47, %v1880_v21  ;;  %v1976_v31 = vsel %vm1946_vm0, %v1585_v20, 0.0  ;;  %v1859_v29 = vmul.u32 10, %v1858_v58  ;;  %vm3447_vm7 = vmand %vm1909_vm5, %vm1899_vm4 }
 0x14e   : > { %v1938_v57 = vsel %vm3443_vm6, %v1928_v8, %v1802_v2  ;;  %v1939_v30 = vsel %vm3447_vm7, %v1929_v1, %v1831_v53 }
 0x14f   : > { %v1562_v23 = vadd.f32 %v1544_v63, %v1433_v14  ;;  %v1885_v28 = vadd.s32 %v1884_v10, %v1874_v48  ;;  %v1860_v61 = vsub.s32 %v3329_v9, %v1859_v29  ;;  %vm1948_vm10 = vcmp.lt.s32.totalorder %v1938_v57, 8 }
 0x150   : > { %vm1949_vm11 = vcmp.lt.s32.totalorder %v1939_v30, 8 }
 0x151   : > { %v1576_v33 = vadd.f32 %v3244_v44, %v1562_v23  ;;  %v1086_v40 = vpop.f32.mrf.mxu1  ;;  %v1886_v19 = vadd.s32 %v1885_v28, %v1876_v49  ;;  %v1549_v24 = vpop.f32.mrf.mxu0  ;;  %vm1900_vm8 = vcmp.ne.s32.totalorder %v1860_v61, 0  ;;  %vm1910_vm9 = vcmp.lt.s32.totalorder %v1860_v61, 0 }
 0x152   : > { %v1247_v62 = vpop.f32.mrf.mxu2  ;;  %v1101_v63 = vadd.f32 %v1086_v40, %v3177_v55  ;;  %v1423_v35 = vpop.f32.mrf.mxu3  ;;  %v1930_v42 = vadd.s32 10, %v1860_v61  ;;  %vm1920_vm12 = vmand %vm1910_vm9, %vm1900_vm8 }
 0x153   : > { %v1586_v56 = vmax.f32 %v1576_v33, 0.0  ;;  %v1263_v43 = vadd.f32 %v1247_v62, %v1100_v26  ;;  %v1887_v13 = vshrl.u32 %v1886_v19, 3 }
 0x154   : > { %v1940_v32 = vsel %vm1920_vm12, %v1930_v42, %v1860_v61 }
 0x155   : > { %v1977_v18 = vsel %vm1947_vm1, %v1586_v56, 0.0  ;;  %v1434_v60 = vadd.f32 %v1418_v51, %v1263_v43  ;;  %v1888_v9 = vmul.u32 10, %v1887_v13  ;;  %vm1950_vm15 = vcmp.lt.s32.totalorder %v1940_v32, 8 }
 0x156   : > { %v2555_v52 = vpack.c.bf16 %v1977_v18, %v1976_v31 }
 0x157   : > { %v1563_v12 = vadd.f32 %v1547_v25, %v1434_v60 }
 0x158   : > { %2571 = vst [vmem:[%s3323_s8 + $0x10] sm:$0xff] %v2555_v52  }
 0x159   : > { %v1577_v6 = vadd.f32 %v3244_v44, %v1563_v12  ;;  %v1089_v17 = vpop.f32.mrf.mxu1  ;;  %v1552_v38 = vpop.f32.mrf.mxu0 }
 0x15a   : > { %v1249_v5 = vpop.f32.mrf.mxu2  ;;  %v1102_v15 = vadd.f32 %v1089_v17, %v3190_v36  ;;  %v1889_v36 = vsub.s32 %v3392_v11, %v1888_v9  ;;  %v1425_v20 = vpop.f32.mrf.mxu3 }
 0x15b   : > { %v1264_v46 = vadd.f32 %v1249_v5, %v1101_v63  ;;  %v1587_v37 = vmax.f32 %v1577_v6, 0.0 }
 0x15c   : > { %vm1901_vm13 = vcmp.ne.s32.totalorder %v1889_v36, 0  ;;  %vm1911_vm14 = vcmp.lt.s32.totalorder %v1889_v36, 0  ;;  %v1931_v45 = vadd.s32 10, %v1889_v36 }
 0x15d   : > { %v1435_v7 = vadd.f32 %v1420_v54, %v1264_v46  ;;  %v1978_v14 = vsel %vm1948_vm10, %v1587_v37, 0.0  ;;  %vm1921_vm0 = vmand %vm1911_vm14, %vm1901_vm13 }
 0x15e   : > { %v1941_v62 = vsel %vm1921_vm0, %v1931_v45, %v1889_v36 }
 0x15f   : > { %v1564_v22 = vadd.f32 %v1549_v24, %v1435_v7  ;;  %vm1951_vm1 = vcmp.lt.s32.totalorder %v1941_v62, 8 }
 0x161   : > { %v1578_v50 = vadd.f32 %v3244_v44, %v1564_v22  ;;  %v1091_v27 = vpop.f32.mrf.mxu1  ;;  %v1554_v48 = vpop.f32.mrf.mxu0 }
 0x162   : > { %v1252_v39 = vpop.f32.mrf.mxu2  ;;  %v1103_v26 = vadd.f32 %v1091_v27, %v3217_v0 }
 0x163   : > { %v1588_v3 = vmax.f32 %v1578_v50, 0.0  ;;  %v1265_v59 = vadd.f32 %v1252_v39, %v1102_v15 }
 0x165   : > { %v1979_v21 = vsel %vm1949_vm11, %v1588_v3, 0.0  ;;  %v1436_v16 = vadd.f32 %v1423_v35, %v1265_v59 }
 0x166   : > { %v2560_v51 = vpack.c.bf16 %v1979_v21, %v1978_v14 }
 0x167   : > { %v1565_v23 = vadd.f32 %v1552_v38, %v1436_v16 }
 0x168   : > { %2572 = vst [vmem:[%s3323_s8 + $0x18] sm:$0xff] %v2560_v51  }
 0x169   : > { %v1579_v47 = vadd.f32 %v3244_v44, %v1565_v23 }
 0x16a   : > { %v1254_v25 = vpop.f32.mrf.mxu2 }
 0x16b   : > { %v1589_v41 = vmax.f32 %v1579_v47, 0.0  ;;  %v1266_v4 = vadd.f32 %v1254_v25, %v1103_v26 }
 0x16d   : > { %v1980_v11 = vsel %vm1950_vm15, %v1589_v41, 0.0  ;;  %v1437_v33 = vadd.f32 %v1425_v20, %v1266_v4 }
 0x16f   : > { %v1566_v10 = vadd.f32 %v1554_v48, %v1437_v33 }
 0x171   : > { %v1580_v0 = vadd.f32 %v3244_v44, %v1566_v10 }
 0x173   : > { %v1590_v56 = vmax.f32 %v1580_v0, 0.0 }
 0x175   : > { %v1981_v43 = vsel %vm1951_vm1, %v1590_v56, 0.0 }
 0x176   : > { %v2565_v2 = vpack.c.bf16 %v1981_v43, %v1980_v11 }
 0x178   : > { %2573 = vst [vmem:[%s3323_s8 + $0x20] sm:$0xff] %v2565_v2  }
 0x179 PF: > { %s13_s14 = sadd.s32 1, %s2640_s14   ;;  %s3506_s12 = smov %s2636_s13 }
 0x17a   : > { %p10_p5 = scmp.ge.s32.totalorder %s13_s14, 4   ;;  %s3507_s13 = smov %s3509_s15 }
 0x17c   :  { %12 = sbr.rel (!%p10_p5) target bundleno = 2 (0x2), region = 68 }

// kernel: _lambda_.2
= control target key start
LH: loop header
LB: loop body
LE: loop exit
PB: predicated region body
PF: predicated region fallthrough
CT: control target
= control target key end

     0   :  { %8 = vsyncpa [#allocation3], 0  ;;  %s2720_s12 = smov 0   ;;  %s2722_s13 = smov 0   ;;  %s3323_s0 = inlined_call_operand.vmem [shape: bf16[2,110,128], index: 0, kind: input, shape index: {}]   ;;  %s3324_s1 = inlined_call_operand.hbm [shape: bf16[1152,128], index: 1, kind: input, shape index: {}]   ;;  %s3325_s2 = inlined_call_operand.vmem [shape: f32[1,128], index: 2, kind: input, shape index: {}]   ;;  %s3326_s3 = inlined_call_operand.vmem [shape: bf16[2,80,128], index: 3, kind: output, shape index: {}]  }
   0x1   :  { %s2724_s14 = smov 0  }
   0x2 LB: > { %s2113_s15 = sadd.s32 4294967295, %s2694_s14   ;;  %s23_s16 = sadd.s32 1, %s2690_s13  ;;  %s2694_s14 = sphi %s2724_s14, %s14_s14   ;;  %s2690_s13 = sphi %s2722_s13, %s3356_s13   ;;  %s2686_s12 = sphi %s2720_s12, %s3355_s12  }
   0x3   : > { %p24_p0 = scmp.ge.s32.totalorder %s23_s16, 2  ;;  %p2115_p1 = scmp.ge.s32.totalorder %s2694_s14, 1 }
   0x4   : > { %p137_p2 = scmp.lt.s32.totalorder %s2694_s14, 3  ;;  %p2607_p4 = scmp.eq.s32.totalorder %s2113_s15, 0 }
   0x5   : > { %s3358_s16 = smov (%p24_p0, %s23_s16), 0  ;;  %s150_s19 = sshll.u32 %s3324_s1, 4  ;;  %s151_s19 = int_to_ptr.hbm [resolvable:$true] %s150_s19 }
   0x6   : > { %p138_p3 = pnand %p2115_p1, %p137_p2  ;;  %s2696_s20 = smov [#allocation2]  }
   0x7   : > { %s152_s21 = sshll.u32 %s2696_s20, 4  ;;  %s2697_s22 = smov 64   ;;  %s153_s21 = int_to_ptr.vmem [resolvable:$true] %s152_s21 }
   0x8   : > { %p2603_p5 = pneg %p138_p3  ;;  %s2698_s23 = smov 4  }
   0x9   : > { %182 = sbr.rel (%p138_p3) target bundleno = 380 (0x17c), region = 32 }
   0xa   : > { %p2604_p6 = pnand %p2607_p4, %p2603_p5 }
   0xc   : > { %2606 = dma.hbm_to_vmem [thread:$0]  (!%p2604_p6), %s151_s19, 9216, %s153_s21, [#allocation3], %s2697_s22, %s2697_s22, %s2698_s23  }
   0xe   : > { %2681 = dma.done.wait (%p2607_p4), [#allocation3], 9216  }
   0xf   : > { %2683 = vsyncadd (%p2607_p4), [#allocation3], 4294958080  ;;  %p213_p7 = scmp.lt.s32.totalorder %s2686_s12, 1  ;;  %v2480_v0 = vld [vmem:[#allocation2 + $0x78] sm:$0xff]  ;;  %v2479_v1 = vld [vmem:[#allocation2 + $0x70] sm:$0xff]  ;;  %vm539_vm1 = vcmask 1046528  }
  0x10   : > { %398 = vmatpush.bf16.msra.mxu0 %v2480_v0  ;;  %2581 = vmatpush.bf16.msra.mxu1 %v2480_v0  ;;  %v2500_v2 = vld [vmem:[#allocation2 + $0xf8] sm:$0xff]  ;;  %v2499_v3 = vld [vmem:[#allocation2 + $0xf0] sm:$0xff]  ;;  %v2478_v4 = vld [vmem:[#allocation2 + $0x68] sm:$0xff]  ;;  %vm300_vm0 = vsmask.f32 7424  ;;  %vm1002_vm4 = vcmask 1045504  }
  0x11   : > { %2582 = vmatpush.bf16.msra.mxu2 %v2480_v0  ;;  %s3360_s12 = smov (!%p213_p7, %s2686_s12), 1  ;;  %767 = vmatpush.bf16.msra.mxu3 %v2500_v2  ;;  %v2498_v5 = vld [vmem:[#allocation2 + $0xe8] sm:$0xff]  ;;  %v2477_v6 = vld [vmem:[#allocation2 + $0x60] sm:$0xff]  ;;  %v2476_v9 = vld [vmem:[#allocation2 + $0x58] sm:$0xff]  ;;  %vm831_vm2 = vsmask.f32 6400 }
  0x12   : > { %s2597_s24 = smul.u32 56, %s3360_s12  ;;  %v2497_v7 = vld [vmem:[#allocation2 + $0xe0] sm:$0xff]  ;;  %v2496_v14 = vld [vmem:[#allocation2 + $0xd8] sm:$0xff]  ;;  %v2475_v17 = vld [vmem:[#allocation2 + $0x50] sm:$0xff]  ;;  %vm1294_vm3 = vsmask.f32 5376 }
  0x13   : > { %v2495_v24 = vld [vmem:[#allocation2 + $0xd0] sm:$0xff]  ;;  %v2474_v29 = vld [vmem:[#allocation2 + $0x48] sm:$0xff]  ;;  %v2473_v39 = vld [vmem:[#allocation2 + $0x40] sm:$0xff]  ;;  %vm1465_vm5 = vcmask 1044480   ;;  %s2598_s30 = smul.u32 40, %s3360_s12 }
  0x14   : > { %399 = vmatpush.bf16.msra.mxu0 %v2479_v1  ;;  %2583 = vmatpush.bf16.msra.mxu1 %v2479_v1  ;;  %s2752_s27 = scalar_lea.vmem %s3323_s0, %s2597_s24  ;;  %v2494_v37 = vld [vmem:[#allocation2 + $0xc8] sm:$0xff]  ;;  %v2472_v45 = vld [vmem:[#allocation2 + $0x38] sm:$0xff]  ;;  %v2493_v52 = vld [vmem:[#allocation2 + $0xc0] sm:$0xff] }
  0x15   : > { %2584 = vmatpush.bf16.msra.mxu2 %v2479_v1  ;;  %768 = vmatpush.bf16.msra.mxu3 %v2499_v3  ;;  %v255_v8 = vld [vmem:[%s2752_s27 + $0x28] sm:$0x1]  ;;  %v2756_v10 = vld [vmem:[%s2752_s27] sm:$0xff]   ;;  %v2759_v11 = vld [vmem:[%s2752_s27 + $0x10] sm:$0xff]  ;;  %s3172_s6 = scalar_lea.vmem %s3326_s3, %s2598_s30 }
  0x16   : > { %v2762_v12 = vld [vmem:[%s2752_s27 + $0x20] sm:$0xff]  ;;  %v293_v13 = vunpack.c.l.b16 %v255_v8  ;;  %v2765_v15 = vld [vmem:[%s2752_s27 + $0x8] sm:$0xff]  ;;  %v304_v16 = vshll.u32 %v2756_v10, 16  ;;  %v2769_v18 = vld [vmem:[%s2752_s27 + $0x18] sm:$0xff]  ;;  %v317_v19 = vshll.u32 %v2759_v11, 16  ;;  %v302_v25 = vshrl.u32 %v2756_v10, 16 }
  0x17   : > { %v333_v21 = vshll.u32 %v2762_v12, 16  ;;  %v648_v22 = vld [vmem:[%s2752_s27 + $0x4] sm:$0xe]  ;;  %v2777_v23 = vld [vmem:[%s2752_s27 + $0x8] sm:$0xff]   ;;  %v309_v27 = vshll.u32 %v2765_v15, 16  ;;  %v321_v28 = vshrl.u32 %v2759_v11, 16 }
  0x18   : > { %400 = vmatpush.bf16.msra.mxu0 %v2478_v4  ;;  %2585 = vmatpush.bf16.msra.mxu1 %v2478_v4  ;;  %v2772_v20 = vpack.c.b16 %v293_v13, %v293_v13  ;;  %v306_v26 = vrot.slane %v304_v16, 1  ;;  %v2782_v30 = vrot.slane %v317_v19, 1  ;;  %v325_v31 = vshll.u32 %v2769_v18, 16  ;;  %v2792_v43 = vld [vmem:[%s2752_s27 + $0xc] sm:$0xff]  ;;  %v2488_v48 = vld [vmem:[#allocation2 + $0xb8] sm:$0xff]  ;;  %v2469_v3 = vld [vmem:[#allocation2 + $0x20] sm:$0xff] }
  0x19   : > { %2586 = vmatpush.bf16.msra.mxu2 %v2478_v4  ;;  %769 = vmatpush.bf16.msra.mxu3 %v2498_v5  ;;  %v686_v32 = vunpack.c.l.b16 %v648_v22  ;;  %v687_v33 = vunpack.c.l.b16 %v2777_v23  ;;  %v2786_v34 = vrot.slane %v333_v21, 1  ;;  %v337_v35 = vshrl.u32 %v2762_v12, 16  ;;  %v2508_v49 = vld [vmem:[#allocation2 + $0x138] sm:$0xff]  ;;  %v2471_v56 = vld [vmem:[#allocation2 + $0x30] sm:$0xff]  ;;  %v2470_v61 = vld [vmem:[#allocation2 + $0x28] sm:$0xff] }
  0x1a   : > { %v341_v36 = vshll.u32 %v2772_v20, 16  ;;  %v307_v38 = vor.u32 %v306_v26, %v302_v25  ;;  %v311_v40 = vrot.slane %v309_v27, 1  ;;  %v323_v41 = vor.u32 %v321_v28, %v2782_v30  ;;  %v2536_v57 = vld [vmem:[#allocation2 + $0x1f8] sm:$0xff]  ;;  %v2487_v58 = vld [vmem:[#allocation2 + $0xb0] sm:$0xff]  ;;  %v2486_v63 = vld [vmem:[#allocation2 + $0xa8] sm:$0xff] }
  0x1b   : > { %v327_v42 = vrot.slane %v325_v31, 1  ;;  %v2796_v44 = vpack.c.b16 %v687_v33, %v686_v32  ;;  %v339_v46 = vor.u32 %v337_v35, %v2786_v34  ;;  %v704_v54 = vrot.slane %v2792_v43, 1  ;;  %v2507_v59 = vld [vmem:[#allocation2 + $0x130] sm:$0xff]  ;;  %v2506_v0 = vld [vmem:[#allocation2 + $0x128] sm:$0xff]  ;;  %v2485_v4 = vld [vmem:[#allocation2 + $0xa0] sm:$0xff] }
  0x1c   : > { %401 = vmatpush.bf16.msra.mxu0 %v2477_v6  ;;  %2587 = vmatpush.bf16.msra.mxu1 %v2477_v6  ;;  %v343_v47 = vrot.slane %v341_v36, 1  ;;  %v312_v50 = vsel %vm300_vm0, %v307_v38, %v311_v40  ;;  %v2535_v62 = vld [vmem:[#allocation2 + $0x1f0] sm:$0xff]  ;;  %v313_v1 = vshrl.u32 %v2765_v15, 16  ;;  %v329_v2 = vshrl.u32 %v2769_v18, 16  ;;  %v2505_v5 = vld [vmem:[#allocation2 + $0x120] sm:$0xff]  ;;  %v2484_v13 = vld [vmem:[#allocation2 + $0x98] sm:$0xff] }
  0x1d   : > { %2588 = vmatpush.bf16.msra.mxu2 %v2477_v6  ;;  %770 = vmatpush.bf16.msra.mxu3 %v2497_v7  ;;  %v328_v51 = vsel %vm300_vm0, %v323_v41, %v327_v42  ;;  %v703_v53 = vrot.slane %v2796_v44, 1  ;;  %v2808_v8 = vld [vmem:[%s2752_s27 + $0x14] sm:$0xff]  ;;  %v2574_v25 = vld [vmem:[%s2752_s27] sm:$0xf0]  ;;  %v2575_v26 = vld [vmem:[%s2752_s27] sm:$0xe] }
  0x1e   : > { %v344_v55 = vsel %vm300_vm0, %v339_v46, %v343_v47  ;;  %v315_v6 = vor.u32 %v313_v1, %v311_v40  ;;  %v331_v7 = vor.u32 %v329_v2, %v327_v42  ;;  %v706_v19 = vrot.slane %v2808_v8, 1  ;;  %v2467_v21 = vld [vmem:[#allocation2 + $0x10] sm:$0xff]  ;;  %v2534_v28 = vld [vmem:[#allocation2 + $0x1e8] sm:$0xff]  ;;  %v2465_v42 = vld [vmem:[#allocation2] sm:$0xff] }
  0x1f   : > { %v705_v60 = vsel %vm539_vm1, %v703_v53, %v704_v54  ;;  %v2483_v22 = vld [vmem:[#allocation2 + $0x90] sm:$0xff]  ;;  %v833_v27 = vshrl.u32 %v2796_v44, 16  ;;  %v844_v31 = vshll.u32 %v2792_v43, 16  ;;  %v2482_v35 = vld [vmem:[#allocation2 + $0x88] sm:$0xff]  ;;  %v541_v46 = vrot.slane %v2765_v15, 1  ;;  %v2501_v47 = vld [vmem:[#allocation2 + $0x100] sm:$0xff] }
  0x20   : > { %402 = vmatpush.bf16.msra.mxu0 %v2476_v9  ;;  %2589 = vmatpush.bf16.msra.mxu1 %v2476_v9  ;;  %v320_v16 = vsel %vm300_vm0, %v315_v6, %v2782_v30  ;;  %v841_v30 = vshrl.u32 %v2792_v43, 16  ;;  %v707_v32 = vsel %vm539_vm1, %v704_v54, %v706_v19  ;;  %v2502_v36 = vld [vmem:[#allocation2 + $0x108] sm:$0xff]  ;;  %v2826_v53 = vld [vmem:[%s2752_s27 + $0x1c] sm:$0xff] }
  0x21   : > { %2590 = vmatpush.bf16.msra.mxu2 %v2476_v9  ;;  %771 = vmatpush.bf16.msra.mxu3 %v2496_v14  ;;  %v2468_v9 = vld [vmem:[#allocation2 + $0x18] sm:$0xff]  ;;  %v835_v38 = vrot.slane %v833_v27, 1  ;;  %v846_v41 = vrot.slane %v844_v31, 2  ;;  %v2542_v2 = vld [vmem:[#allocation2 + $0x228] sm:$0xff]  ;;  %v2513_v6 = vld [vmem:[#allocation2 + $0x160] sm:$0xff] }
  0x22   : > { %v2504_v14 = vld [vmem:[#allocation2 + $0x118] sm:$0xff]  ;;  %v843_v40 = vrot.slane %v841_v30, 1  ;;  %v2511_v27 = vld [vmem:[#allocation2 + $0x150] sm:$0xff]  ;;  %v2522_v31 = vld [vmem:[#allocation2 + $0x188] sm:$0xff] }
  0x24   : > { %403 = vmatpush.bf16.msra.mxu0 %v2475_v17  ;;  %2591 = vmatpush.bf16.msra.mxu1 %v2475_v17 }
  0x25   : > { %2592 = vmatpush.bf16.msra.mxu2 %v2475_v17  ;;  %772 = vmatpush.bf16.msra.mxu3 %v2495_v24  ;;  %v336_v17 = vsel %vm300_vm0, %v331_v7, %v2786_v34  ;;  %v2503_v24 = vld [vmem:[#allocation2 + $0x110] sm:$0xff]  ;;  %v2466_v34 = vld [vmem:[#allocation2 + $0x8] sm:$0xff]  ;;  %v2541_v7 = vld [vmem:[#allocation2 + $0x220] sm:$0xff] }
  0x28   : > { %404 = vmatpush.bf16.msra.mxu0 %v2474_v29  ;;  %2593 = vmatpush.bf16.msra.mxu1 %v2474_v29 }
  0x29   : > { %2594 = vmatpush.bf16.msra.mxu2 %v2474_v29  ;;  %773 = vmatpush.bf16.msra.mxu3 %v2494_v37  ;;  %v836_v29 = vshll.u32 %v2796_v44, 16  ;;  %v2576_v37 = vor.u32 %v2575_v26, %v2574_v25  ;;  %v2481_v44 = vld [vmem:[#allocation2 + $0x80] sm:$0xff]  ;;  %v2540_v25 = vld [vmem:[#allocation2 + $0x218] sm:$0xff]  ;;  %v2531_v26 = vld [vmem:[#allocation2 + $0x1d0] sm:$0xff] }
  0x2c   : > { %405 = vmatpush.bf16.msra.mxu0 %v2473_v39  ;;  %2595 = vmatpush.bf16.msra.mxu1 %v2473_v39 }
  0x2d   : > { %2596 = vmatpush.bf16.msra.mxu2 %v2473_v39  ;;  %774 = vmatpush.bf16.msra.mxu3 %v2493_v52  ;;  %v838_v39 = vrot.slane %v836_v29, 2  ;;  %v2544_v52 = vld [vmem:[#allocation2 + $0x238] sm:$0xff]  ;;  %v862_v29 = vshll.u32 %v2826_v53, 16 }
  0x2f   : > { %406 = vmatmul.bf16.vlgmr.msra.gmra.mxu0 %v312_v50  ;;  %416 = vmatmul.bf16.vlgmr.msra.gmra.mxu1 %v328_v51  ;;  %v839_v50 = vor.u32 %v838_v39, %v835_v38  ;;  %v847_v51 = vor.u32 %v846_v41, %v843_v40  ;;  %v545_v38 = vrot.slane %v2769_v18, 1 }
  0x30   : > { %485 = vmatpush.bf16.msrb.mxu1 %v2472_v45  ;;  %938 = vmatpush.bf16.msrb.mxu0 %v2508_v49  ;;  %v540_v45 = vrot.slane %v2576_v37, 1  ;;  %v2516_v49 = vld [vmem:[#allocation2 + $0x178] sm:$0xff] }
  0x31   : > { %604 = vmatpush.bf16.msrb.mxu2 %v2488_v48  ;;  %1401 = vmatpush.bf16.msrb.mxu3 %v2536_v57  ;;  %v2528_v48 = vld [vmem:[#allocation2 + $0x1b8] sm:$0xff]  ;;  %v2515_v57 = vld [vmem:[#allocation2 + $0x170] sm:$0xff] }
  0x32   : > { %426 = vmatmul.bf16.vlgmr.msra.gmra.mxu2 %v344_v55  ;;  %775 = vmatmul.bf16.vlgmr.msra.gmra.mxu3 %v705_v60  ;;  %v542_v54 = vsel %vm539_vm1, %v540_v45, %v541_v46  ;;  %v848_v55 = vsel %vm831_vm2, %v839_v50, %v847_v51  ;;  %v2533_v60 = vld [vmem:[#allocation2 + $0x1e0] sm:$0xff] }
  0x34   : > { %486 = vmatpush.bf16.msrb.mxu1 %v2471_v56  ;;  %939 = vmatpush.bf16.msrb.mxu0 %v2507_v59  ;;  %v2527_v56 = vld [vmem:[#allocation2 + $0x1b0] sm:$0xff] }
  0x35   : > { %605 = vmatpush.bf16.msrb.mxu2 %v2487_v58  ;;  %1402 = vmatpush.bf16.msrb.mxu3 %v2535_v62  ;;  %v708_v58 = vrot.slane %v2826_v53, 1  ;;  %v2543_v59 = vld [vmem:[#allocation2 + $0x230] sm:$0xff]  ;;  %v853_v62 = vshll.u32 %v2808_v8, 16 }
  0x37   : > { %v709_v1 = vsel %vm539_vm1, %v706_v19, %v708_v58 }
  0x38   : > { %487 = vmatpush.bf16.msrb.mxu1 %v2470_v61  ;;  %940 = vmatpush.bf16.msrb.mxu0 %v2506_v0  ;;  %v850_v61 = vshrl.u32 %v2808_v8, 16  ;;  %v2514_v0 = vld [vmem:[#allocation2 + $0x168] sm:$0xff] }
  0x39   : > { %606 = vmatpush.bf16.msrb.mxu2 %v2486_v63  ;;  %1403 = vmatpush.bf16.msrb.mxu3 %v2534_v28  ;;  %v2526_v63 = vld [vmem:[#allocation2 + $0x1a8] sm:$0xff]  ;;  %v859_v28 = vshrl.u32 %v2826_v53, 16 }
  0x3c   : > { %488 = vmatpush.bf16.msrb.mxu1 %v2469_v3  ;;  %941 = vmatpush.bf16.msrb.mxu0 %v2505_v5  ;;  %v2532_v3 = vld [vmem:[#allocation2 + $0x1d8] sm:$0xff]  ;;  %v2525_v5 = vld [vmem:[#allocation2 + $0x1a0] sm:$0xff] }
  0x3d   : > { %607 = vmatpush.bf16.msrb.mxu2 %v2485_v4  ;;  %1404 = vmatpush.bf16.msrb.mxu3 %v2533_v60  ;;  %v855_v4 = vrot.slane %v853_v62, 2  ;;  %v811_v60 = vld [vmem:[%s2752_s27 + $0x2c] sm:$0x3] }
  0x3f   : > { %411 = vmatmul.bf16.gmra.mxu0 %v320_v16  ;;  %421 = vmatmul.bf16.gmra.mxu1 %v336_v17  ;;  %v2839_v16 = vld [vmem:[%s2752_s27 + $0x24] sm:$0xff]  ;;  %v2512_v17 = vld [vmem:[#allocation2 + $0x158] sm:$0xff] }
  0x40   : > { %489 = vmatpush.bf16.msrb.mxu1 %v2468_v9  ;;  %942 = vmatpush.bf16.msrb.mxu0 %v2504_v14  ;;  %v543_v9 = vrot.slane %v2759_v11, 1  ;;  %v2524_v14 = vld [vmem:[#allocation2 + $0x198] sm:$0xff]  ;;  %v871_v50 = vshll.u32 %v2839_v16, 16 }
  0x41   : > { %608 = vmatpush.bf16.msrb.mxu2 %v2484_v13  ;;  %1405 = vmatpush.bf16.msrb.mxu3 %v2532_v3  ;;  %v829_v3 = vunpack.c.l.b16 %v811_v60 }
  0x42   : > { %780 = vmatmul.bf16.gmra.mxu3 %v707_v32  ;;  %v544_v19 = vsel %vm539_vm1, %v541_v46, %v543_v9  ;;  %v2539_v32 = vld [vmem:[#allocation2 + $0x210] sm:$0xff]  ;;  %v546_v41 = vsel %vm539_vm1, %v543_v9, %v545_v38  ;;  %v2537_v9 = vld [vmem:[#allocation2 + $0x200] sm:$0xff] }
  0x44   : > { %490 = vmatpush.bf16.msrb.mxu1 %v2467_v21  ;;  %943 = vmatpush.bf16.msrb.mxu0 %v2503_v24  ;;  %v2523_v24 = vld [vmem:[#allocation2 + $0x190] sm:$0xff] }
  0x45   : > { %609 = vmatpush.bf16.msrb.mxu2 %v2483_v22  ;;  %v710_v22 = vrot.slane %v2839_v16, 1  ;;  %1406 = vmatpush.bf16.msrb.mxu3 %v2531_v26 }
  0x47   : > { %v711_v30 = vsel %vm539_vm1, %v708_v58, %v710_v22 }
  0x48   : > { %491 = vmatpush.bf16.msrb.mxu1 %v2466_v34  ;;  %944 = vmatpush.bf16.msrb.mxu0 %v2502_v36  ;;  %v658_v34 = vld [vmem:[%s2752_s27 + $0x2c] sm:$0x1]  ;;  %v864_v36 = vrot.slane %v862_v29, 2 }
  0x49   : > { %610 = vmatpush.bf16.msrb.mxu2 %v2482_v35  ;;  %v2530_v35 = vld [vmem:[#allocation2 + $0x1c8] sm:$0xff]  ;;  %v696_v37 = vunpack.c.l.b16 %v658_v34 }
  0x4a   : > { %1407 = vmatpush.bf16.msrb.mxu3 %v2530_v35 }
  0x4b   : > { %v702_v40 = vpack.c.b16 %v696_v37, %v696_v37  ;;  %v1445_v37 = vld [vmem:[%s2752_s27 + $0x8] sm:$0x8] }
  0x4c   : > { %492 = vmatpush.bf16.msrb.mxu1 %v2465_v42  ;;  %945 = vmatpush.bf16.msrb.mxu0 %v2501_v47  ;;  %v1111_v42 = vld [vmem:[%s2752_s27 + $0x8] sm:$0xc]  ;;  %v1150_v47 = vunpack.c.h.b16 %v2777_v23 }
  0x4d   : > { %611 = vmatpush.bf16.msrb.mxu2 %v2481_v44  ;;  %v712_v45 = vrot.slane %v702_v40, 1  ;;  %v1149_v46 = vunpack.c.l.b16 %v1111_v42 }
  0x4f   : > { %493 = vmatmul.bf16.vlgmr.msrb.gmra.mxu1 %v2756_v10  ;;  %946 = vmatmul.bf16.vlgmr.msrb.gmra.mxu0 %v848_v55  ;;  %v852_v10 = vrot.slane %v850_v61, 1  ;;  %v713_v55 = vsel %vm539_vm1, %v710_v22, %v712_v45  ;;  %v2863_v58 = vpack.c.b16 %v1150_v47, %v1149_v46 }
  0x50   : > { %1067 = vmatpush.bf16.msra.mxu1 %v2516_v49  ;;  %1530 = vmatpush.bf16.msra.mxu0 %v2544_v52  ;;  %v868_v49 = vshrl.u32 %v2839_v16, 16  ;;  %v2538_v52 = vld [vmem:[#allocation2 + $0x208] sm:$0xff] }
  0x51   : > { %1230 = vmatpush.bf16.msra.mxu2 %v2528_v48  ;;  %v856_v13 = vor.u32 %v855_v4, %v852_v10  ;;  %v2510_v48 = vld [vmem:[#allocation2 + $0x148] sm:$0xff]  ;;  %v1296_v61 = vshrl.u32 %v2863_v58, 16  ;;  %v1299_v62 = vshll.u32 %v2863_v58, 16 }
  0x52   : > { %612 = vmatmul.bf16.vlgmr.msrb.gmra.mxu2 %v542_v54  ;;  %785 = vmatmul.bf16.gmra.mxu3 %v709_v1  ;;  %v2529_v54 = vld [vmem:[#allocation2 + $0x1c0] sm:$0xff]  ;;  %v547_v1 = vrot.slane %v2762_v12, 1 }
  0x53   : > { %v857_v21 = vsel %vm831_vm2, %v847_v51, %v856_v13  ;;  %v2521_v51 = vld [vmem:[#allocation2 + $0x180] sm:$0xff]  ;;  %1408 = vmatpush.bf16.msrb.mxu3 %v2529_v54  ;;  %v1298_v10 = vrot.slane %v1296_v61, 2  ;;  %v1301_v4 = vrot.slane %v1299_v62, 3 }
  0x54   : > { %1068 = vmatpush.bf16.msra.mxu1 %v2515_v57  ;;  %1531 = vmatpush.bf16.msra.mxu0 %v2543_v59  ;;  %v2859_v57 = vld [vmem:[%s2752_s27 + $0x10] sm:$0xff]  ;;  %v873_v59 = vrot.slane %v871_v50, 2 }
  0x55   : > { %1231 = vmatpush.bf16.msra.mxu2 %v2527_v56  ;;  %v2509_v56 = vld [vmem:[#allocation2 + $0x140] sm:$0xff]  ;;  %v1167_v46 = vrot.slane %v2859_v57, 2 }
  0x58   : > { %1069 = vmatpush.bf16.msra.mxu1 %v2514_v0  ;;  %1532 = vmatpush.bf16.msra.mxu0 %v2542_v2  ;;  %v1307_v0 = vshll.u32 %v2859_v57, 16 }
  0x59   : > { %1232 = vmatpush.bf16.msra.mxu2 %v2526_v63  ;;  %v1304_v63 = vshrl.u32 %v2859_v57, 16 }
  0x5c   : > { %1070 = vmatpush.bf16.msra.mxu1 %v2513_v6  ;;  %1533 = vmatpush.bf16.msra.mxu0 %v2541_v7  ;;  %v1309_v6 = vrot.slane %v1307_v0, 3  ;;  %v548_v7 = vsel %vm539_vm1, %v545_v38, %v547_v1  ;;  %v1274_v0 = vld [vmem:[%s2752_s27 + $0x30] sm:$0x7] }
  0x5d   : > { %1233 = vmatpush.bf16.msra.mxu2 %v2525_v5  ;;  %v1306_v5 = vrot.slane %v1304_v63, 2 }
  0x5f   : > { %498 = vmatmul.bf16.gmra.mxu1 %v2765_v15  ;;  %951 = vmatmul.bf16.gmra.mxu0 %v857_v21  ;;  %v861_v15 = vrot.slane %v859_v28, 1 }
  0x60   : > { %1071 = vmatpush.bf16.msra.mxu1 %v2512_v17  ;;  %1534 = vmatpush.bf16.msra.mxu0 %v2540_v25  ;;  %v1302_v17 = vor.u32 %v1301_v4, %v1298_v10  ;;  %v2880_v25 = vld [vmem:[%s2752_s27 + $0x18] sm:$0xff] }
  0x61   : > { %1234 = vmatpush.bf16.msra.mxu2 %v2524_v14  ;;  %v865_v39 = vor.u32 %v864_v36, %v861_v15  ;;  %v2873_v14 = vpack.c.b16 %v829_v3, %v829_v3  ;;  %v1313_v28 = vshrl.u32 %v2880_v25, 16  ;;  %v1316_v29 = vshll.u32 %v2880_v25, 16  ;;  %v982_v15 = vld [vmem:[%s2752_s27 + $0x4] sm:$0xc] }
  0x62   : > { %617 = vmatmul.bf16.gmra.mxu2 %v544_v19  ;;  %790 = vmatmul.bf16.gmra.mxu3 %v711_v30  ;;  %v1310_v19 = vor.u32 %v1309_v6, %v1306_v5  ;;  %v1000_v38 = vunpack.c.l.b16 %v982_v15  ;;  %v1469_v60 = vrot.slane %v2880_v25, 3  ;;  %v1292_v5 = vunpack.c.l.b16 %v1274_v0 }
  0x63   : > { %v866_v44 = vsel %vm831_vm2, %v856_v13, %v865_v39  ;;  %v877_v21 = vshrl.u32 %v2873_v14, 16  ;;  %v880_v22 = vshll.u32 %v2873_v14, 16 }
  0x64   : > { %1072 = vmatpush.bf16.msra.mxu1 %v2511_v27  ;;  %1535 = vmatpush.bf16.msra.mxu0 %v2539_v32  ;;  %v1318_v32 = vrot.slane %v1316_v29, 3  ;;  %v2923_v6 = vpack.c.b16 %v1292_v5, %v1292_v5 }
  0x65   : > { %1235 = vmatpush.bf16.msra.mxu2 %v2523_v24  ;;  %v1311_v24 = vsel %vm1294_vm3, %v1302_v17, %v1310_v19  ;;  %v879_v26 = vrot.slane %v877_v21, 1  ;;  %v882_v27 = vrot.slane %v880_v22, 2  ;;  %v1008_v22 = vrot.slane %v2826_v53, 2 }
  0x66   : > { %v1343_v17 = vshll.u32 %v2923_v6, 16 }
  0x67   : > { %v883_v30 = vor.u32 %v882_v27, %v879_v26 }
  0x68   : > { %1073 = vmatpush.bf16.msra.mxu1 %v2510_v48  ;;  %1536 = vmatpush.bf16.msra.mxu0 %v2538_v52  ;;  %v1345_v26 = vrot.slane %v1343_v17, 3 }
  0x69   : > { %1236 = vmatpush.bf16.msra.mxu2 %v2522_v31  ;;  %v1315_v31 = vrot.slane %v1313_v28, 2 }
  0x6b   : > { %v1319_v36 = vor.u32 %v1318_v32, %v1315_v31 }
  0x6c   : > { %1074 = vmatpush.bf16.msra.mxu1 %v2509_v56  ;;  %1537 = vmatpush.bf16.msra.mxu0 %v2537_v9 }
  0x6d   : > { %1237 = vmatpush.bf16.msra.mxu2 %v2521_v51  ;;  %v1320_v40 = vsel %vm1294_vm3, %v1310_v19, %v1319_v36 }
  0x6f   : > { %503 = vmatmul.bf16.gmra.mxu1 %v2759_v11  ;;  %956 = vmatmul.bf16.gmra.mxu0 %v866_v44  ;;  %v870_v11 = vrot.slane %v868_v49, 1  ;;  %v1004_v49 = vrot.slane %v2792_v43, 2  ;;  %v2909_v43 = vld [vmem:[%s2752_s27 + $0x28] sm:$0xff] }
  0x71   : > { %v874_v2 = vor.u32 %v873_v59, %v870_v11  ;;  %v1169_v11 = vrot.slane %v2880_v25, 2  ;;  %v1006_v59 = vrot.slane %v2808_v8, 2 }
  0x72   : > { %622 = vmatmul.bf16.gmra.mxu2 %v546_v41  ;;  %795 = vmatmul.bf16.gmra.mxu3 %v713_v55  ;;  %v2892_v41 = vld [vmem:[%s2752_s27 + $0x20] sm:$0xff] }
  0x73   : > { %v875_v13 = vsel %vm831_vm2, %v865_v39, %v874_v2  ;;  %v884_v35 = vsel %vm831_vm2, %v874_v2, %v883_v30  ;;  %v1463_v39 = vunpack.c.l.b16 %v1445_v37  ;;  %v1322_v44 = vshrl.u32 %v2892_v41, 16 }
  0x74   : > { %v1325_v45 = vshll.u32 %v2892_v41, 16  ;;  %v1170_v63 = vsel %vm1002_vm4, %v1167_v46, %v1169_v11  ;;  %v1007_v3 = vsel %vm1002_vm4, %v1004_v49, %v1006_v59  ;;  %v1171_v19 = vrot.slane %v2892_v41, 2 }
  0x75   : > { %v1464_v42 = vpack.c.b16 %v1150_v47, %v1463_v39  ;;  %v1324_v51 = vrot.slane %v1322_v44, 2  ;;  %v1010_v39 = vrot.slane %v2839_v16, 2 }
  0x76   : > { %v1327_v52 = vrot.slane %v1325_v45, 3  ;;  %v1172_v27 = vsel %vm1002_vm4, %v1169_v11, %v1171_v19 }
  0x77   : > { %v1466_v50 = vrot.slane %v1464_v42, 3  ;;  %v1011_v45 = vsel %vm1002_vm4, %v1008_v22, %v1010_v39 }
  0x78   : > { %v1328_v55 = vor.u32 %v1327_v52, %v1324_v51 }
  0x7a   : > { %v1329_v56 = vsel %vm1294_vm3, %v1319_v36, %v1328_v55  ;;  %v1173_v36 = vrot.slane %v2909_v43, 2 }
  0x7f   : > { %508 = vmatmul.bf16.gmra.mxu1 %v2769_v18  ;;  %961 = vmatmul.bf16.gmra.mxu0 %v875_v13  ;;  %v549_v18 = vrot.slane %v2772_v20, 1  ;;  %v1001_v20 = vpack.c.b16 %v687_v33, %v1000_v38  ;;  %v1467_v33 = vrot.slane %v2859_v57, 3  ;;  %v1331_v57 = vshrl.u32 %v2909_v43, 16 }
  0x80   : > { %v1340_v13 = vshrl.u32 %v2923_v6, 16 }
  0x81   : > { %v550_v34 = vsel %vm539_vm1, %v547_v1, %v549_v18  ;;  %v1003_v48 = vrot.slane %v1001_v20, 2  ;;  %v1468_v54 = vsel %vm1465_vm5, %v1466_v50, %v1467_v33  ;;  %v1333_v61 = vrot.slane %v1331_v57, 2  ;;  %v1121_v20 = vld [vmem:[%s2752_s27 + $0x30] sm:$0x3] }
  0x82   : > { %627 = vmatmul.bf16.gmra.mxu2 %v548_v7  ;;  %1409 = vmatmul.bf16.vlgmr.msrb.gmra.mxu3 %v1311_v24  ;;  %v1470_v10 = vsel %vm1465_vm5, %v1467_v33, %v1469_v60  ;;  %v1471_v24 = vrot.slane %v2892_v41, 3  ;;  %v1342_v25 = vrot.slane %v1340_v13, 2  ;;  %v1009_v18 = vsel %vm1002_vm4, %v1006_v59, %v1008_v22 }
  0x83   : > { %v1005_v47 = vsel %vm1002_vm4, %v1003_v48, %v1004_v49  ;;  %v1174_v41 = vsel %vm1002_vm4, %v1171_v19, %v1173_v36  ;;  %v1159_v48 = vunpack.c.l.b16 %v1121_v20  ;;  %v1012_v57 = vrot.slane %v2873_v14, 2 }
  0x84   : > { %v1472_v30 = vsel %vm1465_vm5, %v1469_v60, %v1471_v24  ;;  %v1346_v31 = vor.u32 %v1345_v26, %v1342_v25 }
  0x85   : > { %v1165_v16 = vpack.c.b16 %v1159_v48, %v1159_v48 }
  0x8f   : > { %513 = vmatmul.bf16.gmra.mxu1 %v2762_v12  ;;  %966 = vmatmul.bf16.gmra.mxu0 %v884_v35  ;;  %v1166_v12 = vrot.slane %v2863_v58, 2  ;;  %v1334_v58 = vshll.u32 %v2909_v43, 16 }
  0x91   : > { %v1168_v23 = vsel %vm1002_vm4, %v1166_v12, %v1167_v46  ;;  %v1336_v62 = vrot.slane %v1334_v58, 3  ;;  %v1475_v58 = vrot.slane %v2923_v6, 3 }
  0x92   : > { %632 = vmatmul.bf16.gmra.mxu2 %v550_v34  ;;  %1414 = vmatmul.bf16.gmra.mxu3 %v1320_v40  ;;  %v1473_v40 = vrot.slane %v2909_v43, 3 }
  0x93   : > { %v1337_v4 = vor.u32 %v1336_v62, %v1333_v61 }
  0x94   : > { %v1474_v12 = vsel %vm1465_vm5, %v1471_v24, %v1473_v40  ;;  %v1476_v0 = vsel %vm1465_vm5, %v1473_v40, %v1475_v58 }
  0x95   : > { %v1338_v8 = vsel %vm1294_vm3, %v1328_v55, %v1337_v4  ;;  %v1347_v53 = vsel %vm1294_vm3, %v1337_v4, %v1346_v31  ;;  %v1175_v55 = vrot.slane %v1165_v16, 2 }
  0x97   : > { %v1176_v59 = vsel %vm1002_vm4, %v1173_v36, %v1175_v55 }
  0x9f   : > { %1075 = vmatmul.bf16.vlgmr.msra.gmra.mxu1 %v1005_v47  ;;  %1538 = vmatmul.bf16.vlgmr.msra.gmra.mxu0 %v1468_v54 }
  0xa2   : > { %1238 = vmatmul.bf16.vlgmr.msra.gmra.mxu2 %v1168_v23  ;;  %1419 = vmatmul.bf16.gmra.mxu3 %v1329_v56 }
  0xac   : > { %v407_v1 = vpop.f32.mrf.mxu0  ;;  %v2918_v2 = vpop.f32.mrf.mxu1 }
  0xaf   : > { %1080 = vmatmul.bf16.gmra.mxu1 %v1007_v3  ;;  %1543 = vmatmul.bf16.gmra.mxu0 %v1470_v10 }
  0xb2   : > { %1243 = vmatmul.bf16.gmra.mxu2 %v1170_v63  ;;  %1424 = vmatmul.bf16.gmra.mxu3 %v1338_v8  ;;  %v1013_v63 = vsel %vm1002_vm4, %v1010_v39, %v1012_v57 }
  0xb4   : > { %v409_v7 = vpop.f32.mrf.mxu0  ;;  %v2925_v9 = vpop.f32.mrf.mxu1 }
  0xb5   : > { %v776_v21 = vpop.f32.mrf.mxu3  ;;  %v2937_v32 = vpop.f32.mrf.mxu2 }
  0xbc   : > { %v412_v28 = vpop.f32.mrf.mxu0  ;;  %v2933_v29 = vpop.f32.mrf.mxu1 }
  0xbd   : > { %v778_v34 = vpop.f32.mrf.mxu3  ;;  %v2943_v38 = vpop.f32.mrf.mxu2 }
  0xbf   : > { %1085 = vmatmul.bf16.gmra.mxu1 %v1009_v18  ;;  %1548 = vmatmul.bf16.gmra.mxu0 %v1472_v30 }
  0xc2   : > { %1248 = vmatmul.bf16.gmra.mxu2 %v1172_v27  ;;  %1429 = vmatmul.bf16.gmra.mxu3 %v1347_v53  ;;  %v1598_v27 = vlaneseq }
  0xc4   : > { %v414_v35 = vpop.f32.mrf.mxu0  ;;  %v2940_v15 = vpop.f32.mrf.mxu1  ;;  %v2965_v18 = vshrl.u32 %v1598_v27, 7 }
  0xc5   : > { %v781_v37 = vpop.f32.mrf.mxu3 }
  0xc6   : > { %v1612_v53 = vand.u32 65535, %v2965_v18  ;;  %v1613_v36 = vshrl.u32 %v2965_v18, 16 }
  0xc8   : > { %v2971_v40 = vmul.u32 52428, %v1612_v53  ;;  %v2976_v20 = vmul.u32 52429, %v1613_v36 }
  0xcc   : > { %v494_v42 = vpop.f32.mrf.mxu1  ;;  %v947_v44 = vpop.f32.mrf.mxu0 }
  0xcd   : > { %v495_v46 = vadd.f32 %v494_v42, %v407_v1  ;;  %v783_v49 = vpop.f32.mrf.mxu3 }
  0xcf   : > { %1090 = vmatmul.bf16.gmra.mxu1 %v1011_v45  ;;  %1553 = vmatmul.bf16.gmra.mxu0 %v1474_v12  ;;  %v1619_v45 = vshll.u32 %v2971_v40, 16  ;;  %v2980_v12 = vadd.s32 8, %v2965_v18 }
  0xd1   : > { %v1641_v48 = vand.u32 65535, %v2980_v12 }
  0xd2   : > { %1253 = vmatmul.bf16.gmra.mxu2 %v1174_v41 }
  0xd3   : > { %v1644_v55 = vmul.u32 52429, %v1641_v48 }
  0xd4   : > { %v496_v52 = vpop.f32.mrf.mxu1  ;;  %v949_v23 = vpop.f32.mrf.mxu0 }
  0xd5   : > { %v613_v50 = vpop.f32.mrf.mxu2  ;;  %v497_v47 = vadd.f32 %v496_v52, %v409_v7  ;;  %v786_v56 = vpop.f32.mrf.mxu3 }
  0xd6   : > { %v638_v33 = vadd.f32 %v613_v50, %v495_v46 }
  0xd8   : > { %v801_v51 = vadd.f32 %v776_v21, %v638_v33  ;;  %v1621_v33 = vshll.u32 %v2976_v20, 16 }
  0xda   : > { %v2951_v54 = vadd.f32 %v947_v44, %v801_v51  ;;  %v1615_v44 = vmul.u32 52429, %v1612_v53 }
  0xdc   : > { %v499_v61 = vpop.f32.mrf.mxu1  ;;  %v952_v62 = vpop.f32.mrf.mxu0  ;;  %vm1623_vm6 = vc.u32 %v1615_v44, %v1619_v45  ;;  %v1625_v52 = vadd.s32 %v1619_v45, %v1615_v44  ;;  %v1622_v45 = vshrl.u32 %v2976_v20, 16 }
  0xdd   : > { %v615_v43 = vpop.f32.mrf.mxu2  ;;  %v500_v1 = vadd.f32 %v499_v61, %v412_v28  ;;  %v788_v10 = vpop.f32.mrf.mxu3  ;;  %v2995_v61 = vadd.s32 16, %v2965_v18 }
  0xde   : > { %v639_v11 = vadd.f32 %v615_v43, %v497_v47  ;;  %v1618_v43 = vmul.u32 52428, %v1613_v36  ;;  %vm1627_vm7 = vc.u32 %v1625_v52, %v1621_v33 }
  0xdf   : > { %1095 = vmatmul.bf16.gmra.mxu1 %v1013_v63  ;;  %1558 = vmatmul.bf16.gmra.mxu0 %v1476_v0 }
  0xe0   : > { %v802_v60 = vadd.f32 %v778_v34, %v639_v11  ;;  %v2699_v11 = vmov 0  }
  0xe2   : > { %1258 = vmatmul.bf16.gmra.mxu2 %v1176_v59  ;;  %v2958_v3 = vadd.f32 %v949_v23, %v802_v60  ;;  %v1645_v23 = vmul.u32 52428, %v1641_v48  ;;  %v1624_v59 = vsel %vm1623_vm6, 1, %v2699_v11 }
  0xe4   : > { %v501_v8 = vpop.f32.mrf.mxu1  ;;  %v954_v6 = vpop.f32.mrf.mxu0  ;;  %v1648_v57 = vshll.u32 %v1645_v23, 16 }
  0xe5   : > { %v618_v14 = vpop.f32.mrf.mxu2  ;;  %v502_v7 = vadd.f32 %v501_v8, %v414_v35  ;;  %v791_v17 = vpop.f32.mrf.mxu3  ;;  %v1671_v8 = vshrl.u32 %v2995_v61, 16 }
  0xe6   : > { %v640_v4 = vadd.f32 %v618_v14, %v500_v1  ;;  %vm1652_vm8 = vc.u32 %v1644_v55, %v1648_v57  ;;  %v1626_v14 = vadd.s32 %v1624_v59, %v1618_v43 }
  0xe7   : > { %v1653_v1 = vsel %vm1652_vm8, 1, %v2699_v11  ;;  %v3007_v27 = vmul.u32 52429, %v1671_v8 }
  0xe8   : > { %v803_v5 = vadd.f32 %v781_v37, %v640_v4 }
  0xea   : > { %v2960_v13 = vadd.f32 %v952_v62, %v803_v5  ;;  %v1628_v5 = vsel %vm1627_vm7, 1, %v2699_v11 }
  0xec   : > { %v504_v24 = vpop.f32.mrf.mxu1  ;;  %v957_v25 = vpop.f32.mrf.mxu0 }
  0xed   : > { %v620_v19 = vpop.f32.mrf.mxu2  ;;  %v505_v26 = vadd.f32 %v504_v24, %v2918_v2  ;;  %v2967_v34 = vpop.f32.mrf.mxu3 }
  0xee   : > { %v641_v21 = vadd.f32 %v620_v19, %v502_v7 }
  0xf0   : > { %v804_v22 = vadd.f32 %v783_v49, %v641_v21 }
  0xf2   : > { %v2963_v28 = vadd.f32 %v954_v6, %v804_v22 }
  0xf4   : > { %v506_v37 = vpop.f32.mrf.mxu1  ;;  %v959_v39 = vpop.f32.mrf.mxu0 }
  0xf5   : > { %v623_v30 = vpop.f32.mrf.mxu2  ;;  %v507_v2 = vadd.f32 %v506_v37, %v2925_v9  ;;  %v2983_v50 = vpop.f32.mrf.mxu3  ;;  %v1642_v9 = vshrl.u32 %v2980_v12, 16  ;;  %v1649_v37 = vshrl.u32 %v1645_v23, 16 }
  0xf6   : > { %v642_v31 = vadd.f32 %v623_v30, %v505_v26  ;;  %v1630_v30 = vadd.s32 %v1628_v5, %v1626_v14 }
  0xf7   : > { %v1647_v63 = vmul.u32 52428, %v1642_v9 }
  0xf8   : > { %v805_v35 = vadd.f32 %v786_v56, %v642_v31  ;;  %v2988_v56 = vmul.u32 52429, %v1642_v9 }
  0xf9   : > { %v1655_v19 = vadd.s32 %v1653_v1, %v1647_v63 }
  0xfa   : > { %v2974_v41 = vadd.f32 %v957_v25, %v805_v35  ;;  %v1650_v60 = vshll.u32 %v2988_v56, 16  ;;  %v3014_v35 = vadd.s32 24, %v2965_v18  ;;  %v1651_v48 = vshrl.u32 %v2988_v56, 16 }
  0xfc   : > { %v509_v16 = vpop.f32.mrf.mxu1  ;;  %v962_v51 = vpop.f32.mrf.mxu0  ;;  %v1699_v44 = vand.u32 65535, %v3014_v35 }
  0xfd   : > { %v625_v42 = vpop.f32.mrf.mxu2  ;;  %v510_v47 = vadd.f32 %v509_v16, %v2933_v29  ;;  %v1654_v29 = vadd.s32 %v1648_v57, %v1644_v55  ;;  %v3004_v24 = vpop.f32.mrf.mxu3  ;;  %v1676_v16 = vmul.u32 52428, %v1671_v8 }
  0xfe   : > { %v643_v46 = vadd.f32 %v625_v42, %v507_v2  ;;  %v1679_v2 = vshll.u32 %v3007_v27, 16  ;;  %v1703_v52 = vmul.u32 52428, %v1699_v44  ;;  %v1702_v55 = vmul.u32 52429, %v1699_v44 }
  0xff   : > { %vm1656_vm9 = vc.u32 %v1654_v29, %v1650_v60  ;;  %v1680_v44 = vshrl.u32 %v3007_v27, 16 }
 0x100   : > { %v806_v49 = vadd.f32 %v788_v10, %v643_v46  ;;  %v1670_v10 = vand.u32 65535, %v2995_v61  ;;  %v1657_v25 = vsel %vm1656_vm9, 1, %v2699_v11  ;;  %v1706_v57 = vshll.u32 %v1703_v52, 16 }
 0x102   : > { %v2990_v58 = vadd.f32 %v959_v39, %v806_v49  ;;  %v3001_v21 = vmul.u32 52428, %v1670_v10  ;;  %v1673_v26 = vmul.u32 52429, %v1670_v10  ;;  %vm1710_vm12 = vc.u32 %v1702_v55, %v1706_v57 }
 0x103   : > { %v1711_v14 = vsel %vm1710_vm12, 1, %v2699_v11 }
 0x104   : > { %v511_v6 = vpop.f32.mrf.mxu1  ;;  %v964_v7 = vpop.f32.mrf.mxu0  ;;  %v1677_v31 = vshll.u32 %v3001_v21, 16  ;;  %v1678_v8 = vshrl.u32 %v3001_v21, 16 }
 0x105   : > { %v628_v62 = vpop.f32.mrf.mxu2  ;;  %v512_v22 = vadd.f32 %v511_v6, %v2940_v15  ;;  %v1659_v15 = vadd.s32 %v1657_v25, %v1655_v19  ;;  %v3024_v59 = vpop.f32.mrf.mxu3 }
 0x106   : > { %v644_v0 = vadd.f32 %v628_v62, %v510_v47  ;;  %v1683_v42 = vadd.s32 %v1677_v31, %v1673_v26  ;;  %vm1681_vm10 = vc.u32 %v1673_v26, %v1677_v31 }
 0x107   : > { %v1660_v9 = vadd.s32 %v1659_v15, %v1649_v37  ;;  %v1682_v47 = vsel %vm1681_vm10, 1, %v2699_v11 }
 0x108   : > { %v807_v4 = vadd.f32 %v791_v17, %v644_v0  ;;  %v1620_v17 = vshrl.u32 %v2971_v40, 16  ;;  %vm1685_vm11 = vc.u32 %v1683_v42, %v1679_v2  ;;  %v1684_v63 = vadd.s32 %v1682_v47, %v1676_v16 }
 0x109   : > { %v1661_v62 = vadd.s32 %v1660_v9, %v1651_v48  ;;  %v1686_v29 = vsel %vm1685_vm11, 1, %v2699_v11 }
 0x10a   : > { %v3011_v53 = vadd.f32 %v962_v51, %v807_v4  ;;  %v1631_v40 = vadd.s32 %v1630_v30, %v1620_v17  ;;  %v1700_v51 = vshrl.u32 %v3014_v35, 16  ;;  %v3031_v4 = vadd.s32 32, %v2965_v18 }
 0x10b   : > { %v1662_v30 = vshrl.u32 %v1661_v62, 3 }
 0x10c   : > { %v514_v49 = vpop.f32.mrf.mxu1  ;;  %v967_v33 = vpop.f32.mrf.mxu0  ;;  %v1632_v20 = vadd.s32 %v1631_v40, %v1622_v45  ;;  %v1704_v43 = vmul.u32 52429, %v1700_v51  ;;  %v1728_v25 = vand.u32 65535, %v3031_v4  ;;  %v1729_v26 = vshrl.u32 %v3031_v4, 16 }
 0x10d   : > { %v630_v36 = vpop.f32.mrf.mxu2  ;;  %v515_v23 = vadd.f32 %v514_v49, %v2937_v32  ;;  %v1712_v32 = vadd.s32 %v1706_v57, %v1702_v55  ;;  %v1663_v48 = vmul.u32 10, %v1662_v30  ;;  %v3050_v49 = vadd.s32 40, %v2965_v18 }
 0x10e   : > { %v645_v39 = vadd.f32 %v630_v36, %v512_v22  ;;  %v1708_v1 = vshll.u32 %v1704_v43, 16  ;;  %v1633_v10 = vshrl.u32 %v1632_v20, 3  ;;  %v1688_v22 = vadd.s32 %v1686_v29, %v1684_v63 }
 0x10f   : > { %v3041_v21 = vmul.u32 52428, %v1728_v25  ;;  %v3043_v2 = vmul.u32 52429, %v1729_v26  ;;  %v1709_v9 = vshrl.u32 %v1704_v43, 16  ;;  %v1734_v57 = vmul.u32 52428, %v1729_v26 }
 0x110   : > { %v808_v46 = vadd.f32 %v2967_v34, %v645_v39  ;;  %v1705_v34 = vmul.u32 52428, %v1700_v51  ;;  %vm1714_vm13 = vc.u32 %v1712_v32, %v1708_v1  ;;  %v1634_v37 = vmul.u32 10, %v1633_v10 }
 0x111   : > { %v1715_v31 = vsel %vm1714_vm13, 1, %v2699_v11  ;;  %v1731_v39 = vmul.u32 52429, %v1728_v25  ;;  %v1689_v45 = vadd.s32 %v1688_v22, %v1678_v8  ;;  %v1735_v40 = vshll.u32 %v3041_v21, 16 }
 0x112   : > { %v3026_v56 = vadd.f32 %v964_v7, %v808_v46  ;;  %v1713_v6 = vadd.s32 %v1711_v14, %v1705_v34  ;;  %v3047_v46 = vpop.f32.mrf.mxu3  ;;  %v1737_v51 = vshll.u32 %v3043_v2, 16 }
 0x113   : > { %vm1739_vm14 = vc.u32 %v1731_v39, %v1735_v40  ;;  %v1741_v27 = vadd.s32 %v1735_v40, %v1731_v39  ;;  %v1690_v20 = vadd.s32 %v1689_v45, %v1680_v44  ;;  %v3093_v44 = vld [vmem:[%s3325_s2] ss:$0 sm:$0xff] }
 0x114   : > { %v516_v7 = vpop.f32.mrf.mxu1  ;;  %v969_v19 = vpop.f32.mrf.mxu0  ;;  %v1717_v15 = vadd.s32 %v1715_v31, %v1713_v6  ;;  %v1740_v62 = vsel %vm1739_vm14, 1, %v2699_v11 }
 0x115   : > { %v633_v60 = vpop.f32.mrf.mxu2  ;;  %v517_v17 = vadd.f32 %v516_v7, %v2943_v38  ;;  %vm1743_vm0 = vc.u32 %v1741_v27, %v1737_v51  ;;  %v1691_v32 = vshrl.u32 %v1690_v20, 3 }
 0x116   : > { %v646_v0 = vadd.f32 %v633_v60, %v515_v23  ;;  %v1757_v23 = vand.u32 65535, %v3050_v49  ;;  %v1664_v60 = vsub.s32 %v2980_v12, %v1663_v48  ;;  %v1742_v12 = vadd.s32 %v1740_v62, %v1734_v57 }
 0x118   : > { %v809_v5 = vadd.f32 %v2983_v50, %v646_v0  ;;  %v1707_v50 = vshrl.u32 %v1703_v52, 16  ;;  %v1760_v63 = vmul.u32 52429, %v1757_v23  ;;  %v3064_v29 = vmul.u32 52428, %v1757_v23 }
 0x119   : > { %vm1900_vm2 = vcmp.ne.s32.totalorder %v1664_v60, 0  ;;  %vm1910_vm3 = vcmp.lt.s32.totalorder %v1664_v60, 0  ;;  %v1930_v40 = vadd.s32 10, %v1664_v60 }
 0x11a   : > { %v3039_v36 = vadd.f32 %v967_v33, %v809_v5  ;;  %v3053_v33 = vsub.s32 %v2965_v18, %v1634_v37  ;;  %v1718_v16 = vadd.s32 %v1717_v15, %v1707_v50  ;;  %v1744_v5 = vsel %vm1743_vm0, 1, %v2699_v11  ;;  %v3078_v25 = vpop.f32.mrf.mxu3  ;;  %vm3098_vm6 = vmand %vm1910_vm3, %vm1900_vm2 }
 0x11b   : > { %v1764_v8 = vshll.u32 %v3064_v29, 16  ;;  %v1692_v50 = vmul.u32 10, %v1691_v32  ;;  %v1736_v15 = vshrl.u32 %v3041_v21, 16  ;;  %v1746_v39 = vadd.s32 %v1744_v5, %v1742_v12 }
 0x11c   : > { %v1076_v47 = vpop.f32.mrf.mxu1  ;;  %v1539_v55 = vpop.f32.mrf.mxu0  ;;  %vm1899_vm15 = vcmp.ne.s32.totalorder %v3053_v33, 0  ;;  %v1719_v43 = vadd.s32 %v1718_v16, %v1709_v9  ;;  %vm1909_vm1 = vcmp.lt.s32.totalorder %v3053_v33, 0  ;;  %v1940_v20 = vsel %vm3098_vm6, %v1930_v40, %v1664_v60 }
 0x11d   : > { %v635_v42 = vpop.f32.mrf.mxu2  ;;  %v1101_v34 = vadd.f32 %v1076_v47, %v2951_v54  ;;  %v1929_v54 = vadd.s32 10, %v3053_v33  ;;  %vm1768_vm4 = vc.u32 %v1760_v63, %v1764_v8  ;;  %vm3084_vm5 = vmand %vm1909_vm1, %vm1899_vm15  ;;  %v1747_v27 = vadd.s32 %v1746_v39, %v1736_v15 }
 0x11e   : > { %v647_v38 = vadd.f32 %v635_v42, %v517_v17  ;;  %v1720_v6 = vshrl.u32 %v1719_v43, 3  ;;  %v1770_v17 = vadd.s32 %v1764_v8, %v1760_v63  ;;  %v1765_v62 = vshrl.u32 %v3064_v29, 16 }
 0x11f   : > { %v1939_v9 = vsel %vm3084_vm5, %v1929_v54, %v3053_v33  ;;  %vm3129_vm9 = vcmp.lt.s32.totalorder %v1940_v20, 8 }
 0x120   : > { %v810_v52 = vadd.f32 %v3004_v24, %v647_v38  ;;  %v1758_v24 = vshrl.u32 %v3050_v49, 16  ;;  %v1721_v48 = vmul.u32 10, %v1720_v6  ;;  %vm3115_vm8 = vcmp.lt.s32.totalorder %v1939_v9, 8 }
 0x121   : > { %v3178_v9 = vadd.s32 64, %v2965_v18 }
 0x122   : > { %v3066_v0 = vadd.f32 %v969_v19, %v810_v52  ;;  %v3069_v10 = vmul.u32 52429, %v1758_v24  ;;  %v3075_v19 = vadd.s32 48, %v2965_v18  ;;  %v1763_v26 = vmul.u32 52428, %v1758_v24 }
 0x123   : > { %v3107_v52 = vsub.s32 %v2995_v61, %v1692_v50  ;;  %v3120_v61 = vsub.s32 %v3014_v35, %v1721_v48  ;;  %v3127_v24 = vadd.s32 56, %v2965_v18 }
 0x124   : > { %v1766_v7 = vshll.u32 %v3069_v10, 16  ;;  %v1078_v31 = vpop.f32.mrf.mxu1  ;;  %v1541_v37 = vpop.f32.mrf.mxu0  ;;  %v1786_v21 = vand.u32 65535, %v3075_v19  ;;  %v1787_v57 = vshrl.u32 %v3075_v19, 16 }
 0x125   : > { %v1239_v1 = vpop.f32.mrf.mxu2  ;;  %v1102_v45 = vadd.f32 %v1078_v31, %v2958_v3  ;;  %v1738_v3 = vshrl.u32 %v3043_v2, 16  ;;  %vm1901_vm10 = vcmp.ne.s32.totalorder %v3107_v52, 0  ;;  %vm1911_vm11 = vcmp.lt.s32.totalorder %v3107_v52, 0 }
 0x126   : > { %v1264_v14 = vadd.f32 %v1239_v1, %v1101_v34  ;;  %vm1772_vm7 = vc.u32 %v1770_v17, %v1766_v7  ;;  %v3122_v34 = vmul.u32 52428, %v1786_v21  ;;  %v3136_v32 = vmul.u32 52429, %v1787_v57  ;;  %vm3157_vm14 = vmand %vm1911_vm11, %vm1901_vm10 }
 0x127   : > { %v1773_v23 = vsel %vm1772_vm7, 1, %v2699_v11  ;;  %v1748_v35 = vadd.s32 %v1747_v27, %v1738_v3  ;;  %v1931_v12 = vadd.s32 10, %v3107_v52  ;;  %vm1902_vm12 = vcmp.ne.s32.totalorder %v3120_v61, 0 }
 0x128   : > { %v1435_v22 = vadd.f32 %v3024_v59, %v1264_v14  ;;  %v1769_v59 = vsel %vm1768_vm4, 1, %v2699_v11  ;;  %v3139_v14 = vpop.f32.mrf.mxu3  ;;  %v1789_v5 = vmul.u32 52429, %v1786_v21  ;;  %v1793_v8 = vshll.u32 %v3122_v34, 16 }
 0x129   : > { %v1771_v16 = vadd.s32 %v1769_v59, %v1763_v26  ;;  %v1767_v7 = vshrl.u32 %v3069_v10, 16  ;;  %v1815_v26 = vand.u32 65535, %v3127_v24  ;;  %vm1912_vm13 = vcmp.lt.s32.totalorder %v3120_v61, 0 }
 0x12a   : > { %v1564_v42 = vadd.f32 %v1539_v55, %v1435_v22  ;;  %v1932_v17 = vadd.s32 10, %v3120_v61  ;;  %v1749_v30 = vshrl.u32 %v1748_v35, 3  ;;  %v1816_v31 = vshrl.u32 %v3127_v24, 16  ;;  %vm3184_vm0 = vmand %vm1912_vm13, %vm1902_vm12 }
 0x12b   : > { %v1775_v43 = vadd.s32 %v1773_v23, %v1771_v16  ;;  %v1795_v39 = vshll.u32 %v3136_v32, 16  ;;  %vm3161_vm15 = vc.u32 %v1789_v5, %v1793_v8  ;;  %v1792_v23 = vmul.u32 52428, %v1787_v57 }
 0x12c   : > { %v1578_v47 = vadd.f32 %v3093_v44, %v1564_v42  ;;  %v1081_v63 = vpop.f32.mrf.mxu1  ;;  %v1544_v1 = vpop.f32.mrf.mxu0  ;;  %v1799_v42 = vadd.s32 %v1793_v8, %v1789_v5  ;;  %v3167_v40 = vmul.u32 52429, %v1816_v31  ;;  %v1798_v20 = vsel %vm3161_vm15, 1, %v2699_v11 }
 0x12d   : > { %v1241_v51 = vpop.f32.mrf.mxu2  ;;  %v1103_v29 = vadd.f32 %v1081_v63, %v2960_v13  ;;  %v1776_v22 = vadd.s32 %v1775_v43, %v1765_v62  ;;  %v1821_v62 = vmul.u32 52428, %v1816_v31  ;;  %v1844_v43 = vand.u32 65535, %v3178_v9 }
 0x12e   : > { %v1265_v55 = vadd.f32 %v1241_v51, %v1102_v45  ;;  %v1588_v54 = vmax.f32 %v1578_v47, 0.0  ;;  %v3165_v45 = vmul.u32 52428, %v1815_v26  ;;  %v1818_v47 = vmul.u32 52429, %v1815_v26 }
 0x12f   : > { %v1777_v21 = vadd.s32 %v1776_v22, %v1767_v7  ;;  %vm3197_vm1 = vc.u32 %v1799_v42, %v1795_v39  ;;  %v1824_v57 = vshll.u32 %v3167_v40, 16  ;;  %v1845_v5 = vshrl.u32 %v3178_v9, 16 }
 0x130   : > { %v1436_v2 = vadd.f32 %v3047_v46, %v1265_v55  ;;  %v1822_v33 = vshll.u32 %v3165_v45, 16  ;;  %v3215_v22 = vmul.u32 52428, %v1844_v43  ;;  %v1794_v39 = vshrl.u32 %v3122_v34, 16 }
 0x131   : > { %v1778_v63 = vshrl.u32 %v1777_v21, 3  ;;  %v3217_v26 = vmul.u32 52429, %v1845_v5  ;;  %v1823_v21 = vshrl.u32 %v3165_v45, 16 }
 0x132   : > { %v1565_v46 = vadd.f32 %v1541_v37, %v1436_v2  ;;  %v1979_v37 = vsel %vm3115_vm8, %v1588_v54, 0.0  ;;  %vm1826_vm3 = vc.u32 %v1818_v47, %v1822_v33  ;;  %v1851_v59 = vshll.u32 %v3215_v22, 16 }
 0x134   : > { %v1579_v6 = vadd.f32 %v3093_v44, %v1565_v46  ;;  %v1083_v51 = vpop.f32.mrf.mxu1  ;;  %v1546_v3 = vpop.f32.mrf.mxu0 }
 0x135   : > { %v1244_v13 = vpop.f32.mrf.mxu2  ;;  %v1104_v55 = vadd.f32 %v1083_v51, %v2963_v28  ;;  %v1942_v28 = vsel %vm3184_vm0, %v1932_v17, %v3120_v61  ;;  %v1420_v46 = vpop.f32.mrf.mxu3  ;;  %v1827_v61 = vsel %vm1826_vm3, 1, %v2699_v11  ;;  %v1850_v51 = vmul.u32 52428, %v1845_v5 }
 0x136   : > { %v1589_v50 = vmax.f32 %v1579_v6, 0.0  ;;  %v1266_v15 = vadd.f32 %v1244_v13, %v1103_v29  ;;  %v1800_v29 = vadd.s32 %v1798_v20, %v1792_v23  ;;  %v1847_v6 = vmul.u32 52429, %v1844_v43 }
 0x137   : > { %v1829_v7 = vadd.s32 %v1827_v61, %v1821_v62  ;;  %vm3221_vm5 = vcmp.lt.s32.totalorder %v1942_v28, 8 }
 0x138   : > { %v1980_v38 = vsel %vm3129_vm9, %v1589_v50, 0.0  ;;  %v1437_v48 = vadd.f32 %v3078_v25, %v1266_v15  ;;  %v1941_v25 = vsel %vm3157_vm14, %v1931_v12, %v3107_v52  ;;  %v1750_v52 = vmul.u32 10, %v1749_v30 }
 0x139   : > { %v2552_v16 = vpack.c.bf16 %v1980_v38, %v1979_v37  ;;  %vm3206_vm2 = vcmp.lt.s32.totalorder %v1941_v25, 8  ;;  %v1828_v12 = vadd.s32 %v1822_v33, %v1818_v47  ;;  %v1779_v15 = vmul.u32 10, %v1778_v63 }
 0x13a   : > { %v1566_v60 = vadd.f32 %v1544_v1, %v1437_v48  ;;  %v1802_v1 = vsel %vm3197_vm1, 1, %v2699_v11  ;;  %v3230_v48 = vsub.s32 %v3031_v4, %v1750_v52  ;;  %vm1855_vm6 = vc.u32 %v1847_v6, %v1851_v59 }
 0x13b   : > { %2553 = vst [vmem:[%s3172_s6] sm:$0xff] %v2552_v16   ;;  %vm1830_vm4 = vc.u32 %v1828_v12, %v1824_v57  ;;  %v1804_v10 = vadd.s32 %v1802_v1, %v1800_v29  ;;  %v1856_v34 = vsel %vm1855_vm6, 1, %v2699_v11  ;;  %v1857_v47 = vadd.s32 %v1851_v59, %v1847_v6 }
 0x13c   : > { %v1580_v13 = vadd.f32 %v3093_v44, %v1566_v60  ;;  %v1831_v31 = vsel %vm1830_vm4, 1, %v2699_v11  ;;  %v1086_v37 = vpop.f32.mrf.mxu1  ;;  %v1549_v50 = vpop.f32.mrf.mxu0  ;;  %v1825_v33 = vshrl.u32 %v3167_v40, 16  ;;  %v1858_v57 = vadd.s32 %v1856_v34, %v1850_v51 }
 0x13d   : > { %v1246_v54 = vpop.f32.mrf.mxu2  ;;  %v1105_v38 = vadd.f32 %v1086_v37, %v2974_v41  ;;  %v1833_v16 = vadd.s32 %v1831_v31, %v1829_v7  ;;  %v1796_v41 = vshrl.u32 %v3136_v32, 16  ;;  %v1805_v4 = vadd.s32 %v1804_v10, %v1794_v39  ;;  %v1422_v2 = vpop.f32.mrf.mxu3 }
 0x13e   : > { %v1267_v8 = vadd.f32 %v1246_v54, %v1104_v55  ;;  %v1590_v27 = vmax.f32 %v1580_v13, 0.0  ;;  %v3241_v55 = vadd.s32 72, %v2965_v18  ;;  %vm1903_vm8 = vcmp.ne.s32.totalorder %v3230_v48, 0 }
 0x13f   : > { %v1834_v62 = vadd.s32 %v1833_v16, %v1823_v21  ;;  %vm1913_vm9 = vcmp.lt.s32.totalorder %v3230_v48, 0  ;;  %v1806_v5 = vadd.s32 %v1805_v4, %v1796_v41  ;;  %v1933_v13 = vadd.s32 10, %v3230_v48 }
 0x140   : > { %v1438_v17 = vadd.f32 %v3139_v14, %v1267_v8  ;;  %v1853_v14 = vshll.u32 %v3217_v26, 16  ;;  %v1873_v43 = vand.u32 65535, %v3241_v55  ;;  %v1981_v32 = vsel %vm3206_vm2, %v1590_v27, 0.0  ;;  %vm3266_vm13 = vmand %vm1913_vm9, %vm1903_vm8 }
 0x141   : > { %v1835_v8 = vadd.s32 %v1834_v62, %v1825_v33  ;;  %v1807_v37 = vshrl.u32 %v1806_v5, 3  ;;  %v1854_v10 = vshrl.u32 %v3217_v26, 16  ;;  %v1943_v16 = vsel %vm3266_vm13, %v1933_v13, %v3230_v48 }
 0x142   : > { %v1567_v42 = vadd.f32 %v1546_v3, %v1438_v17  ;;  %v3237_v3 = vsub.s32 %v3050_v49, %v1779_v15  ;;  %vm1859_vm7 = vc.u32 %v1857_v47, %v1853_v14  ;;  %v1874_v49 = vshrl.u32 %v3241_v55, 16 }
 0x143   : > { %v1860_v28 = vsel %vm1859_vm7, 1, %v2699_v11  ;;  %v1876_v54 = vmul.u32 52429, %v1873_v43  ;;  %v1877_v29 = vmul.u32 52428, %v1873_v43  ;;  %v1836_v39 = vshrl.u32 %v1835_v8, 3 }
 0x144   : > { %v1581_v23 = vadd.f32 %v3093_v44, %v1567_v42  ;;  %v1088_v40 = vpop.f32.mrf.mxu1  ;;  %v1551_v63 = vpop.f32.mrf.mxu0  ;;  %v3254_v35 = vmul.u32 52429, %v1874_v49  ;;  %v1862_v1 = vadd.s32 %v1860_v28, %v1858_v57  ;;  %vm1904_vm10 = vcmp.ne.s32.totalorder %v3237_v3, 0 }
 0x145   : > { %v1249_v25 = vpop.f32.mrf.mxu2  ;;  %v1106_v12 = vadd.f32 %v1088_v40, %v2990_v58  ;;  %v1880_v61 = vshll.u32 %v1877_v29, 16  ;;  %vm1914_vm11 = vcmp.lt.s32.totalorder %v3237_v3, 0  ;;  %v1879_v7 = vmul.u32 52428, %v1874_v49  ;;  %v1425_v51 = vpop.f32.mrf.mxu3 }
 0x146   : > { %v1591_v45 = vmax.f32 %v1581_v23, 0.0  ;;  %v1268_v20 = vadd.f32 %v1249_v25, %v1105_v38  ;;  %v1882_v58 = vshll.u32 %v3254_v35, 16  ;;  %v1934_v31 = vadd.s32 10, %v3237_v3  ;;  %vm3272_vm14 = vmand %vm1914_vm11, %vm1904_vm10 }
 0x147   : > { %vm1884_vm12 = vc.u32 %v1876_v54, %v1880_v61  ;;  %v1886_v42 = vadd.s32 %v1880_v61, %v1876_v54  ;;  %v1808_v41 = vmul.u32 10, %v1807_v37  ;;  %v1837_v4 = vmul.u32 10, %v1836_v39 }
 0x148   : > { %v1982_v18 = vsel %vm3221_vm5, %v1591_v45, 0.0  ;;  %v1439_v60 = vadd.f32 %v1420_v46, %v1268_v20  ;;  %v1852_v46 = vshrl.u32 %v3215_v22, 16  ;;  %v1944_v34 = vsel %vm3272_vm14, %v1934_v31, %v3237_v3 }
 0x149   : > { %v2557_v52 = vpack.c.bf16 %v1982_v18, %v1981_v32  ;;  %vm1888_vm15 = vc.u32 %v1886_v42, %v1882_v58  ;;  %v1881_v48 = vshrl.u32 %v1877_v29, 16  ;;  %vm1953_vm0 = vcmp.lt.s32.totalorder %v1943_v16, 8 }
 0x14a   : > { %v1568_v6 = vadd.f32 %v1549_v50, %v1439_v60  ;;  %v1885_v50 = vsel %vm1884_vm12, 1, %v2699_v11  ;;  %v1863_v59 = vadd.s32 %v1862_v1, %v1852_v46  ;;  %v1889_v47 = vsel %vm1888_vm15, 1, %v2699_v11 }
 0x14b   : > { %2577 = vst [vmem:[%s3172_s6 + $0x8] sm:$0xff] %v2557_v52   ;;  %v1887_v21 = vadd.s32 %v1885_v50, %v1879_v7  ;;  %vm1954_vm1 = vcmp.lt.s32.totalorder %v1944_v34, 8  ;;  %v1809_v3 = vsub.s32 %v3075_v19, %v1808_v41  ;;  %v1883_v49 = vshrl.u32 %v3254_v35, 16 }
 0x14c   : > { %v1582_v38 = vadd.f32 %v3093_v44, %v1568_v6  ;;  %v1091_v27 = vpop.f32.mrf.mxu1  ;;  %v1554_v25 = vpop.f32.mrf.mxu0  ;;  %v1864_v45 = vadd.s32 %v1863_v59, %v1854_v10 }
 0x14d   : > { %v1251_v17 = vpop.f32.mrf.mxu2  ;;  %v1107_v26 = vadd.f32 %v1091_v27, %v3011_v53  ;;  %v1838_v53 = vsub.s32 %v3127_v24, %v1837_v4  ;;  %vm1905_vm2 = vcmp.ne.s32.totalorder %v1809_v3, 0  ;;  %vm1915_vm3 = vcmp.lt.s32.totalorder %v1809_v3, 0  ;;  %v1427_v54 = vpop.f32.mrf.mxu3 }
 0x14e   : > { %v1269_v30 = vadd.f32 %v1251_v17, %v1106_v12  ;;  %v1592_v20 = vmax.f32 %v1582_v38, 0.0  ;;  %v1865_v11 = vshrl.u32 %v1864_v45, 3  ;;  %vm3292_vm6 = vmand %vm1915_vm3, %vm1905_vm2  ;;  %v1935_v8 = vadd.s32 10, %v1809_v3 }
 0x14f   : > { %vm1906_vm4 = vcmp.ne.s32.totalorder %v1838_v53, 0  ;;  %vm1916_vm5 = vcmp.lt.s32.totalorder %v1838_v53, 0  ;;  %v1936_v1 = vadd.s32 10, %v1838_v53 }
 0x150   : > { %v1440_v14 = vadd.f32 %v1422_v2, %v1269_v30  ;;  %v1891_v2 = vadd.s32 %v1889_v47, %v1887_v21  ;;  %v1983_v32 = vsel %vm1953_vm0, %v1592_v20, 0.0  ;;  %v1866_v29 = vmul.u32 10, %v1865_v11  ;;  %vm3296_vm7 = vmand %vm1916_vm5, %vm1906_vm4 }
 0x151   : > { %v1945_v58 = vsel %vm3292_vm6, %v1935_v8, %v1809_v3  ;;  %v1946_v30 = vsel %vm3296_vm7, %v1936_v1, %v1838_v53 }
 0x152   : > { %v1569_v23 = vadd.f32 %v1551_v63, %v1440_v14  ;;  %v1892_v28 = vadd.s32 %v1891_v2, %v1881_v48  ;;  %v1867_v61 = vsub.s32 %v3178_v9, %v1866_v29  ;;  %vm1955_vm10 = vcmp.lt.s32.totalorder %v1945_v58, 8 }
 0x153   : > { %vm1956_vm11 = vcmp.lt.s32.totalorder %v1946_v30, 8 }
 0x154   : > { %v1583_v33 = vadd.f32 %v3093_v44, %v1569_v23  ;;  %v1093_v40 = vpop.f32.mrf.mxu1  ;;  %v1893_v19 = vadd.s32 %v1892_v28, %v1883_v49  ;;  %v1556_v24 = vpop.f32.mrf.mxu0  ;;  %vm1907_vm8 = vcmp.ne.s32.totalorder %v1867_v61, 0  ;;  %vm1917_vm9 = vcmp.lt.s32.totalorder %v1867_v61, 0 }
 0x155   : > { %v1254_v62 = vpop.f32.mrf.mxu2  ;;  %v1108_v63 = vadd.f32 %v1093_v40, %v3026_v56  ;;  %v1430_v15 = vpop.f32.mrf.mxu3  ;;  %v1937_v42 = vadd.s32 10, %v1867_v61  ;;  %vm1927_vm12 = vmand %vm1917_vm9, %vm1907_vm8 }
 0x156   : > { %v1593_v57 = vmax.f32 %v1583_v33, 0.0  ;;  %v1270_v43 = vadd.f32 %v1254_v62, %v1107_v26  ;;  %v1894_v13 = vshrl.u32 %v1893_v19, 3 }
 0x157   : > { %v1947_v34 = vsel %vm1927_vm12, %v1937_v42, %v1867_v61 }
 0x158   : > { %v1984_v18 = vsel %vm1954_vm1, %v1593_v57, 0.0  ;;  %v1441_v60 = vadd.f32 %v1425_v51, %v1270_v43  ;;  %v1895_v9 = vmul.u32 10, %v1894_v13  ;;  %vm1957_vm15 = vcmp.lt.s32.totalorder %v1947_v34, 8 }
 0x159   : > { %v2562_v52 = vpack.c.bf16 %v1984_v18, %v1983_v32 }
 0x15a   : > { %v1570_v12 = vadd.f32 %v1554_v25, %v1441_v60 }
 0x15b   : > { %2578 = vst [vmem:[%s3172_s6 + $0x10] sm:$0xff] %v2562_v52  }
 0x15c   : > { %v1584_v6 = vadd.f32 %v3093_v44, %v1570_v12  ;;  %v1096_v17 = vpop.f32.mrf.mxu1  ;;  %v1559_v38 = vpop.f32.mrf.mxu0 }
 0x15d   : > { %v1256_v5 = vpop.f32.mrf.mxu2  ;;  %v1109_v31 = vadd.f32 %v1096_v17, %v3039_v36  ;;  %v1896_v36 = vsub.s32 %v3241_v55, %v1895_v9  ;;  %v1432_v20 = vpop.f32.mrf.mxu3 }
 0x15e   : > { %v1271_v46 = vadd.f32 %v1256_v5, %v1108_v63  ;;  %v1594_v37 = vmax.f32 %v1584_v6, 0.0 }
 0x15f   : > { %vm1908_vm13 = vcmp.ne.s32.totalorder %v1896_v36, 0  ;;  %vm1918_vm14 = vcmp.lt.s32.totalorder %v1896_v36, 0  ;;  %v1938_v45 = vadd.s32 10, %v1896_v36 }
 0x160   : > { %v1442_v7 = vadd.f32 %v1427_v54, %v1271_v46  ;;  %v1985_v14 = vsel %vm1955_vm10, %v1594_v37, 0.0  ;;  %vm1928_vm0 = vmand %vm1918_vm14, %vm1908_vm13 }
 0x161   : > { %v1948_v62 = vsel %vm1928_vm0, %v1938_v45, %v1896_v36 }
 0x162   : > { %v1571_v22 = vadd.f32 %v1556_v24, %v1442_v7  ;;  %vm1958_vm1 = vcmp.lt.s32.totalorder %v1948_v62, 8 }
 0x164   : > { %v1585_v50 = vadd.f32 %v3093_v44, %v1571_v22  ;;  %v1098_v27 = vpop.f32.mrf.mxu1  ;;  %v1561_v48 = vpop.f32.mrf.mxu0 }
 0x165   : > { %v1259_v39 = vpop.f32.mrf.mxu2  ;;  %v1110_v26 = vadd.f32 %v1098_v27, %v3066_v0 }
 0x166   : > { %v1595_v10 = vmax.f32 %v1585_v50, 0.0  ;;  %v1272_v59 = vadd.f32 %v1259_v39, %v1109_v31 }
 0x168   : > { %v1986_v21 = vsel %vm1956_vm11, %v1595_v10, 0.0  ;;  %v1443_v16 = vadd.f32 %v1430_v15, %v1272_v59 }
 0x169   : > { %v2567_v51 = vpack.c.bf16 %v1986_v21, %v1985_v14 }
 0x16a   : > { %v1572_v23 = vadd.f32 %v1559_v38, %v1443_v16 }
 0x16b   : > { %2579 = vst [vmem:[%s3172_s6 + $0x18] sm:$0xff] %v2567_v51  }
 0x16c   : > { %v1586_v47 = vadd.f32 %v3093_v44, %v1572_v23 }
 0x16d   : > { %v1261_v25 = vpop.f32.mrf.mxu2 }
 0x16e   : > { %v1596_v41 = vmax.f32 %v1586_v47, 0.0  ;;  %v1273_v4 = vadd.f32 %v1261_v25, %v1110_v26 }
 0x170   : > { %v1987_v55 = vsel %vm1957_vm15, %v1596_v41, 0.0  ;;  %v1444_v33 = vadd.f32 %v1432_v20, %v1273_v4 }
 0x172   : > { %v1573_v2 = vadd.f32 %v1561_v48, %v1444_v33 }
 0x174   : > { %v1587_v0 = vadd.f32 %v3093_v44, %v1573_v2 }
 0x176   : > { %v1597_v57 = vmax.f32 %v1587_v0, 0.0 }
 0x178   : > { %v1988_v43 = vsel %vm1958_vm1, %v1597_v57, 0.0 }
 0x179   : > { %v2572_v3 = vpack.c.bf16 %v1988_v43, %v1987_v55 }
 0x17b   : > { %2580 = vst [vmem:[%s3172_s6 + $0x20] sm:$0xff] %v2572_v3  }
 0x17c PF: > { %s14_s14 = sadd.s32 1, %s2694_s14   ;;  %s3355_s12 = smov %s2690_s13 }
 0x17d   : > { %p11_p8 = scmp.ge.s32.totalorder %s14_s14, 4   ;;  %s3356_s13 = smov %s3358_s16 }
 0x17f   :  { %13 = sbr.rel (!%p11_p8) target bundleno = 2 (0x2), region = 71 }
 0x184   :  { %2036 = vsyncpa [#allocation3], 1 }
 0x185   :  { %2038 = vsyncpa [#allocation3 + $0x1], 1 }

</bundles_post_ra>
